<compile_context>
chip_gen: v7x
topology: tpu7x:2x2x1
jax: 0.10.0
libtpu: 0.0.40
codegen_flags: <defaults>
</compile_context>

<pallas_src>
import functools

import numpy as np
import jax
import jax.numpy as jnp
from jax import lax
from jax.experimental import pallas as pl
from jax.experimental.pallas import tpu as pltpu

# bf16 operands, f32 accumulation (recommended on v6e/v7x; also fine on v5e).
# Set to jnp.float32 if bit-level parity with the f32 PyTorch reference matters.
_MM_DTYPE = jnp.bfloat16


def _mm(a, b):
    return jnp.dot(a.astype(_MM_DTYPE), b.astype(_MM_DTYPE),
                   preferred_element_type=jnp.float32)


def _layer_norm(x, g, b, eps=1e-5):
    mu = jnp.mean(x, axis=-1, keepdims=True)
    var = jnp.mean((x - mu) ** 2, axis=-1, keepdims=True)
    return (x - mu) * jax.lax.rsqrt(var + eps) * g + b


# ----------------------------------------------------------------------------
# Kernel 1: patch_embed + pos + LN + all transformer layers + patch_deembed.
#   One grid step handles B_blk batch elements; dense matmuls run on the
#   flattened (M = B_blk*N, .) slab.
# ----------------------------------------------------------------------------
def token_kernel(B_blk, N, nh, hd, flatten_out,
                 patches_ref, pe_w_ref, pe_b_ref, pos_ref, lng_ref, lnb_ref,
                 ln1g_ref, ln1b_ref, wqkv_ref, bqkv_ref, wo_ref, bo_ref,
                 ln2g_ref, ln2b_ref, w1_ref, b1_ref, w2_ref, b2_ref,
                 pdw_ref, pdb_ref, o_ref):
    E = nh * hd

    # patch embed: (M, Cin*ps*ps) @ (Cin*ps*ps, E) + b, then +pos, LayerNorm
    x = _mm(patches_ref[0], pe_w_ref[...]) + pe_b_ref[...]
    x = _layer_norm(x + pos_ref[...], lng_ref[...], lnb_ref[...])

    depth = wqkv_ref.shape[0]
    scale = 1.0 / float(hd) ** 0.5

    # depth=2 here: static unroll is fine.
    # TODO(synk): for large depth/E, stream layers via a trailing "arbitrary"
    # grid axis (per-layer index_maps) instead of keeping all weights resident,
    # and switch to lax.fori_loop so vreg live ranges stay bounded.
    for l in range(depth):
        # ---- attention block: x = x + MHA(LN1(x))  (norm_first=True) ----
        h = _layer_norm(x, ln1g_ref[l], ln1b_ref[l])
        qkv = _mm(h, wqkv_ref[l]) + bqkv_ref[l]          # (M, 3E) fused QKV
        q = qkv[:, :E] * scale
        k = qkv[:, E:2 * E]
        v = qkv[:, 2 * E:]

        ctx_rows = []
        for b in range(B_blk):                           # per batch element
            qb = q[b * N:(b + 1) * N]
            kb = k[b * N:(b + 1) * N]
            vb = v[b * N:(b + 1) * N]
            heads = []
            for hI in range(nh):                         # heads = lane chunks
                sl = slice(hI * hd, (hI + 1) * hd)
                s = lax.dot_general(
                    qb[:, sl].astype(_MM_DTYPE), kb[:, sl].astype(_MM_DTYPE),
                    (((1,), (1,)), ((), ())),
                    preferred_element_type=jnp.float32)  # (N, N)
                s = s - jnp.max(s, axis=-1, keepdims=True)
                p = jnp.exp(s)
                p = p * pl.reciprocal(jnp.sum(p, axis=-1, keepdims=True),
                                      approx=True)
                heads.append(jnp.dot(p.astype(_MM_DTYPE),
                                     vb[:, sl].astype(_MM_DTYPE),
                                     preferred_element_type=jnp.float32))
            ctx_rows.append(jnp.concatenate(heads, axis=-1))   # (N, E)
        ctx = ctx_rows[0] if B_blk == 1 else jnp.concatenate(ctx_rows, axis=0)

        x = x + _mm(ctx, wo_ref[l]) + bo_ref[l]          # single K=E out-proj

        # ---- feed-forward block: x = x + W2 relu(W1 LN2(x)) ----
        h2 = _layer_norm(x, ln2g_ref[l], ln2b_ref[l])
        ff = jnp.maximum(_mm(h2, w1_ref[l]) + b1_ref[l], 0.0)
        x = x + _mm(ff, w2_ref[l]) + b2_ref[l]

    # patch de-embed
    y = _mm(x, pdw_ref[...]) + pdb_ref[...]              # (M, Dout)
    if flatten_out:                                      # lane-dense store when Dout < 128
        o_ref[0] = y.reshape(B_blk, N * y.shape[-1])
    else:                                                # Dout >= 128: already lane-dense
        o_ref[0] = y


# ----------------------------------------------------------------------------
# Kernel 2: smooth / smooth2 ResBlock2 chain + residual adds + final skip add.
#   Layout: (B_blk*C, H*W) lane-dense slab; rows ordered (image, channel), so
#   per-row rolls never leak across images and GroupNorm stats are per-row
#   reductions.  Each 3x3 conv = one matmul against a block-diagonal weight on
#   a 9-tap slab staged in VMEM scratch.
# ----------------------------------------------------------------------------
def smooth_kernel(img_w, gs, img_ref, skip_ref, masks_ref, wbig_ref,
                  gng_ref, gnb_ref, o_ref, tap_ref):
    x0 = img_ref[0]                                      # (BC, HW)
    BC, HW = x0.shape
    inv_hw = 1.0 / float(HW)
    offs = [dh * img_w + dw for dh in (-1, 0, 1) for dw in (-1, 0, 1)]

    def group_avg(stat):                                 # (BC,1) -> per-group mean
        if gs == 1:
            return stat
        n_grp = BC // gs
        g = jnp.mean(stat.reshape(n_grp, gs), axis=1, keepdims=True)
        return jnp.broadcast_to(g, (n_grp, gs)).reshape(BC, 1)

    def conv_gn(x, idx):
        # stage the 9 rolled+masked taps into the (9*BC, HW) scratch slab
        for t, off in enumerate(offs):
            sh = x if off == 0 else pltpu.roll(x, shift=(-off) % HW, axis=1)
            tap_ref[pl.ds(t * BC, BC), :] = sh * masks_ref[t]
        # one MXU matmul per conv: (BC, 9*BC) @ (9*BC, HW)
        acc = _mm(wbig_ref[idx], tap_ref[...])
        # GroupNorm: per-(image, group) stats via per-row reduce + tiny group avg
        mu = group_avg(jnp.sum(acc, axis=1, keepdims=True) * inv_hw)
        d = acc - mu
        var = group_avg(jnp.sum(d * d, axis=1, keepdims=True) * inv_hw)
        return d * jax.lax.rsqrt(var + 1e-5) * gng_ref[idx] + gnb_ref[idx]

    def resblock(x, i):
        h = jnp.maximum(conv_gn(x, 2 * i), 0.0)
        return jnp.maximum(conv_gn(h, 2 * i + 1) + x, 0.0)

    x = resblock(x0, 0)            # smooth[0]
    x = resblock(x, 1)             # smooth[1]
    x = x + x0                     # + skip2
    s3 = x
    x = resblock(x, 2)             # smooth2[0]
    x = x + s3                     # + skip3
    o_ref[0] = x + skip_ref[0]     # + skip (x[:, :out_ch])


# ----------------------------------------------------------------------------
# Forward pass (ViTRefiner.forward) — exactly two pallas_calls
# ----------------------------------------------------------------------------
def _const_spec(shape):
    nd = len(shape)
    return pl.BlockSpec(shape, lambda g, _nd=nd: (0,) * _nd)


def _pick_bblk(B, rows_per_elem, target_rows, min_grid=2):
    """Largest per-step batch block <= target rows, keeping >= min_grid steps."""
    bb = max(1, min(B, max(1, target_rows // max(1, rows_per_elem))))
    if B >= min_grid:
        bb = min(bb, max(1, B // min_grid))
    while B % bb:
        bb -= 1
    return bb


def vit_refiner_forward(x, P):
    B, Cin, H, W = x.shape
    ps, E, C = P["ps"], P["E"], P["out_ch"]
    nh = P["num_heads"]
    hd = E // nh
    Hp, Wp = H // ps, W // ps
    N = Hp * Wp
    Din = Cin * ps * ps
    Dout = C * ps * ps
    HW = H * W

    # -------------------- token kernel --------------------
    bb_t = _pick_bblk(B, N, 256)               # fold batch into the matmul M dim
    G = B // bb_t
    M = bb_t * N

    # patchify (== Conv2d(k=ps, stride=ps) im2col), grouped B_blk per grid step
    patches = (x.reshape(B, Cin, Hp, ps, Wp, ps)
                 .transpose(0, 2, 4, 1, 3, 5)
                 .reshape(G, M, Din))
    pos = jnp.tile(P["pos"], (bb_t, 1))        # (M, E)

    flatten_out = Dout < 128                   # lane-dense store for narrow Dout
    if flatten_out:
        out_shape = jax.ShapeDtypeStruct((G, bb_t, N * Dout), jnp.float32)
        out_spec = pl.BlockSpec((1, bb_t, N * Dout), lambda g: (g, 0, 0))
    else:
        out_shape = jax.ShapeDtypeStruct((G, M, Dout), jnp.float32)
        out_spec = pl.BlockSpec((1, M, Dout), lambda g: (g, 0, 0))

    L = P["layers"]
    tok_args = (patches, P["pe_w"], P["pe_b"], pos, P["ln_g"], P["ln_b"],
                L["ln1g"], L["ln1b"], L["wqkv"], L["bqkv"], L["wo"], L["bo"],
                L["ln2g"], L["ln2b"], L["w1"], L["b1"], L["w2"], L["b2"],
                P["pd_w"], P["pd_b"])
    tok_specs = [pl.BlockSpec((1, M, Din), lambda g: (g, 0, 0))]
    tok_specs += [_const_spec(a.shape) for a in tok_args[1:]]

    dee = pl.pallas_call(
        functools.partial(token_kernel, bb_t, N, nh, hd, flatten_out),
        out_shape=out_shape,
        grid=(G,),
        in_specs=tok_specs,
        out_specs=out_spec,
        compiler_params=pltpu.CompilerParams(dimension_semantics=("parallel",)),
    )(*tok_args)

    dee = dee.reshape(B, N, Dout)

    # Fold (non-overlapping patches -> pure rearrangement) to (B, C, H*W)
    img = (dee.reshape(B, Hp, Wp, C, ps, ps)
              .transpose(0, 3, 1, 4, 2, 5)
              .reshape(B, C, HW))
    skip = x[:, :C].reshape(B, C, HW)

    # -------------------- smooth kernel --------------------
    bb_s = _pick_bblk(B, C, 8)                 # fill the 8 vreg sublanes
    Gs = B // bb_s
    BC = bb_s * C

    img_s = img.reshape(Gs, BC, HW)
    skip_s = skip.reshape(Gs, BC, HW)

    # block-diagonal (per image) expansion of the tap-fused conv weights:
    # wbig[x, b*C+co, t*BC + b*C + ci] = conv_w[x, t, co, ci]
    eye = jnp.eye(bb_s, dtype=jnp.float32)
    wbig = jnp.einsum('xtoi,bd->xbotdi', P["conv_w"], eye).reshape(6, BC, 9 * BC)
    gng = jnp.tile(P["gn_g"], (1, bb_s, 1))    # (6, BC, 1)
    gnb = jnp.tile(P["gn_b"], (1, bb_s, 1))

    sm_args = (img_s, skip_s, P["masks"], wbig, gng, gnb)
    slab_spec = pl.BlockSpec((1, BC, HW), lambda g: (g, 0, 0))
    sm_specs = [slab_spec, slab_spec] + [_const_spec(a.shape) for a in sm_args[2:]]

    out = pl.pallas_call(
        functools.partial(smooth_kernel, W, P["gs"]),
        out_shape=jax.ShapeDtypeStruct((Gs, BC, HW), jnp.float32),
        grid=(Gs,),
        in_specs=sm_specs,
        out_specs=slab_spec,
        scratch_shapes=[pltpu.VMEM((9 * BC, HW), jnp.float32)],
        compiler_params=pltpu.CompilerParams(dimension_semantics=("parallel",)),
    )(*sm_args)

    return out.reshape(B, C, H, W)


# ----------------------------------------------------------------------------
# Deterministic parameter init (shapes follow the PyTorch module __init__)
# ----------------------------------------------------------------------------
def _init(key, shape, scale=0.02):
    return scale * jax.random.normal(key, shape, dtype=jnp.float32)


def init_params(key, *, in_ch, out_ch, H, W, ps, E, depth, num_heads,
                mlp_ratio, groups=4):
    keys = iter(jax.random.split(key, 1024))
    nk = lambda: next(keys)
    Hp, Wp = H // ps, W // ps
    N = Hp * Wp
    F = int(E * mlp_ratio)
    C = out_ch
    HW = H * W

    P = dict(ps=ps, E=E, out_ch=out_ch, num_heads=num_heads)

    pe_conv = _init(nk(), (E, in_ch, ps, ps))            # Conv2d weight
    P["pe_w"] = pe_conv.reshape(E, -1).T                 # (in_ch*ps*ps, E)
    P["pe_b"] = _init(nk(), (1, E))
    P["pos"] = _init(nk(), (N, E))
    P["ln_g"] = jnp.ones((1, E), jnp.float32) + _init(nk(), (1, E))
    P["ln_b"] = _init(nk(), (1, E))

    names = ("ln1g", "ln1b", "wqkv", "bqkv", "wo", "bo",
             "ln2g", "ln2b", "w1", "b1", "w2", "b2")
    Ls = {k: [] for k in names}
    for _ in range(depth):
        in_proj = _init(nk(), (3 * E, E))                # MHA in_proj_weight
        in_bias = _init(nk(), (1, 3 * E))
        Wo = _init(nk(), (E, E))                         # out_proj.weight
        W1, W2 = _init(nk(), (F, E)), _init(nk(), (E, F))
        Ls["ln1g"].append(jnp.ones((1, E), jnp.float32) + _init(nk(), (1, E)))
        Ls["ln1b"].append(_init(nk(), (1, E)))
        Ls["wqkv"].append(in_proj.T)                     # (E, 3E), cols [q|k|v] head-major
        Ls["bqkv"].append(in_bias)
        Ls["wo"].append(Wo.T)                            # (E, E)
        Ls["bo"].append(_init(nk(), (1, E)))
        Ls["ln2g"].append(jnp.ones((1, E), jnp.float32) + _init(nk(), (1, E)))
        Ls["ln2b"].append(_init(nk(), (1, E)))
        Ls["w1"].append(W1.T)
        Ls["b1"].append(_init(nk(), (1, F)))
        Ls["w2"].append(W2.T)
        Ls["b2"].append(_init(nk(), (1, E)))
    P["layers"] = {k: jnp.stack(v, axis=0) for k, v in Ls.items()}

    pd = _init(nk(), (C * ps * ps, E))                   # Linear weight
    P["pd_w"] = pd.T                                     # (E, out_ch*ps*ps)
    P["pd_b"] = _init(nk(), (1, C * ps * ps))

    # smooth: 6 convs (3 ResBlock2 x 2), GroupNorm(groups, C)
    conv_w, gn_g, gn_b = [], [], []
    for _ in range(6):
        w = _init(nk(), (C, C, 3, 3), scale=0.1)
        conv_w.append(jnp.transpose(w, (2, 3, 0, 1)).reshape(9, C, C))  # [t, co, ci]
        gn_g.append(jnp.ones((C, 1), jnp.float32) + _init(nk(), (C, 1)))
        gn_b.append(_init(nk(), (C, 1)))
    P["conv_w"] = jnp.stack(conv_w, axis=0)              # (6, 9, C, C)
    P["gn_g"] = jnp.stack(gn_g, axis=0)                  # (6, C, 1)
    P["gn_b"] = jnp.stack(gn_b, axis=0)
    P["gs"] = C // groups                                # channels per group

    # validity masks for the 9 conv taps on the flattened (H*W) axis
    masks = np.zeros((9, 1, HW), np.float32)
    rr = np.arange(H)[:, None]
    cc = np.arange(W)[None, :]
    t = 0
    for dh in (-1, 0, 1):
        for dw in (-1, 0, 1):
            valid = ((rr + dh >= 0) & (rr + dh < H) &
                     (cc + dw >= 0) & (cc + dw < W))
            masks[t, 0] = valid.reshape(-1).astype(np.float32)
            t += 1
    P["masks"] = jnp.asarray(masks)
    return P


# ----------------------------------------------------------------------------
if __name__ == "__main__":
    B, in_ch, out_ch = 4, 6, 4
    H = W = 32
    ps, E, depth, num_heads, mlp_ratio = 8, 32, 2, 4, 4.0

    key = jax.random.PRNGKey(0)
    kx, kp = jax.random.split(key)
    x = jax.random.normal(kx, (B, in_ch, H, W), dtype=jnp.float32)
    P = init_params(kp, in_ch=in_ch, out_ch=out_ch, H=H, W=W, ps=ps, E=E,
                    depth=depth, num_heads=num_heads, mlp_ratio=mlp_ratio,
                    groups=4)

    out = vit_refiner_forward(x, P)
    jax.block_until_ready(out)
    assert out.shape == (B, out_ch, H, W)
    assert bool(jnp.all(jnp.isfinite(out)))
    print("KERNEL_OK")
</pallas_src>

<mosaic_0001>
module attributes {stable_mosaic.version = 11 : i64} {
  func.func @token_kernel(%arg0: i32, %arg1: memref<1x32x384xf32, #tpu.memory_space<vmem>>, %arg2: memref<384x32xf32, #tpu.memory_space<vmem>>, %arg3: memref<1x32xf32, #tpu.memory_space<vmem>>, %arg4: memref<32x32xf32, #tpu.memory_space<vmem>>, %arg5: memref<1x32xf32, #tpu.memory_space<vmem>>, %arg6: memref<1x32xf32, #tpu.memory_space<vmem>>, %arg7: memref<2x1x32xf32, #tpu.memory_space<vmem>>, %arg8: memref<2x1x32xf32, #tpu.memory_space<vmem>>, %arg9: memref<2x32x96xf32, #tpu.memory_space<vmem>>, %arg10: memref<2x1x96xf32, #tpu.memory_space<vmem>>, %arg11: memref<2x32x32xf32, #tpu.memory_space<vmem>>, %arg12: memref<2x1x32xf32, #tpu.memory_space<vmem>>, %arg13: memref<2x1x32xf32, #tpu.memory_space<vmem>>, %arg14: memref<2x1x32xf32, #tpu.memory_space<vmem>>, %arg15: memref<2x32x128xf32, #tpu.memory_space<vmem>>, %arg16: memref<2x1x128xf32, #tpu.memory_space<vmem>>, %arg17: memref<2x128x32xf32, #tpu.memory_space<vmem>>, %arg18: memref<2x1x32xf32, #tpu.memory_space<vmem>>, %arg19: memref<32x256xf32, #tpu.memory_space<vmem>>, %arg20: memref<1x256xf32, #tpu.memory_space<vmem>>, %arg21: memref<1x32x256xf32, #tpu.memory_space<vmem>>) attributes {dimension_semantics = [#tpu.dimension_semantics<parallel>], iteration_bounds = array<i64: 2>, scalar_prefetch = 0 : i64, scratch_operands = 0 : i64, tpu.core_type = #tpu.core_type<tc>, window_params = [{transform_indices = @transform_0, window_bounds = array<i64: 1, 32, 384>}, {pipeline_mode = #tpu.pipeline_mode<synchronous>, transform_indices = @transform_1, window_bounds = array<i64: 384, 32>}, {pipeline_mode = #tpu.pipeline_mode<synchronous>, transform_indices = @transform_2, window_bounds = array<i64: 1, 32>}, {pipeline_mode = #tpu.pipeline_mode<synchronous>, transform_indices = @transform_3, window_bounds = array<i64: 32, 32>}, {pipeline_mode = #tpu.pipeline_mode<synchronous>, transform_indices = @transform_4, window_bounds = array<i64: 1, 32>}, {pipeline_mode = #tpu.pipeline_mode<synchronous>, transform_indices = @transform_5, window_bounds = array<i64: 1, 32>}, {pipeline_mode = #tpu.pipeline_mode<synchronous>, transform_indices = @transform_6, window_bounds = array<i64: 2, 1, 32>}, {pipeline_mode = #tpu.pipeline_mode<synchronous>, transform_indices = @transform_7, window_bounds = array<i64: 2, 1, 32>}, {pipeline_mode = #tpu.pipeline_mode<synchronous>, transform_indices = @transform_8, window_bounds = array<i64: 2, 32, 96>}, {pipeline_mode = #tpu.pipeline_mode<synchronous>, transform_indices = @transform_9, window_bounds = array<i64: 2, 1, 96>}, {pipeline_mode = #tpu.pipeline_mode<synchronous>, transform_indices = @transform_10, window_bounds = array<i64: 2, 32, 32>}, {pipeline_mode = #tpu.pipeline_mode<synchronous>, transform_indices = @transform_11, window_bounds = array<i64: 2, 1, 32>}, {pipeline_mode = #tpu.pipeline_mode<synchronous>, transform_indices = @transform_12, window_bounds = array<i64: 2, 1, 32>}, {pipeline_mode = #tpu.pipeline_mode<synchronous>, transform_indices = @transform_13, window_bounds = array<i64: 2, 1, 32>}, {pipeline_mode = #tpu.pipeline_mode<synchronous>, transform_indices = @transform_14, window_bounds = array<i64: 2, 32, 128>}, {pipeline_mode = #tpu.pipeline_mode<synchronous>, transform_indices = @transform_15, window_bounds = array<i64: 2, 1, 128>}, {pipeline_mode = #tpu.pipeline_mode<synchronous>, transform_indices = @transform_16, window_bounds = array<i64: 2, 128, 32>}, {pipeline_mode = #tpu.pipeline_mode<synchronous>, transform_indices = @transform_17, window_bounds = array<i64: 2, 1, 32>}, {pipeline_mode = #tpu.pipeline_mode<synchronous>, transform_indices = @transform_18, window_bounds = array<i64: 32, 256>}, {pipeline_mode = #tpu.pipeline_mode<synchronous>, transform_indices = @transform_19, window_bounds = array<i64: 1, 256>}, {transform_indices = @transform_20, window_bounds = array<i64: 1, 32, 256>}]} {
    %c0 = arith.constant 0 : index
    %c0_0 = arith.constant 0 : index
    %c0_1 = arith.constant 0 : index
    %0 = vector.load %arg1[%c0, %c0_0, %c0_1] : memref<1x32x384xf32, #tpu.memory_space<vmem>>, vector<1x32x384xf32>
    %1 = vector.shape_cast %0 : vector<1x32x384xf32> to vector<32x384xf32>
    %c0_2 = arith.constant 0 : index
    %c0_3 = arith.constant 0 : index
    %2 = vector.load %arg2[%c0_2, %c0_3] : memref<384x32xf32, #tpu.memory_space<vmem>>, vector<384x32xf32>
    %3 = arith.truncf %1 : vector<32x384xf32> to vector<32x384xbf16>
    %4 = arith.truncf %2 : vector<384x32xf32> to vector<384x32xbf16>
    %cst = arith.constant dense<0.000000e+00> : vector<32x32xf32>
    %5 = tpu.matmul %3, %4, %cst {dimension_numbers = #tpu.dot_dimension_numbers<[1], [0], [0], [1], [0, 0, 1, 1], [], []>} : vector<32x384xbf16>, vector<384x32xbf16>, vector<32x32xf32> -> vector<32x32xf32>
    %c0_4 = arith.constant 0 : index
    %c0_5 = arith.constant 0 : index
    %6 = vector.load %arg3[%c0_4, %c0_5] : memref<1x32xf32, #tpu.memory_space<vmem>>, vector<1x32xf32>
    %7 = vector.broadcast %6 : vector<1x32xf32> to vector<32x32xf32>
    %8 = arith.addf %5, %7 : vector<32x32xf32>
    %c0_6 = arith.constant 0 : index
    %c0_7 = arith.constant 0 : index
    %9 = vector.load %arg4[%c0_6, %c0_7] : memref<32x32xf32, #tpu.memory_space<vmem>>, vector<32x32xf32>
    %10 = arith.addf %8, %9 : vector<32x32xf32>
    %c0_8 = arith.constant 0 : index
    %c0_9 = arith.constant 0 : index
    %11 = vector.load %arg5[%c0_8, %c0_9] : memref<1x32xf32, #tpu.memory_space<vmem>>, vector<1x32xf32>
    %c0_10 = arith.constant 0 : index
    %c0_11 = arith.constant 0 : index
    %12 = vector.load %arg6[%c0_10, %c0_11] : memref<1x32xf32, #tpu.memory_space<vmem>>, vector<1x32xf32>
    %cst_12 = arith.constant dense<0.000000e+00> : vector<32xf32>
    %13 = vector.multi_reduction <add>, %10, %cst_12 [1] : vector<32x32xf32> to vector<32xf32>
    %14 = vector.shape_cast %13 : vector<32xf32> to vector<32x1xf32>
    %cst_13 = arith.constant 3.200000e+01 : f32
    %15 = vector.broadcast %cst_13 : f32 to vector<32x1xf32>
    %16 = arith.divf %14, %15 : vector<32x1xf32>
    %17 = vector.broadcast %16 : vector<32x1xf32> to vector<32x32xf32>
    %18 = arith.subf %10, %17 : vector<32x32xf32>
    %19 = arith.mulf %18, %18 : vector<32x32xf32>
    %cst_14 = arith.constant dense<0.000000e+00> : vector<32xf32>
    %20 = vector.multi_reduction <add>, %19, %cst_14 [1] : vector<32x32xf32> to vector<32xf32>
    %21 = vector.shape_cast %20 : vector<32xf32> to vector<32x1xf32>
    %cst_15 = arith.constant 3.200000e+01 : f32
    %22 = vector.broadcast %cst_15 : f32 to vector<32x1xf32>
    %23 = arith.divf %21, %22 : vector<32x1xf32>
    %24 = vector.broadcast %16 : vector<32x1xf32> to vector<32x32xf32>
    %25 = arith.subf %10, %24 : vector<32x32xf32>
    %cst_16 = arith.constant 9.99999974E-6 : f32
    %26 = vector.broadcast %cst_16 : f32 to vector<32x1xf32>
    %27 = arith.addf %23, %26 : vector<32x1xf32>
    %28 = math.rsqrt %27 : vector<32x1xf32>
    %29 = vector.broadcast %28 : vector<32x1xf32> to vector<32x32xf32>
    %30 = arith.mulf %25, %29 : vector<32x32xf32>
    %31 = vector.broadcast %11 : vector<1x32xf32> to vector<32x32xf32>
    %32 = arith.mulf %30, %31 : vector<32x32xf32>
    %33 = vector.broadcast %12 : vector<1x32xf32> to vector<32x32xf32>
    %34 = arith.addf %32, %33 : vector<32x32xf32>
    %c0_17 = arith.constant 0 : index
    %c0_18 = arith.constant 0 : index
    %c0_19 = arith.constant 0 : index
    %35 = vector.load %arg7[%c0_17, %c0_18, %c0_19] : memref<2x1x32xf32, #tpu.memory_space<vmem>>, vector<1x1x32xf32>
    %36 = vector.shape_cast %35 : vector<1x1x32xf32> to vector<1x32xf32>
    %c0_20 = arith.constant 0 : index
    %c0_21 = arith.constant 0 : index
    %c0_22 = arith.constant 0 : index
    %37 = vector.load %arg8[%c0_20, %c0_21, %c0_22] : memref<2x1x32xf32, #tpu.memory_space<vmem>>, vector<1x1x32xf32>
    %38 = vector.shape_cast %37 : vector<1x1x32xf32> to vector<1x32xf32>
    %cst_23 = arith.constant dense<0.000000e+00> : vector<32xf32>
    %39 = vector.multi_reduction <add>, %34, %cst_23 [1] : vector<32x32xf32> to vector<32xf32>
    %40 = vector.shape_cast %39 : vector<32xf32> to vector<32x1xf32>
    %cst_24 = arith.constant 3.200000e+01 : f32
    %41 = vector.broadcast %cst_24 : f32 to vector<32x1xf32>
    %42 = arith.divf %40, %41 : vector<32x1xf32>
    %43 = vector.broadcast %42 : vector<32x1xf32> to vector<32x32xf32>
    %44 = arith.subf %34, %43 : vector<32x32xf32>
    %45 = arith.mulf %44, %44 : vector<32x32xf32>
    %cst_25 = arith.constant dense<0.000000e+00> : vector<32xf32>
    %46 = vector.multi_reduction <add>, %45, %cst_25 [1] : vector<32x32xf32> to vector<32xf32>
    %47 = vector.shape_cast %46 : vector<32xf32> to vector<32x1xf32>
    %cst_26 = arith.constant 3.200000e+01 : f32
    %48 = vector.broadcast %cst_26 : f32 to vector<32x1xf32>
    %49 = arith.divf %47, %48 : vector<32x1xf32>
    %50 = vector.broadcast %42 : vector<32x1xf32> to vector<32x32xf32>
    %51 = arith.subf %34, %50 : vector<32x32xf32>
    %cst_27 = arith.constant 9.99999974E-6 : f32
    %52 = vector.broadcast %cst_27 : f32 to vector<32x1xf32>
    %53 = arith.addf %49, %52 : vector<32x1xf32>
    %54 = math.rsqrt %53 : vector<32x1xf32>
    %55 = vector.broadcast %54 : vector<32x1xf32> to vector<32x32xf32>
    %56 = arith.mulf %51, %55 : vector<32x32xf32>
    %57 = vector.broadcast %36 : vector<1x32xf32> to vector<32x32xf32>
    %58 = arith.mulf %56, %57 : vector<32x32xf32>
    %59 = vector.broadcast %38 : vector<1x32xf32> to vector<32x32xf32>
    %60 = arith.addf %58, %59 : vector<32x32xf32>
    %c0_28 = arith.constant 0 : index
    %c0_29 = arith.constant 0 : index
    %c0_30 = arith.constant 0 : index
    %61 = vector.load %arg9[%c0_28, %c0_29, %c0_30] : memref<2x32x96xf32, #tpu.memory_space<vmem>>, vector<1x32x96xf32>
    %62 = vector.shape_cast %61 : vector<1x32x96xf32> to vector<32x96xf32>
    %63 = arith.truncf %60 : vector<32x32xf32> to vector<32x32xbf16>
    %64 = arith.truncf %62 : vector<32x96xf32> to vector<32x96xbf16>
    %cst_31 = arith.constant dense<0.000000e+00> : vector<32x96xf32>
    %65 = tpu.matmul %63, %64, %cst_31 {dimension_numbers = #tpu.dot_dimension_numbers<[1], [0], [0], [1], [0, 0, 1, 1], [], []>} : vector<32x32xbf16>, vector<32x96xbf16>, vector<32x96xf32> -> vector<32x96xf32>
    %c0_32 = arith.constant 0 : index
    %c0_33 = arith.constant 0 : index
    %c0_34 = arith.constant 0 : index
    %66 = vector.load %arg10[%c0_32, %c0_33, %c0_34] : memref<2x1x96xf32, #tpu.memory_space<vmem>>, vector<1x1x96xf32>
    %67 = vector.shape_cast %66 : vector<1x1x96xf32> to vector<1x96xf32>
    %68 = vector.broadcast %67 : vector<1x96xf32> to vector<32x96xf32>
    %69 = arith.addf %65, %68 : vector<32x96xf32>
    %70 = vector.extract_strided_slice %69 {offsets = [0, 0], sizes = [32, 32], strides = [1, 1]} : vector<32x96xf32> to vector<32x32xf32>
    %cst_35 = arith.constant 0.353553385 : f32
    %71 = vector.broadcast %cst_35 : f32 to vector<32x32xf32>
    %72 = arith.mulf %70, %71 : vector<32x32xf32>
    %73 = vector.extract_strided_slice %69 {offsets = [0, 32], sizes = [32, 32], strides = [1, 1]} : vector<32x96xf32> to vector<32x32xf32>
    %74 = vector.extract_strided_slice %69 {offsets = [0, 64], sizes = [32, 32], strides = [1, 1]} : vector<32x96xf32> to vector<32x32xf32>
    %75 = vector.extract_strided_slice %72 {offsets = [0, 0], sizes = [16, 32], strides = [1, 1]} : vector<32x32xf32> to vector<16x32xf32>
    %76 = vector.extract_strided_slice %73 {offsets = [0, 0], sizes = [16, 32], strides = [1, 1]} : vector<32x32xf32> to vector<16x32xf32>
    %77 = vector.extract_strided_slice %74 {offsets = [0, 0], sizes = [16, 32], strides = [1, 1]} : vector<32x32xf32> to vector<16x32xf32>
    %78 = vector.extract_strided_slice %75 {offsets = [0, 0], sizes = [16, 8], strides = [1, 1]} : vector<16x32xf32> to vector<16x8xf32>
    %79 = arith.truncf %78 : vector<16x8xf32> to vector<16x8xbf16>
    %80 = vector.extract_strided_slice %76 {offsets = [0, 0], sizes = [16, 8], strides = [1, 1]} : vector<16x32xf32> to vector<16x8xf32>
    %81 = arith.truncf %80 : vector<16x8xf32> to vector<16x8xbf16>
    %cst_36 = arith.constant dense<0.000000e+00> : vector<16x16xf32>
    %82 = tpu.matmul %79, %81, %cst_36 {dimension_numbers = #tpu.dot_dimension_numbers<[1], [1], [0], [0], [0, 0, 1, 0], [], []>} : vector<16x8xbf16>, vector<16x8xbf16>, vector<16x16xf32> -> vector<16x16xf32>
    %cst_37 = arith.constant dense<0xFF800000> : vector<16xf32>
    %83 = vector.multi_reduction <maximumf>, %82, %cst_37 [1] : vector<16x16xf32> to vector<16xf32>
    %84 = vector.shape_cast %83 : vector<16xf32> to vector<16x1xf32>
    %85 = vector.broadcast %84 : vector<16x1xf32> to vector<16x16xf32>
    %86 = arith.subf %82, %85 : vector<16x16xf32>
    %87 = math.exp %86 : vector<16x16xf32>
    %cst_38 = arith.constant dense<0.000000e+00> : vector<16xf32>
    %88 = vector.multi_reduction <add>, %87, %cst_38 [1] : vector<16x16xf32> to vector<16xf32>
    %89 = vector.shape_cast %88 : vector<16xf32> to vector<16x1xf32>
    %90 = tpu.reciprocal %89 {approx = true} : vector<16x1xf32> -> vector<16x1xf32>
    %91 = vector.broadcast %90 : vector<16x1xf32> to vector<16x16xf32>
    %92 = arith.mulf %87, %91 : vector<16x16xf32>
    %93 = arith.truncf %92 : vector<16x16xf32> to vector<16x16xbf16>
    %94 = vector.extract_strided_slice %77 {offsets = [0, 0], sizes = [16, 8], strides = [1, 1]} : vector<16x32xf32> to vector<16x8xf32>
    %95 = arith.truncf %94 : vector<16x8xf32> to vector<16x8xbf16>
    %cst_39 = arith.constant dense<0.000000e+00> : vector<16x8xf32>
    %96 = tpu.matmul %93, %95, %cst_39 {dimension_numbers = #tpu.dot_dimension_numbers<[1], [0], [0], [1], [0, 0, 1, 1], [], []>} : vector<16x16xbf16>, vector<16x8xbf16>, vector<16x8xf32> -> vector<16x8xf32>
    %97 = vector.extract_strided_slice %75 {offsets = [0, 8], sizes = [16, 8], strides = [1, 1]} : vector<16x32xf32> to vector<16x8xf32>
    %98 = arith.truncf %97 : vector<16x8xf32> to vector<16x8xbf16>
    %99 = vector.extract_strided_slice %76 {offsets = [0, 8], sizes = [16, 8], strides = [1, 1]} : vector<16x32xf32> to vector<16x8xf32>
    %100 = arith.truncf %99 : vector<16x8xf32> to vector<16x8xbf16>
    %cst_40 = arith.constant dense<0.000000e+00> : vector<16x16xf32>
    %101 = tpu.matmul %98, %100, %cst_40 {dimension_numbers = #tpu.dot_dimension_numbers<[1], [1], [0], [0], [0, 0, 1, 0], [], []>} : vector<16x8xbf16>, vector<16x8xbf16>, vector<16x16xf32> -> vector<16x16xf32>
    %cst_41 = arith.constant dense<0xFF800000> : vector<16xf32>
    %102 = vector.multi_reduction <maximumf>, %101, %cst_41 [1] : vector<16x16xf32> to vector<16xf32>
    %103 = vector.shape_cast %102 : vector<16xf32> to vector<16x1xf32>
    %104 = vector.broadcast %103 : vector<16x1xf32> to vector<16x16xf32>
    %105 = arith.subf %101, %104 : vector<16x16xf32>
    %106 = math.exp %105 : vector<16x16xf32>
    %cst_42 = arith.constant dense<0.000000e+00> : vector<16xf32>
    %107 = vector.multi_reduction <add>, %106, %cst_42 [1] : vector<16x16xf32> to vector<16xf32>
    %108 = vector.shape_cast %107 : vector<16xf32> to vector<16x1xf32>
    %109 = tpu.reciprocal %108 {approx = true} : vector<16x1xf32> -> vector<16x1xf32>
    %110 = vector.broadcast %109 : vector<16x1xf32> to vector<16x16xf32>
    %111 = arith.mulf %106, %110 : vector<16x16xf32>
    %112 = arith.truncf %111 : vector<16x16xf32> to vector<16x16xbf16>
    %113 = vector.extract_strided_slice %77 {offsets = [0, 8], sizes = [16, 8], strides = [1, 1]} : vector<16x32xf32> to vector<16x8xf32>
    %114 = arith.truncf %113 : vector<16x8xf32> to vector<16x8xbf16>
    %cst_43 = arith.constant dense<0.000000e+00> : vector<16x8xf32>
    %115 = tpu.matmul %112, %114, %cst_43 {dimension_numbers = #tpu.dot_dimension_numbers<[1], [0], [0], [1], [0, 0, 1, 1], [], []>} : vector<16x16xbf16>, vector<16x8xbf16>, vector<16x8xf32> -> vector<16x8xf32>
    %116 = vector.extract_strided_slice %75 {offsets = [0, 16], sizes = [16, 8], strides = [1, 1]} : vector<16x32xf32> to vector<16x8xf32>
    %117 = arith.truncf %116 : vector<16x8xf32> to vector<16x8xbf16>
    %118 = vector.extract_strided_slice %76 {offsets = [0, 16], sizes = [16, 8], strides = [1, 1]} : vector<16x32xf32> to vector<16x8xf32>
    %119 = arith.truncf %118 : vector<16x8xf32> to vector<16x8xbf16>
    %cst_44 = arith.constant dense<0.000000e+00> : vector<16x16xf32>
    %120 = tpu.matmul %117, %119, %cst_44 {dimension_numbers = #tpu.dot_dimension_numbers<[1], [1], [0], [0], [0, 0, 1, 0], [], []>} : vector<16x8xbf16>, vector<16x8xbf16>, vector<16x16xf32> -> vector<16x16xf32>
    %cst_45 = arith.constant dense<0xFF800000> : vector<16xf32>
    %121 = vector.multi_reduction <maximumf>, %120, %cst_45 [1] : vector<16x16xf32> to vector<16xf32>
    %122 = vector.shape_cast %121 : vector<16xf32> to vector<16x1xf32>
    %123 = vector.broadcast %122 : vector<16x1xf32> to vector<16x16xf32>
    %124 = arith.subf %120, %123 : vector<16x16xf32>
    %125 = math.exp %124 : vector<16x16xf32>
    %cst_46 = arith.constant dense<0.000000e+00> : vector<16xf32>
    %126 = vector.multi_reduction <add>, %125, %cst_46 [1] : vector<16x16xf32> to vector<16xf32>
    %127 = vector.shape_cast %126 : vector<16xf32> to vector<16x1xf32>
    %128 = tpu.reciprocal %127 {approx = true} : vector<16x1xf32> -> vector<16x1xf32>
    %129 = vector.broadcast %128 : vector<16x1xf32> to vector<16x16xf32>
    %130 = arith.mulf %125, %129 : vector<16x16xf32>
    %131 = arith.truncf %130 : vector<16x16xf32> to vector<16x16xbf16>
    %132 = vector.extract_strided_slice %77 {offsets = [0, 16], sizes = [16, 8], strides = [1, 1]} : vector<16x32xf32> to vector<16x8xf32>
    %133 = arith.truncf %132 : vector<16x8xf32> to vector<16x8xbf16>
    %cst_47 = arith.constant dense<0.000000e+00> : vector<16x8xf32>
    %134 = tpu.matmul %131, %133, %cst_47 {dimension_numbers = #tpu.dot_dimension_numbers<[1], [0], [0], [1], [0, 0, 1, 1], [], []>} : vector<16x16xbf16>, vector<16x8xbf16>, vector<16x8xf32> -> vector<16x8xf32>
    %135 = vector.extract_strided_slice %75 {offsets = [0, 24], sizes = [16, 8], strides = [1, 1]} : vector<16x32xf32> to vector<16x8xf32>
    %136 = arith.truncf %135 : vector<16x8xf32> to vector<16x8xbf16>
    %137 = vector.extract_strided_slice %76 {offsets = [0, 24], sizes = [16, 8], strides = [1, 1]} : vector<16x32xf32> to vector<16x8xf32>
    %138 = arith.truncf %137 : vector<16x8xf32> to vector<16x8xbf16>
    %cst_48 = arith.constant dense<0.000000e+00> : vector<16x16xf32>
    %139 = tpu.matmul %136, %138, %cst_48 {dimension_numbers = #tpu.dot_dimension_numbers<[1], [1], [0], [0], [0, 0, 1, 0], [], []>} : vector<16x8xbf16>, vector<16x8xbf16>, vector<16x16xf32> -> vector<16x16xf32>
    %cst_49 = arith.constant dense<0xFF800000> : vector<16xf32>
    %140 = vector.multi_reduction <maximumf>, %139, %cst_49 [1] : vector<16x16xf32> to vector<16xf32>
    %141 = vector.shape_cast %140 : vector<16xf32> to vector<16x1xf32>
    %142 = vector.broadcast %141 : vector<16x1xf32> to vector<16x16xf32>
    %143 = arith.subf %139, %142 : vector<16x16xf32>
    %144 = math.exp %143 : vector<16x16xf32>
    %cst_50 = arith.constant dense<0.000000e+00> : vector<16xf32>
    %145 = vector.multi_reduction <add>, %144, %cst_50 [1] : vector<16x16xf32> to vector<16xf32>
    %146 = vector.shape_cast %145 : vector<16xf32> to vector<16x1xf32>
    %147 = tpu.reciprocal %146 {approx = true} : vector<16x1xf32> -> vector<16x1xf32>
    %148 = vector.broadcast %147 : vector<16x1xf32> to vector<16x16xf32>
    %149 = arith.mulf %144, %148 : vector<16x16xf32>
    %150 = arith.truncf %149 : vector<16x16xf32> to vector<16x16xbf16>
    %151 = vector.extract_strided_slice %77 {offsets = [0, 24], sizes = [16, 8], strides = [1, 1]} : vector<16x32xf32> to vector<16x8xf32>
    %152 = arith.truncf %151 : vector<16x8xf32> to vector<16x8xbf16>
    %cst_51 = arith.constant dense<0.000000e+00> : vector<16x8xf32>
    %153 = tpu.matmul %150, %152, %cst_51 {dimension_numbers = #tpu.dot_dimension_numbers<[1], [0], [0], [1], [0, 0, 1, 1], [], []>} : vector<16x16xbf16>, vector<16x8xbf16>, vector<16x8xf32> -> vector<16x8xf32>
    %154 = tpu.concatenate %96, %115, %134, %153 in 1 : vector<16x8xf32>, vector<16x8xf32>, vector<16x8xf32>, vector<16x8xf32> -> vector<16x32xf32>
    %155 = vector.extract_strided_slice %72 {offsets = [16, 0], sizes = [16, 32], strides = [1, 1]} : vector<32x32xf32> to vector<16x32xf32>
    %156 = vector.extract_strided_slice %73 {offsets = [16, 0], sizes = [16, 32], strides = [1, 1]} : vector<32x32xf32> to vector<16x32xf32>
    %157 = vector.extract_strided_slice %74 {offsets = [16, 0], sizes = [16, 32], strides = [1, 1]} : vector<32x32xf32> to vector<16x32xf32>
    %158 = vector.extract_strided_slice %155 {offsets = [0, 0], sizes = [16, 8], strides = [1, 1]} : vector<16x32xf32> to vector<16x8xf32>
    %159 = arith.truncf %158 : vector<16x8xf32> to vector<16x8xbf16>
    %160 = vector.extract_strided_slice %156 {offsets = [0, 0], sizes = [16, 8], strides = [1, 1]} : vector<16x32xf32> to vector<16x8xf32>
    %161 = arith.truncf %160 : vector<16x8xf32> to vector<16x8xbf16>
    %cst_52 = arith.constant dense<0.000000e+00> : vector<16x16xf32>
    %162 = tpu.matmul %159, %161, %cst_52 {dimension_numbers = #tpu.dot_dimension_numbers<[1], [1], [0], [0], [0, 0, 1, 0], [], []>} : vector<16x8xbf16>, vector<16x8xbf16>, vector<16x16xf32> -> vector<16x16xf32>
    %cst_53 = arith.constant dense<0xFF800000> : vector<16xf32>
    %163 = vector.multi_reduction <maximumf>, %162, %cst_53 [1] : vector<16x16xf32> to vector<16xf32>
    %164 = vector.shape_cast %163 : vector<16xf32> to vector<16x1xf32>
    %165 = vector.broadcast %164 : vector<16x1xf32> to vector<16x16xf32>
    %166 = arith.subf %162, %165 : vector<16x16xf32>
    %167 = math.exp %166 : vector<16x16xf32>
    %cst_54 = arith.constant dense<0.000000e+00> : vector<16xf32>
    %168 = vector.multi_reduction <add>, %167, %cst_54 [1] : vector<16x16xf32> to vector<16xf32>
    %169 = vector.shape_cast %168 : vector<16xf32> to vector<16x1xf32>
    %170 = tpu.reciprocal %169 {approx = true} : vector<16x1xf32> -> vector<16x1xf32>
    %171 = vector.broadcast %170 : vector<16x1xf32> to vector<16x16xf32>
    %172 = arith.mulf %167, %171 : vector<16x16xf32>
    %173 = arith.truncf %172 : vector<16x16xf32> to vector<16x16xbf16>
    %174 = vector.extract_strided_slice %157 {offsets = [0, 0], sizes = [16, 8], strides = [1, 1]} : vector<16x32xf32> to vector<16x8xf32>
    %175 = arith.truncf %174 : vector<16x8xf32> to vector<16x8xbf16>
    %cst_55 = arith.constant dense<0.000000e+00> : vector<16x8xf32>
    %176 = tpu.matmul %173, %175, %cst_55 {dimension_numbers = #tpu.dot_dimension_numbers<[1], [0], [0], [1], [0, 0, 1, 1], [], []>} : vector<16x16xbf16>, vector<16x8xbf16>, vector<16x8xf32> -> vector<16x8xf32>
    %177 = vector.extract_strided_slice %155 {offsets = [0, 8], sizes = [16, 8], strides = [1, 1]} : vector<16x32xf32> to vector<16x8xf32>
    %178 = arith.truncf %177 : vector<16x8xf32> to vector<16x8xbf16>
    %179 = vector.extract_strided_slice %156 {offsets = [0, 8], sizes = [16, 8], strides = [1, 1]} : vector<16x32xf32> to vector<16x8xf32>
    %180 = arith.truncf %179 : vector<16x8xf32> to vector<16x8xbf16>
    %cst_56 = arith.constant dense<0.000000e+00> : vector<16x16xf32>
    %181 = tpu.matmul %178, %180, %cst_56 {dimension_numbers = #tpu.dot_dimension_numbers<[1], [1], [0], [0], [0, 0, 1, 0], [], []>} : vector<16x8xbf16>, vector<16x8xbf16>, vector<16x16xf32> -> vector<16x16xf32>
    %cst_57 = arith.constant dense<0xFF800000> : vector<16xf32>
    %182 = vector.multi_reduction <maximumf>, %181, %cst_57 [1] : vector<16x16xf32> to vector<16xf32>
    %183 = vector.shape_cast %182 : vector<16xf32> to vector<16x1xf32>
    %184 = vector.broadcast %183 : vector<16x1xf32> to vector<16x16xf32>
    %185 = arith.subf %181, %184 : vector<16x16xf32>
    %186 = math.exp %185 : vector<16x16xf32>
    %cst_58 = arith.constant dense<0.000000e+00> : vector<16xf32>
    %187 = vector.multi_reduction <add>, %186, %cst_58 [1] : vector<16x16xf32> to vector<16xf32>
    %188 = vector.shape_cast %187 : vector<16xf32> to vector<16x1xf32>
    %189 = tpu.reciprocal %188 {approx = true} : vector<16x1xf32> -> vector<16x1xf32>
    %190 = vector.broadcast %189 : vector<16x1xf32> to vector<16x16xf32>
    %191 = arith.mulf %186, %190 : vector<16x16xf32>
    %192 = arith.truncf %191 : vector<16x16xf32> to vector<16x16xbf16>
    %193 = vector.extract_strided_slice %157 {offsets = [0, 8], sizes = [16, 8], strides = [1, 1]} : vector<16x32xf32> to vector<16x8xf32>
    %194 = arith.truncf %193 : vector<16x8xf32> to vector<16x8xbf16>
    %cst_59 = arith.constant dense<0.000000e+00> : vector<16x8xf32>
    %195 = tpu.matmul %192, %194, %cst_59 {dimension_numbers = #tpu.dot_dimension_numbers<[1], [0], [0], [1], [0, 0, 1, 1], [], []>} : vector<16x16xbf16>, vector<16x8xbf16>, vector<16x8xf32> -> vector<16x8xf32>
    %196 = vector.extract_strided_slice %155 {offsets = [0, 16], sizes = [16, 8], strides = [1, 1]} : vector<16x32xf32> to vector<16x8xf32>
    %197 = arith.truncf %196 : vector<16x8xf32> to vector<16x8xbf16>
    %198 = vector.extract_strided_slice %156 {offsets = [0, 16], sizes = [16, 8], strides = [1, 1]} : vector<16x32xf32> to vector<16x8xf32>
    %199 = arith.truncf %198 : vector<16x8xf32> to vector<16x8xbf16>
    %cst_60 = arith.constant dense<0.000000e+00> : vector<16x16xf32>
    %200 = tpu.matmul %197, %199, %cst_60 {dimension_numbers = #tpu.dot_dimension_numbers<[1], [1], [0], [0], [0, 0, 1, 0], [], []>} : vector<16x8xbf16>, vector<16x8xbf16>, vector<16x16xf32> -> vector<16x16xf32>
    %cst_61 = arith.constant dense<0xFF800000> : vector<16xf32>
    %201 = vector.multi_reduction <maximumf>, %200, %cst_61 [1] : vector<16x16xf32> to vector<16xf32>
    %202 = vector.shape_cast %201 : vector<16xf32> to vector<16x1xf32>
    %203 = vector.broadcast %202 : vector<16x1xf32> to vector<16x16xf32>
    %204 = arith.subf %200, %203 : vector<16x16xf32>
    %205 = math.exp %204 : vector<16x16xf32>
    %cst_62 = arith.constant dense<0.000000e+00> : vector<16xf32>
    %206 = vector.multi_reduction <add>, %205, %cst_62 [1] : vector<16x16xf32> to vector<16xf32>
    %207 = vector.shape_cast %206 : vector<16xf32> to vector<16x1xf32>
    %208 = tpu.reciprocal %207 {approx = true} : vector<16x1xf32> -> vector<16x1xf32>
    %209 = vector.broadcast %208 : vector<16x1xf32> to vector<16x16xf32>
    %210 = arith.mulf %205, %209 : vector<16x16xf32>
    %211 = arith.truncf %210 : vector<16x16xf32> to vector<16x16xbf16>
    %212 = vector.extract_strided_slice %157 {offsets = [0, 16], sizes = [16, 8], strides = [1, 1]} : vector<16x32xf32> to vector<16x8xf32>
    %213 = arith.truncf %212 : vector<16x8xf32> to vector<16x8xbf16>
    %cst_63 = arith.constant dense<0.000000e+00> : vector<16x8xf32>
    %214 = tpu.matmul %211, %213, %cst_63 {dimension_numbers = #tpu.dot_dimension_numbers<[1], [0], [0], [1], [0, 0, 1, 1], [], []>} : vector<16x16xbf16>, vector<16x8xbf16>, vector<16x8xf32> -> vector<16x8xf32>
    %215 = vector.extract_strided_slice %155 {offsets = [0, 24], sizes = [16, 8], strides = [1, 1]} : vector<16x32xf32> to vector<16x8xf32>
    %216 = arith.truncf %215 : vector<16x8xf32> to vector<16x8xbf16>
    %217 = vector.extract_strided_slice %156 {offsets = [0, 24], sizes = [16, 8], strides = [1, 1]} : vector<16x32xf32> to vector<16x8xf32>
    %218 = arith.truncf %217 : vector<16x8xf32> to vector<16x8xbf16>
    %cst_64 = arith.constant dense<0.000000e+00> : vector<16x16xf32>
    %219 = tpu.matmul %216, %218, %cst_64 {dimension_numbers = #tpu.dot_dimension_numbers<[1], [1], [0], [0], [0, 0, 1, 0], [], []>} : vector<16x8xbf16>, vector<16x8xbf16>, vector<16x16xf32> -> vector<16x16xf32>
    %cst_65 = arith.constant dense<0xFF800000> : vector<16xf32>
    %220 = vector.multi_reduction <maximumf>, %219, %cst_65 [1] : vector<16x16xf32> to vector<16xf32>
    %221 = vector.shape_cast %220 : vector<16xf32> to vector<16x1xf32>
    %222 = vector.broadcast %221 : vector<16x1xf32> to vector<16x16xf32>
    %223 = arith.subf %219, %222 : vector<16x16xf32>
    %224 = math.exp %223 : vector<16x16xf32>
    %cst_66 = arith.constant dense<0.000000e+00> : vector<16xf32>
    %225 = vector.multi_reduction <add>, %224, %cst_66 [1] : vector<16x16xf32> to vector<16xf32>
    %226 = vector.shape_cast %225 : vector<16xf32> to vector<16x1xf32>
    %227 = tpu.reciprocal %226 {approx = true} : vector<16x1xf32> -> vector<16x1xf32>
    %228 = vector.broadcast %227 : vector<16x1xf32> to vector<16x16xf32>
    %229 = arith.mulf %224, %228 : vector<16x16xf32>
    %230 = arith.truncf %229 : vector<16x16xf32> to vector<16x16xbf16>
    %231 = vector.extract_strided_slice %157 {offsets = [0, 24], sizes = [16, 8], strides = [1, 1]} : vector<16x32xf32> to vector<16x8xf32>
    %232 = arith.truncf %231 : vector<16x8xf32> to vector<16x8xbf16>
    %cst_67 = arith.constant dense<0.000000e+00> : vector<16x8xf32>
    %233 = tpu.matmul %230, %232, %cst_67 {dimension_numbers = #tpu.dot_dimension_numbers<[1], [0], [0], [1], [0, 0, 1, 1], [], []>} : vector<16x16xbf16>, vector<16x8xbf16>, vector<16x8xf32> -> vector<16x8xf32>
    %234 = tpu.concatenate %176, %195, %214, %233 in 1 : vector<16x8xf32>, vector<16x8xf32>, vector<16x8xf32>, vector<16x8xf32> -> vector<16x32xf32>
    %235 = tpu.concatenate %154, %234 in 0 : vector<16x32xf32>, vector<16x32xf32> -> vector<32x32xf32>
    %c0_68 = arith.constant 0 : index
    %c0_69 = arith.constant 0 : index
    %c0_70 = arith.constant 0 : index
    %236 = vector.load %arg11[%c0_68, %c0_69, %c0_70] : memref<2x32x32xf32, #tpu.memory_space<vmem>>, vector<1x32x32xf32>
    %237 = vector.shape_cast %236 : vector<1x32x32xf32> to vector<32x32xf32>
    %238 = arith.truncf %235 : vector<32x32xf32> to vector<32x32xbf16>
    %239 = arith.truncf %237 : vector<32x32xf32> to vector<32x32xbf16>
    %cst_71 = arith.constant dense<0.000000e+00> : vector<32x32xf32>
    %240 = tpu.matmul %238, %239, %cst_71 {dimension_numbers = #tpu.dot_dimension_numbers<[1], [0], [0], [1], [0, 0, 1, 1], [], []>} : vector<32x32xbf16>, vector<32x32xbf16>, vector<32x32xf32> -> vector<32x32xf32>
    %241 = arith.addf %34, %240 : vector<32x32xf32>
    %c0_72 = arith.constant 0 : index
    %c0_73 = arith.constant 0 : index
    %c0_74 = arith.constant 0 : index
    %242 = vector.load %arg12[%c0_72, %c0_73, %c0_74] : memref<2x1x32xf32, #tpu.memory_space<vmem>>, vector<1x1x32xf32>
    %243 = vector.shape_cast %242 : vector<1x1x32xf32> to vector<1x32xf32>
    %244 = vector.broadcast %243 : vector<1x32xf32> to vector<32x32xf32>
    %245 = arith.addf %241, %244 : vector<32x32xf32>
    %c0_75 = arith.constant 0 : index
    %c0_76 = arith.constant 0 : index
    %c0_77 = arith.constant 0 : index
    %246 = vector.load %arg13[%c0_75, %c0_76, %c0_77] : memref<2x1x32xf32, #tpu.memory_space<vmem>>, vector<1x1x32xf32>
    %247 = vector.shape_cast %246 : vector<1x1x32xf32> to vector<1x32xf32>
    %c0_78 = arith.constant 0 : index
    %c0_79 = arith.constant 0 : index
    %c0_80 = arith.constant 0 : index
    %248 = vector.load %arg14[%c0_78, %c0_79, %c0_80] : memref<2x1x32xf32, #tpu.memory_space<vmem>>, vector<1x1x32xf32>
    %249 = vector.shape_cast %248 : vector<1x1x32xf32> to vector<1x32xf32>
    %cst_81 = arith.constant dense<0.000000e+00> : vector<32xf32>
    %250 = vector.multi_reduction <add>, %245, %cst_81 [1] : vector<32x32xf32> to vector<32xf32>
    %251 = vector.shape_cast %250 : vector<32xf32> to vector<32x1xf32>
    %cst_82 = arith.constant 3.200000e+01 : f32
    %252 = vector.broadcast %cst_82 : f32 to vector<32x1xf32>
    %253 = arith.divf %251, %252 : vector<32x1xf32>
    %254 = vector.broadcast %253 : vector<32x1xf32> to vector<32x32xf32>
    %255 = arith.subf %245, %254 : vector<32x32xf32>
    %256 = arith.mulf %255, %255 : vector<32x32xf32>
    %cst_83 = arith.constant dense<0.000000e+00> : vector<32xf32>
    %257 = vector.multi_reduction <add>, %256, %cst_83 [1] : vector<32x32xf32> to vector<32xf32>
    %258 = vector.shape_cast %257 : vector<32xf32> to vector<32x1xf32>
    %cst_84 = arith.constant 3.200000e+01 : f32
    %259 = vector.broadcast %cst_84 : f32 to vector<32x1xf32>
    %260 = arith.divf %258, %259 : vector<32x1xf32>
    %261 = vector.broadcast %253 : vector<32x1xf32> to vector<32x32xf32>
    %262 = arith.subf %245, %261 : vector<32x32xf32>
    %cst_85 = arith.constant 9.99999974E-6 : f32
    %263 = vector.broadcast %cst_85 : f32 to vector<32x1xf32>
    %264 = arith.addf %260, %263 : vector<32x1xf32>
    %265 = math.rsqrt %264 : vector<32x1xf32>
    %266 = vector.broadcast %265 : vector<32x1xf32> to vector<32x32xf32>
    %267 = arith.mulf %262, %266 : vector<32x32xf32>
    %268 = vector.broadcast %247 : vector<1x32xf32> to vector<32x32xf32>
    %269 = arith.mulf %267, %268 : vector<32x32xf32>
    %270 = vector.broadcast %249 : vector<1x32xf32> to vector<32x32xf32>
    %271 = arith.addf %269, %270 : vector<32x32xf32>
    %c0_86 = arith.constant 0 : index
    %c0_87 = arith.constant 0 : index
    %c0_88 = arith.constant 0 : index
    %272 = vector.load %arg15[%c0_86, %c0_87, %c0_88] : memref<2x32x128xf32, #tpu.memory_space<vmem>>, vector<1x32x128xf32>
    %273 = vector.shape_cast %272 : vector<1x32x128xf32> to vector<32x128xf32>
    %274 = arith.truncf %271 : vector<32x32xf32> to vector<32x32xbf16>
    %275 = arith.truncf %273 : vector<32x128xf32> to vector<32x128xbf16>
    %cst_89 = arith.constant dense<0.000000e+00> : vector<32x128xf32>
    %276 = tpu.matmul %274, %275, %cst_89 {dimension_numbers = #tpu.dot_dimension_numbers<[1], [0], [0], [1], [0, 0, 1, 1], [], []>} : vector<32x32xbf16>, vector<32x128xbf16>, vector<32x128xf32> -> vector<32x128xf32>
    %c0_90 = arith.constant 0 : index
    %c0_91 = arith.constant 0 : index
    %c0_92 = arith.constant 0 : index
    %277 = vector.load %arg16[%c0_90, %c0_91, %c0_92] : memref<2x1x128xf32, #tpu.memory_space<vmem>>, vector<1x1x128xf32>
    %278 = vector.shape_cast %277 : vector<1x1x128xf32> to vector<1x128xf32>
    %279 = vector.broadcast %278 : vector<1x128xf32> to vector<32x128xf32>
    %280 = arith.addf %276, %279 : vector<32x128xf32>
    %cst_93 = arith.constant 0.000000e+00 : f32
    %281 = vector.broadcast %cst_93 : f32 to vector<32x128xf32>
    %282 = arith.maximumf %280, %281 : vector<32x128xf32>
    %c0_94 = arith.constant 0 : index
    %c0_95 = arith.constant 0 : index
    %c0_96 = arith.constant 0 : index
    %283 = vector.load %arg17[%c0_94, %c0_95, %c0_96] : memref<2x128x32xf32, #tpu.memory_space<vmem>>, vector<1x128x32xf32>
    %284 = vector.shape_cast %283 : vector<1x128x32xf32> to vector<128x32xf32>
    %285 = arith.truncf %282 : vector<32x128xf32> to vector<32x128xbf16>
    %286 = arith.truncf %284 : vector<128x32xf32> to vector<128x32xbf16>
    %cst_97 = arith.constant dense<0.000000e+00> : vector<32x32xf32>
    %287 = tpu.matmul %285, %286, %cst_97 {dimension_numbers = #tpu.dot_dimension_numbers<[1], [0], [0], [1], [0, 0, 1, 1], [], []>} : vector<32x128xbf16>, vector<128x32xbf16>, vector<32x32xf32> -> vector<32x32xf32>
    %288 = arith.addf %245, %287 : vector<32x32xf32>
    %c0_98 = arith.constant 0 : index
    %c0_99 = arith.constant 0 : index
    %c0_100 = arith.constant 0 : index
    %289 = vector.load %arg18[%c0_98, %c0_99, %c0_100] : memref<2x1x32xf32, #tpu.memory_space<vmem>>, vector<1x1x32xf32>
    %290 = vector.shape_cast %289 : vector<1x1x32xf32> to vector<1x32xf32>
    %291 = vector.broadcast %290 : vector<1x32xf32> to vector<32x32xf32>
    %292 = arith.addf %288, %291 : vector<32x32xf32>
    %c1 = arith.constant 1 : index
    %c0_101 = arith.constant 0 : index
    %c0_102 = arith.constant 0 : index
    %293 = vector.load %arg7[%c1, %c0_101, %c0_102] : memref<2x1x32xf32, #tpu.memory_space<vmem>>, vector<1x1x32xf32>
    %294 = vector.shape_cast %293 : vector<1x1x32xf32> to vector<1x32xf32>
    %c1_103 = arith.constant 1 : index
    %c0_104 = arith.constant 0 : index
    %c0_105 = arith.constant 0 : index
    %295 = vector.load %arg8[%c1_103, %c0_104, %c0_105] : memref<2x1x32xf32, #tpu.memory_space<vmem>>, vector<1x1x32xf32>
    %296 = vector.shape_cast %295 : vector<1x1x32xf32> to vector<1x32xf32>
    %cst_106 = arith.constant dense<0.000000e+00> : vector<32xf32>
    %297 = vector.multi_reduction <add>, %292, %cst_106 [1] : vector<32x32xf32> to vector<32xf32>
    %298 = vector.shape_cast %297 : vector<32xf32> to vector<32x1xf32>
    %cst_107 = arith.constant 3.200000e+01 : f32
    %299 = vector.broadcast %cst_107 : f32 to vector<32x1xf32>
    %300 = arith.divf %298, %299 : vector<32x1xf32>
    %301 = vector.broadcast %300 : vector<32x1xf32> to vector<32x32xf32>
    %302 = arith.subf %292, %301 : vector<32x32xf32>
    %303 = arith.mulf %302, %302 : vector<32x32xf32>
    %cst_108 = arith.constant dense<0.000000e+00> : vector<32xf32>
    %304 = vector.multi_reduction <add>, %303, %cst_108 [1] : vector<32x32xf32> to vector<32xf32>
    %305 = vector.shape_cast %304 : vector<32xf32> to vector<32x1xf32>
    %cst_109 = arith.constant 3.200000e+01 : f32
    %306 = vector.broadcast %cst_109 : f32 to vector<32x1xf32>
    %307 = arith.divf %305, %306 : vector<32x1xf32>
    %308 = vector.broadcast %300 : vector<32x1xf32> to vector<32x32xf32>
    %309 = arith.subf %292, %308 : vector<32x32xf32>
    %cst_110 = arith.constant 9.99999974E-6 : f32
    %310 = vector.broadcast %cst_110 : f32 to vector<32x1xf32>
    %311 = arith.addf %307, %310 : vector<32x1xf32>
    %312 = math.rsqrt %311 : vector<32x1xf32>
    %313 = vector.broadcast %312 : vector<32x1xf32> to vector<32x32xf32>
    %314 = arith.mulf %309, %313 : vector<32x32xf32>
    %315 = vector.broadcast %294 : vector<1x32xf32> to vector<32x32xf32>
    %316 = arith.mulf %314, %315 : vector<32x32xf32>
    %317 = vector.broadcast %296 : vector<1x32xf32> to vector<32x32xf32>
    %318 = arith.addf %316, %317 : vector<32x32xf32>
    %c1_111 = arith.constant 1 : index
    %c0_112 = arith.constant 0 : index
    %c0_113 = arith.constant 0 : index
    %319 = vector.load %arg9[%c1_111, %c0_112, %c0_113] : memref<2x32x96xf32, #tpu.memory_space<vmem>>, vector<1x32x96xf32>
    %320 = vector.shape_cast %319 : vector<1x32x96xf32> to vector<32x96xf32>
    %321 = arith.truncf %318 : vector<32x32xf32> to vector<32x32xbf16>
    %322 = arith.truncf %320 : vector<32x96xf32> to vector<32x96xbf16>
    %cst_114 = arith.constant dense<0.000000e+00> : vector<32x96xf32>
    %323 = tpu.matmul %321, %322, %cst_114 {dimension_numbers = #tpu.dot_dimension_numbers<[1], [0], [0], [1], [0, 0, 1, 1], [], []>} : vector<32x32xbf16>, vector<32x96xbf16>, vector<32x96xf32> -> vector<32x96xf32>
    %c1_115 = arith.constant 1 : index
    %c0_116 = arith.constant 0 : index
    %c0_117 = arith.constant 0 : index
    %324 = vector.load %arg10[%c1_115, %c0_116, %c0_117] : memref<2x1x96xf32, #tpu.memory_space<vmem>>, vector<1x1x96xf32>
    %325 = vector.shape_cast %324 : vector<1x1x96xf32> to vector<1x96xf32>
    %326 = vector.broadcast %325 : vector<1x96xf32> to vector<32x96xf32>
    %327 = arith.addf %323, %326 : vector<32x96xf32>
    %328 = vector.extract_strided_slice %327 {offsets = [0, 0], sizes = [32, 32], strides = [1, 1]} : vector<32x96xf32> to vector<32x32xf32>
    %cst_118 = arith.constant 0.353553385 : f32
    %329 = vector.broadcast %cst_118 : f32 to vector<32x32xf32>
    %330 = arith.mulf %328, %329 : vector<32x32xf32>
    %331 = vector.extract_strided_slice %327 {offsets = [0, 32], sizes = [32, 32], strides = [1, 1]} : vector<32x96xf32> to vector<32x32xf32>
    %332 = vector.extract_strided_slice %327 {offsets = [0, 64], sizes = [32, 32], strides = [1, 1]} : vector<32x96xf32> to vector<32x32xf32>
    %333 = vector.extract_strided_slice %330 {offsets = [0, 0], sizes = [16, 32], strides = [1, 1]} : vector<32x32xf32> to vector<16x32xf32>
    %334 = vector.extract_strided_slice %331 {offsets = [0, 0], sizes = [16, 32], strides = [1, 1]} : vector<32x32xf32> to vector<16x32xf32>
    %335 = vector.extract_strided_slice %332 {offsets = [0, 0], sizes = [16, 32], strides = [1, 1]} : vector<32x32xf32> to vector<16x32xf32>
    %336 = vector.extract_strided_slice %333 {offsets = [0, 0], sizes = [16, 8], strides = [1, 1]} : vector<16x32xf32> to vector<16x8xf32>
    %337 = arith.truncf %336 : vector<16x8xf32> to vector<16x8xbf16>
    %338 = vector.extract_strided_slice %334 {offsets = [0, 0], sizes = [16, 8], strides = [1, 1]} : vector<16x32xf32> to vector<16x8xf32>
    %339 = arith.truncf %338 : vector<16x8xf32> to vector<16x8xbf16>
    %cst_119 = arith.constant dense<0.000000e+00> : vector<16x16xf32>
    %340 = tpu.matmul %337, %339, %cst_119 {dimension_numbers = #tpu.dot_dimension_numbers<[1], [1], [0], [0], [0, 0, 1, 0], [], []>} : vector<16x8xbf16>, vector<16x8xbf16>, vector<16x16xf32> -> vector<16x16xf32>
    %cst_120 = arith.constant dense<0xFF800000> : vector<16xf32>
    %341 = vector.multi_reduction <maximumf>, %340, %cst_120 [1] : vector<16x16xf32> to vector<16xf32>
    %342 = vector.shape_cast %341 : vector<16xf32> to vector<16x1xf32>
    %343 = vector.broadcast %342 : vector<16x1xf32> to vector<16x16xf32>
    %344 = arith.subf %340, %343 : vector<16x16xf32>
    %345 = math.exp %344 : vector<16x16xf32>
    %cst_121 = arith.constant dense<0.000000e+00> : vector<16xf32>
    %346 = vector.multi_reduction <add>, %345, %cst_121 [1] : vector<16x16xf32> to vector<16xf32>
    %347 = vector.shape_cast %346 : vector<16xf32> to vector<16x1xf32>
    %348 = tpu.reciprocal %347 {approx = true} : vector<16x1xf32> -> vector<16x1xf32>
    %349 = vector.broadcast %348 : vector<16x1xf32> to vector<16x16xf32>
    %350 = arith.mulf %345, %349 : vector<16x16xf32>
    %351 = arith.truncf %350 : vector<16x16xf32> to vector<16x16xbf16>
    %352 = vector.extract_strided_slice %335 {offsets = [0, 0], sizes = [16, 8], strides = [1, 1]} : vector<16x32xf32> to vector<16x8xf32>
    %353 = arith.truncf %352 : vector<16x8xf32> to vector<16x8xbf16>
    %cst_122 = arith.constant dense<0.000000e+00> : vector<16x8xf32>
    %354 = tpu.matmul %351, %353, %cst_122 {dimension_numbers = #tpu.dot_dimension_numbers<[1], [0], [0], [1], [0, 0, 1, 1], [], []>} : vector<16x16xbf16>, vector<16x8xbf16>, vector<16x8xf32> -> vector<16x8xf32>
    %355 = vector.extract_strided_slice %333 {offsets = [0, 8], sizes = [16, 8], strides = [1, 1]} : vector<16x32xf32> to vector<16x8xf32>
    %356 = arith.truncf %355 : vector<16x8xf32> to vector<16x8xbf16>
    %357 = vector.extract_strided_slice %334 {offsets = [0, 8], sizes = [16, 8], strides = [1, 1]} : vector<16x32xf32> to vector<16x8xf32>
    %358 = arith.truncf %357 : vector<16x8xf32> to vector<16x8xbf16>
    %cst_123 = arith.constant dense<0.000000e+00> : vector<16x16xf32>
    %359 = tpu.matmul %356, %358, %cst_123 {dimension_numbers = #tpu.dot_dimension_numbers<[1], [1], [0], [0], [0, 0, 1, 0], [], []>} : vector<16x8xbf16>, vector<16x8xbf16>, vector<16x16xf32> -> vector<16x16xf32>
    %cst_124 = arith.constant dense<0xFF800000> : vector<16xf32>
    %360 = vector.multi_reduction <maximumf>, %359, %cst_124 [1] : vector<16x16xf32> to vector<16xf32>
    %361 = vector.shape_cast %360 : vector<16xf32> to vector<16x1xf32>
    %362 = vector.broadcast %361 : vector<16x1xf32> to vector<16x16xf32>
    %363 = arith.subf %359, %362 : vector<16x16xf32>
    %364 = math.exp %363 : vector<16x16xf32>
    %cst_125 = arith.constant dense<0.000000e+00> : vector<16xf32>
    %365 = vector.multi_reduction <add>, %364, %cst_125 [1] : vector<16x16xf32> to vector<16xf32>
    %366 = vector.shape_cast %365 : vector<16xf32> to vector<16x1xf32>
    %367 = tpu.reciprocal %366 {approx = true} : vector<16x1xf32> -> vector<16x1xf32>
    %368 = vector.broadcast %367 : vector<16x1xf32> to vector<16x16xf32>
    %369 = arith.mulf %364, %368 : vector<16x16xf32>
    %370 = arith.truncf %369 : vector<16x16xf32> to vector<16x16xbf16>
    %371 = vector.extract_strided_slice %335 {offsets = [0, 8], sizes = [16, 8], strides = [1, 1]} : vector<16x32xf32> to vector<16x8xf32>
    %372 = arith.truncf %371 : vector<16x8xf32> to vector<16x8xbf16>
    %cst_126 = arith.constant dense<0.000000e+00> : vector<16x8xf32>
    %373 = tpu.matmul %370, %372, %cst_126 {dimension_numbers = #tpu.dot_dimension_numbers<[1], [0], [0], [1], [0, 0, 1, 1], [], []>} : vector<16x16xbf16>, vector<16x8xbf16>, vector<16x8xf32> -> vector<16x8xf32>
    %374 = vector.extract_strided_slice %333 {offsets = [0, 16], sizes = [16, 8], strides = [1, 1]} : vector<16x32xf32> to vector<16x8xf32>
    %375 = arith.truncf %374 : vector<16x8xf32> to vector<16x8xbf16>
    %376 = vector.extract_strided_slice %334 {offsets = [0, 16], sizes = [16, 8], strides = [1, 1]} : vector<16x32xf32> to vector<16x8xf32>
    %377 = arith.truncf %376 : vector<16x8xf32> to vector<16x8xbf16>
    %cst_127 = arith.constant dense<0.000000e+00> : vector<16x16xf32>
    %378 = tpu.matmul %375, %377, %cst_127 {dimension_numbers = #tpu.dot_dimension_numbers<[1], [1], [0], [0], [0, 0, 1, 0], [], []>} : vector<16x8xbf16>, vector<16x8xbf16>, vector<16x16xf32> -> vector<16x16xf32>
    %cst_128 = arith.constant dense<0xFF800000> : vector<16xf32>
    %379 = vector.multi_reduction <maximumf>, %378, %cst_128 [1] : vector<16x16xf32> to vector<16xf32>
    %380 = vector.shape_cast %379 : vector<16xf32> to vector<16x1xf32>
    %381 = vector.broadcast %380 : vector<16x1xf32> to vector<16x16xf32>
    %382 = arith.subf %378, %381 : vector<16x16xf32>
    %383 = math.exp %382 : vector<16x16xf32>
    %cst_129 = arith.constant dense<0.000000e+00> : vector<16xf32>
    %384 = vector.multi_reduction <add>, %383, %cst_129 [1] : vector<16x16xf32> to vector<16xf32>
    %385 = vector.shape_cast %384 : vector<16xf32> to vector<16x1xf32>
    %386 = tpu.reciprocal %385 {approx = true} : vector<16x1xf32> -> vector<16x1xf32>
    %387 = vector.broadcast %386 : vector<16x1xf32> to vector<16x16xf32>
    %388 = arith.mulf %383, %387 : vector<16x16xf32>
    %389 = arith.truncf %388 : vector<16x16xf32> to vector<16x16xbf16>
    %390 = vector.extract_strided_slice %335 {offsets = [0, 16], sizes = [16, 8], strides = [1, 1]} : vector<16x32xf32> to vector<16x8xf32>
    %391 = arith.truncf %390 : vector<16x8xf32> to vector<16x8xbf16>
    %cst_130 = arith.constant dense<0.000000e+00> : vector<16x8xf32>
    %392 = tpu.matmul %389, %391, %cst_130 {dimension_numbers = #tpu.dot_dimension_numbers<[1], [0], [0], [1], [0, 0, 1, 1], [], []>} : vector<16x16xbf16>, vector<16x8xbf16>, vector<16x8xf32> -> vector<16x8xf32>
    %393 = vector.extract_strided_slice %333 {offsets = [0, 24], sizes = [16, 8], strides = [1, 1]} : vector<16x32xf32> to vector<16x8xf32>
    %394 = arith.truncf %393 : vector<16x8xf32> to vector<16x8xbf16>
    %395 = vector.extract_strided_slice %334 {offsets = [0, 24], sizes = [16, 8], strides = [1, 1]} : vector<16x32xf32> to vector<16x8xf32>
    %396 = arith.truncf %395 : vector<16x8xf32> to vector<16x8xbf16>
    %cst_131 = arith.constant dense<0.000000e+00> : vector<16x16xf32>
    %397 = tpu.matmul %394, %396, %cst_131 {dimension_numbers = #tpu.dot_dimension_numbers<[1], [1], [0], [0], [0, 0, 1, 0], [], []>} : vector<16x8xbf16>, vector<16x8xbf16>, vector<16x16xf32> -> vector<16x16xf32>
    %cst_132 = arith.constant dense<0xFF800000> : vector<16xf32>
    %398 = vector.multi_reduction <maximumf>, %397, %cst_132 [1] : vector<16x16xf32> to vector<16xf32>
    %399 = vector.shape_cast %398 : vector<16xf32> to vector<16x1xf32>
    %400 = vector.broadcast %399 : vector<16x1xf32> to vector<16x16xf32>
    %401 = arith.subf %397, %400 : vector<16x16xf32>
    %402 = math.exp %401 : vector<16x16xf32>
    %cst_133 = arith.constant dense<0.000000e+00> : vector<16xf32>
    %403 = vector.multi_reduction <add>, %402, %cst_133 [1] : vector<16x16xf32> to vector<16xf32>
    %404 = vector.shape_cast %403 : vector<16xf32> to vector<16x1xf32>
    %405 = tpu.reciprocal %404 {approx = true} : vector<16x1xf32> -> vector<16x1xf32>
    %406 = vector.broadcast %405 : vector<16x1xf32> to vector<16x16xf32>
    %407 = arith.mulf %402, %406 : vector<16x16xf32>
    %408 = arith.truncf %407 : vector<16x16xf32> to vector<16x16xbf16>
    %409 = vector.extract_strided_slice %335 {offsets = [0, 24], sizes = [16, 8], strides = [1, 1]} : vector<16x32xf32> to vector<16x8xf32>
    %410 = arith.truncf %409 : vector<16x8xf32> to vector<16x8xbf16>
    %cst_134 = arith.constant dense<0.000000e+00> : vector<16x8xf32>
    %411 = tpu.matmul %408, %410, %cst_134 {dimension_numbers = #tpu.dot_dimension_numbers<[1], [0], [0], [1], [0, 0, 1, 1], [], []>} : vector<16x16xbf16>, vector<16x8xbf16>, vector<16x8xf32> -> vector<16x8xf32>
    %412 = tpu.concatenate %354, %373, %392, %411 in 1 : vector<16x8xf32>, vector<16x8xf32>, vector<16x8xf32>, vector<16x8xf32> -> vector<16x32xf32>
    %413 = vector.extract_strided_slice %330 {offsets = [16, 0], sizes = [16, 32], strides = [1, 1]} : vector<32x32xf32> to vector<16x32xf32>
    %414 = vector.extract_strided_slice %331 {offsets = [16, 0], sizes = [16, 32], strides = [1, 1]} : vector<32x32xf32> to vector<16x32xf32>
    %415 = vector.extract_strided_slice %332 {offsets = [16, 0], sizes = [16, 32], strides = [1, 1]} : vector<32x32xf32> to vector<16x32xf32>
    %416 = vector.extract_strided_slice %413 {offsets = [0, 0], sizes = [16, 8], strides = [1, 1]} : vector<16x32xf32> to vector<16x8xf32>
    %417 = arith.truncf %416 : vector<16x8xf32> to vector<16x8xbf16>
    %418 = vector.extract_strided_slice %414 {offsets = [0, 0], sizes = [16, 8], strides = [1, 1]} : vector<16x32xf32> to vector<16x8xf32>
    %419 = arith.truncf %418 : vector<16x8xf32> to vector<16x8xbf16>
    %cst_135 = arith.constant dense<0.000000e+00> : vector<16x16xf32>
    %420 = tpu.matmul %417, %419, %cst_135 {dimension_numbers = #tpu.dot_dimension_numbers<[1], [1], [0], [0], [0, 0, 1, 0], [], []>} : vector<16x8xbf16>, vector<16x8xbf16>, vector<16x16xf32> -> vector<16x16xf32>
    %cst_136 = arith.constant dense<0xFF800000> : vector<16xf32>
    %421 = vector.multi_reduction <maximumf>, %420, %cst_136 [1] : vector<16x16xf32> to vector<16xf32>
    %422 = vector.shape_cast %421 : vector<16xf32> to vector<16x1xf32>
    %423 = vector.broadcast %422 : vector<16x1xf32> to vector<16x16xf32>
    %424 = arith.subf %420, %423 : vector<16x16xf32>
    %425 = math.exp %424 : vector<16x16xf32>
    %cst_137 = arith.constant dense<0.000000e+00> : vector<16xf32>
    %426 = vector.multi_reduction <add>, %425, %cst_137 [1] : vector<16x16xf32> to vector<16xf32>
    %427 = vector.shape_cast %426 : vector<16xf32> to vector<16x1xf32>
    %428 = tpu.reciprocal %427 {approx = true} : vector<16x1xf32> -> vector<16x1xf32>
    %429 = vector.broadcast %428 : vector<16x1xf32> to vector<16x16xf32>
    %430 = arith.mulf %425, %429 : vector<16x16xf32>
    %431 = arith.truncf %430 : vector<16x16xf32> to vector<16x16xbf16>
    %432 = vector.extract_strided_slice %415 {offsets = [0, 0], sizes = [16, 8], strides = [1, 1]} : vector<16x32xf32> to vector<16x8xf32>
    %433 = arith.truncf %432 : vector<16x8xf32> to vector<16x8xbf16>
    %cst_138 = arith.constant dense<0.000000e+00> : vector<16x8xf32>
    %434 = tpu.matmul %431, %433, %cst_138 {dimension_numbers = #tpu.dot_dimension_numbers<[1], [0], [0], [1], [0, 0, 1, 1], [], []>} : vector<16x16xbf16>, vector<16x8xbf16>, vector<16x8xf32> -> vector<16x8xf32>
    %435 = vector.extract_strided_slice %413 {offsets = [0, 8], sizes = [16, 8], strides = [1, 1]} : vector<16x32xf32> to vector<16x8xf32>
    %436 = arith.truncf %435 : vector<16x8xf32> to vector<16x8xbf16>
    %437 = vector.extract_strided_slice %414 {offsets = [0, 8], sizes = [16, 8], strides = [1, 1]} : vector<16x32xf32> to vector<16x8xf32>
    %438 = arith.truncf %437 : vector<16x8xf32> to vector<16x8xbf16>
    %cst_139 = arith.constant dense<0.000000e+00> : vector<16x16xf32>
    %439 = tpu.matmul %436, %438, %cst_139 {dimension_numbers = #tpu.dot_dimension_numbers<[1], [1], [0], [0], [0, 0, 1, 0], [], []>} : vector<16x8xbf16>, vector<16x8xbf16>, vector<16x16xf32> -> vector<16x16xf32>
    %cst_140 = arith.constant dense<0xFF800000> : vector<16xf32>
    %440 = vector.multi_reduction <maximumf>, %439, %cst_140 [1] : vector<16x16xf32> to vector<16xf32>
    %441 = vector.shape_cast %440 : vector<16xf32> to vector<16x1xf32>
    %442 = vector.broadcast %441 : vector<16x1xf32> to vector<16x16xf32>
    %443 = arith.subf %439, %442 : vector<16x16xf32>
    %444 = math.exp %443 : vector<16x16xf32>
    %cst_141 = arith.constant dense<0.000000e+00> : vector<16xf32>
    %445 = vector.multi_reduction <add>, %444, %cst_141 [1] : vector<16x16xf32> to vector<16xf32>
    %446 = vector.shape_cast %445 : vector<16xf32> to vector<16x1xf32>
    %447 = tpu.reciprocal %446 {approx = true} : vector<16x1xf32> -> vector<16x1xf32>
    %448 = vector.broadcast %447 : vector<16x1xf32> to vector<16x16xf32>
    %449 = arith.mulf %444, %448 : vector<16x16xf32>
    %450 = arith.truncf %449 : vector<16x16xf32> to vector<16x16xbf16>
    %451 = vector.extract_strided_slice %415 {offsets = [0, 8], sizes = [16, 8], strides = [1, 1]} : vector<16x32xf32> to vector<16x8xf32>
    %452 = arith.truncf %451 : vector<16x8xf32> to vector<16x8xbf16>
    %cst_142 = arith.constant dense<0.000000e+00> : vector<16x8xf32>
    %453 = tpu.matmul %450, %452, %cst_142 {dimension_numbers = #tpu.dot_dimension_numbers<[1], [0], [0], [1], [0, 0, 1, 1], [], []>} : vector<16x16xbf16>, vector<16x8xbf16>, vector<16x8xf32> -> vector<16x8xf32>
    %454 = vector.extract_strided_slice %413 {offsets = [0, 16], sizes = [16, 8], strides = [1, 1]} : vector<16x32xf32> to vector<16x8xf32>
    %455 = arith.truncf %454 : vector<16x8xf32> to vector<16x8xbf16>
    %456 = vector.extract_strided_slice %414 {offsets = [0, 16], sizes = [16, 8], strides = [1, 1]} : vector<16x32xf32> to vector<16x8xf32>
    %457 = arith.truncf %456 : vector<16x8xf32> to vector<16x8xbf16>
    %cst_143 = arith.constant dense<0.000000e+00> : vector<16x16xf32>
    %458 = tpu.matmul %455, %457, %cst_143 {dimension_numbers = #tpu.dot_dimension_numbers<[1], [1], [0], [0], [0, 0, 1, 0], [], []>} : vector<16x8xbf16>, vector<16x8xbf16>, vector<16x16xf32> -> vector<16x16xf32>
    %cst_144 = arith.constant dense<0xFF800000> : vector<16xf32>
    %459 = vector.multi_reduction <maximumf>, %458, %cst_144 [1] : vector<16x16xf32> to vector<16xf32>
    %460 = vector.shape_cast %459 : vector<16xf32> to vector<16x1xf32>
    %461 = vector.broadcast %460 : vector<16x1xf32> to vector<16x16xf32>
    %462 = arith.subf %458, %461 : vector<16x16xf32>
    %463 = math.exp %462 : vector<16x16xf32>
    %cst_145 = arith.constant dense<0.000000e+00> : vector<16xf32>
    %464 = vector.multi_reduction <add>, %463, %cst_145 [1] : vector<16x16xf32> to vector<16xf32>
    %465 = vector.shape_cast %464 : vector<16xf32> to vector<16x1xf32>
    %466 = tpu.reciprocal %465 {approx = true} : vector<16x1xf32> -> vector<16x1xf32>
    %467 = vector.broadcast %466 : vector<16x1xf32> to vector<16x16xf32>
    %468 = arith.mulf %463, %467 : vector<16x16xf32>
    %469 = arith.truncf %468 : vector<16x16xf32> to vector<16x16xbf16>
    %470 = vector.extract_strided_slice %415 {offsets = [0, 16], sizes = [16, 8], strides = [1, 1]} : vector<16x32xf32> to vector<16x8xf32>
    %471 = arith.truncf %470 : vector<16x8xf32> to vector<16x8xbf16>
    %cst_146 = arith.constant dense<0.000000e+00> : vector<16x8xf32>
    %472 = tpu.matmul %469, %471, %cst_146 {dimension_numbers = #tpu.dot_dimension_numbers<[1], [0], [0], [1], [0, 0, 1, 1], [], []>} : vector<16x16xbf16>, vector<16x8xbf16>, vector<16x8xf32> -> vector<16x8xf32>
    %473 = vector.extract_strided_slice %413 {offsets = [0, 24], sizes = [16, 8], strides = [1, 1]} : vector<16x32xf32> to vector<16x8xf32>
    %474 = arith.truncf %473 : vector<16x8xf32> to vector<16x8xbf16>
    %475 = vector.extract_strided_slice %414 {offsets = [0, 24], sizes = [16, 8], strides = [1, 1]} : vector<16x32xf32> to vector<16x8xf32>
    %476 = arith.truncf %475 : vector<16x8xf32> to vector<16x8xbf16>
    %cst_147 = arith.constant dense<0.000000e+00> : vector<16x16xf32>
    %477 = tpu.matmul %474, %476, %cst_147 {dimension_numbers = #tpu.dot_dimension_numbers<[1], [1], [0], [0], [0, 0, 1, 0], [], []>} : vector<16x8xbf16>, vector<16x8xbf16>, vector<16x16xf32> -> vector<16x16xf32>
    %cst_148 = arith.constant dense<0xFF800000> : vector<16xf32>
    %478 = vector.multi_reduction <maximumf>, %477, %cst_148 [1] : vector<16x16xf32> to vector<16xf32>
    %479 = vector.shape_cast %478 : vector<16xf32> to vector<16x1xf32>
    %480 = vector.broadcast %479 : vector<16x1xf32> to vector<16x16xf32>
    %481 = arith.subf %477, %480 : vector<16x16xf32>
    %482 = math.exp %481 : vector<16x16xf32>
    %cst_149 = arith.constant dense<0.000000e+00> : vector<16xf32>
    %483 = vector.multi_reduction <add>, %482, %cst_149 [1] : vector<16x16xf32> to vector<16xf32>
    %484 = vector.shape_cast %483 : vector<16xf32> to vector<16x1xf32>
    %485 = tpu.reciprocal %484 {approx = true} : vector<16x1xf32> -> vector<16x1xf32>
    %486 = vector.broadcast %485 : vector<16x1xf32> to vector<16x16xf32>
    %487 = arith.mulf %482, %486 : vector<16x16xf32>
    %488 = arith.truncf %487 : vector<16x16xf32> to vector<16x16xbf16>
    %489 = vector.extract_strided_slice %415 {offsets = [0, 24], sizes = [16, 8], strides = [1, 1]} : vector<16x32xf32> to vector<16x8xf32>
    %490 = arith.truncf %489 : vector<16x8xf32> to vector<16x8xbf16>
    %cst_150 = arith.constant dense<0.000000e+00> : vector<16x8xf32>
    %491 = tpu.matmul %488, %490, %cst_150 {dimension_numbers = #tpu.dot_dimension_numbers<[1], [0], [0], [1], [0, 0, 1, 1], [], []>} : vector<16x16xbf16>, vector<16x8xbf16>, vector<16x8xf32> -> vector<16x8xf32>
    %492 = tpu.concatenate %434, %453, %472, %491 in 1 : vector<16x8xf32>, vector<16x8xf32>, vector<16x8xf32>, vector<16x8xf32> -> vector<16x32xf32>
    %493 = tpu.concatenate %412, %492 in 0 : vector<16x32xf32>, vector<16x32xf32> -> vector<32x32xf32>
    %c1_151 = arith.constant 1 : index
    %c0_152 = arith.constant 0 : index
    %c0_153 = arith.constant 0 : index
    %494 = vector.load %arg11[%c1_151, %c0_152, %c0_153] : memref<2x32x32xf32, #tpu.memory_space<vmem>>, vector<1x32x32xf32>
    %495 = vector.shape_cast %494 : vector<1x32x32xf32> to vector<32x32xf32>
    %496 = arith.truncf %493 : vector<32x32xf32> to vector<32x32xbf16>
    %497 = arith.truncf %495 : vector<32x32xf32> to vector<32x32xbf16>
    %cst_154 = arith.constant dense<0.000000e+00> : vector<32x32xf32>
    %498 = tpu.matmul %496, %497, %cst_154 {dimension_numbers = #tpu.dot_dimension_numbers<[1], [0], [0], [1], [0, 0, 1, 1], [], []>} : vector<32x32xbf16>, vector<32x32xbf16>, vector<32x32xf32> -> vector<32x32xf32>
    %499 = arith.addf %292, %498 : vector<32x32xf32>
    %c1_155 = arith.constant 1 : index
    %c0_156 = arith.constant 0 : index
    %c0_157 = arith.constant 0 : index
    %500 = vector.load %arg12[%c1_155, %c0_156, %c0_157] : memref<2x1x32xf32, #tpu.memory_space<vmem>>, vector<1x1x32xf32>
    %501 = vector.shape_cast %500 : vector<1x1x32xf32> to vector<1x32xf32>
    %502 = vector.broadcast %501 : vector<1x32xf32> to vector<32x32xf32>
    %503 = arith.addf %499, %502 : vector<32x32xf32>
    %c1_158 = arith.constant 1 : index
    %c0_159 = arith.constant 0 : index
    %c0_160 = arith.constant 0 : index
    %504 = vector.load %arg13[%c1_158, %c0_159, %c0_160] : memref<2x1x32xf32, #tpu.memory_space<vmem>>, vector<1x1x32xf32>
    %505 = vector.shape_cast %504 : vector<1x1x32xf32> to vector<1x32xf32>
    %c1_161 = arith.constant 1 : index
    %c0_162 = arith.constant 0 : index
    %c0_163 = arith.constant 0 : index
    %506 = vector.load %arg14[%c1_161, %c0_162, %c0_163] : memref<2x1x32xf32, #tpu.memory_space<vmem>>, vector<1x1x32xf32>
    %507 = vector.shape_cast %506 : vector<1x1x32xf32> to vector<1x32xf32>
    %cst_164 = arith.constant dense<0.000000e+00> : vector<32xf32>
    %508 = vector.multi_reduction <add>, %503, %cst_164 [1] : vector<32x32xf32> to vector<32xf32>
    %509 = vector.shape_cast %508 : vector<32xf32> to vector<32x1xf32>
    %cst_165 = arith.constant 3.200000e+01 : f32
    %510 = vector.broadcast %cst_165 : f32 to vector<32x1xf32>
    %511 = arith.divf %509, %510 : vector<32x1xf32>
    %512 = vector.broadcast %511 : vector<32x1xf32> to vector<32x32xf32>
    %513 = arith.subf %503, %512 : vector<32x32xf32>
    %514 = arith.mulf %513, %513 : vector<32x32xf32>
    %cst_166 = arith.constant dense<0.000000e+00> : vector<32xf32>
    %515 = vector.multi_reduction <add>, %514, %cst_166 [1] : vector<32x32xf32> to vector<32xf32>
    %516 = vector.shape_cast %515 : vector<32xf32> to vector<32x1xf32>
    %cst_167 = arith.constant 3.200000e+01 : f32
    %517 = vector.broadcast %cst_167 : f32 to vector<32x1xf32>
    %518 = arith.divf %516, %517 : vector<32x1xf32>
    %519 = vector.broadcast %511 : vector<32x1xf32> to vector<32x32xf32>
    %520 = arith.subf %503, %519 : vector<32x32xf32>
    %cst_168 = arith.constant 9.99999974E-6 : f32
    %521 = vector.broadcast %cst_168 : f32 to vector<32x1xf32>
    %522 = arith.addf %518, %521 : vector<32x1xf32>
    %523 = math.rsqrt %522 : vector<32x1xf32>
    %524 = vector.broadcast %523 : vector<32x1xf32> to vector<32x32xf32>
    %525 = arith.mulf %520, %524 : vector<32x32xf32>
    %526 = vector.broadcast %505 : vector<1x32xf32> to vector<32x32xf32>
    %527 = arith.mulf %525, %526 : vector<32x32xf32>
    %528 = vector.broadcast %507 : vector<1x32xf32> to vector<32x32xf32>
    %529 = arith.addf %527, %528 : vector<32x32xf32>
    %c1_169 = arith.constant 1 : index
    %c0_170 = arith.constant 0 : index
    %c0_171 = arith.constant 0 : index
    %530 = vector.load %arg15[%c1_169, %c0_170, %c0_171] : memref<2x32x128xf32, #tpu.memory_space<vmem>>, vector<1x32x128xf32>
    %531 = vector.shape_cast %530 : vector<1x32x128xf32> to vector<32x128xf32>
    %532 = arith.truncf %529 : vector<32x32xf32> to vector<32x32xbf16>
    %533 = arith.truncf %531 : vector<32x128xf32> to vector<32x128xbf16>
    %cst_172 = arith.constant dense<0.000000e+00> : vector<32x128xf32>
    %534 = tpu.matmul %532, %533, %cst_172 {dimension_numbers = #tpu.dot_dimension_numbers<[1], [0], [0], [1], [0, 0, 1, 1], [], []>} : vector<32x32xbf16>, vector<32x128xbf16>, vector<32x128xf32> -> vector<32x128xf32>
    %c1_173 = arith.constant 1 : index
    %c0_174 = arith.constant 0 : index
    %c0_175 = arith.constant 0 : index
    %535 = vector.load %arg16[%c1_173, %c0_174, %c0_175] : memref<2x1x128xf32, #tpu.memory_space<vmem>>, vector<1x1x128xf32>
    %536 = vector.shape_cast %535 : vector<1x1x128xf32> to vector<1x128xf32>
    %537 = vector.broadcast %536 : vector<1x128xf32> to vector<32x128xf32>
    %538 = arith.addf %534, %537 : vector<32x128xf32>
    %cst_176 = arith.constant 0.000000e+00 : f32
    %539 = vector.broadcast %cst_176 : f32 to vector<32x128xf32>
    %540 = arith.maximumf %538, %539 : vector<32x128xf32>
    %c1_177 = arith.constant 1 : index
    %c0_178 = arith.constant 0 : index
    %c0_179 = arith.constant 0 : index
    %541 = vector.load %arg17[%c1_177, %c0_178, %c0_179] : memref<2x128x32xf32, #tpu.memory_space<vmem>>, vector<1x128x32xf32>
    %542 = vector.shape_cast %541 : vector<1x128x32xf32> to vector<128x32xf32>
    %543 = arith.truncf %540 : vector<32x128xf32> to vector<32x128xbf16>
    %544 = arith.truncf %542 : vector<128x32xf32> to vector<128x32xbf16>
    %cst_180 = arith.constant dense<0.000000e+00> : vector<32x32xf32>
    %545 = tpu.matmul %543, %544, %cst_180 {dimension_numbers = #tpu.dot_dimension_numbers<[1], [0], [0], [1], [0, 0, 1, 1], [], []>} : vector<32x128xbf16>, vector<128x32xbf16>, vector<32x32xf32> -> vector<32x32xf32>
    %546 = arith.addf %503, %545 : vector<32x32xf32>
    %c1_181 = arith.constant 1 : index
    %c0_182 = arith.constant 0 : index
    %c0_183 = arith.constant 0 : index
    %547 = vector.load %arg18[%c1_181, %c0_182, %c0_183] : memref<2x1x32xf32, #tpu.memory_space<vmem>>, vector<1x1x32xf32>
    %548 = vector.shape_cast %547 : vector<1x1x32xf32> to vector<1x32xf32>
    %549 = vector.broadcast %548 : vector<1x32xf32> to vector<32x32xf32>
    %550 = arith.addf %546, %549 : vector<32x32xf32>
    %c0_184 = arith.constant 0 : index
    %c0_185 = arith.constant 0 : index
    %551 = vector.load %arg19[%c0_184, %c0_185] : memref<32x256xf32, #tpu.memory_space<vmem>>, vector<32x256xf32>
    %552 = arith.truncf %550 : vector<32x32xf32> to vector<32x32xbf16>
    %553 = arith.truncf %551 : vector<32x256xf32> to vector<32x256xbf16>
    %cst_186 = arith.constant dense<0.000000e+00> : vector<32x256xf32>
    %554 = tpu.matmul %552, %553, %cst_186 {dimension_numbers = #tpu.dot_dimension_numbers<[1], [0], [0], [1], [0, 0, 1, 1], [], []>} : vector<32x32xbf16>, vector<32x256xbf16>, vector<32x256xf32> -> vector<32x256xf32>
    %c0_187 = arith.constant 0 : index
    %c0_188 = arith.constant 0 : index
    %555 = vector.load %arg20[%c0_187, %c0_188] : memref<1x256xf32, #tpu.memory_space<vmem>>, vector<1x256xf32>
    %556 = vector.broadcast %555 : vector<1x256xf32> to vector<32x256xf32>
    %557 = arith.addf %554, %556 : vector<32x256xf32>
    %c0_189 = arith.constant 0 : index
    %c0_190 = arith.constant 0 : index
    %c0_191 = arith.constant 0 : index
    %558 = vector.load %arg21[%c0_189, %c0_190, %c0_191] : memref<1x32x256xf32, #tpu.memory_space<vmem>>, vector<1x32x256xf32>
    %559 = vector.shape_cast %558 : vector<1x32x256xf32> to vector<32x256xf32>
    %560 = vector.shape_cast %557 : vector<32x256xf32> to vector<1x32x256xf32>
    tpu.vector_store %arg21[%c0_189, %c0_190, %c0_191], %560 {strides = array<i32>} : memref<1x32x256xf32, #tpu.memory_space<vmem>>, vector<1x32x256xf32>,
    return
  }
  func.func @transform_0(%arg0: i32) -> (i32, i32, i32) {
    %c0_i32 = arith.constant 0 : i32
    %c0_i32_0 = arith.constant 0 : i32
    %c0_i32_1 = arith.constant 0 : i32
    return %arg0, %c0_i32, %c0_i32_0 : i32, i32, i32
  }
  func.func @transform_1(%arg0: i32) -> (i32, i32) {
    %c0_i32 = arith.constant 0 : i32
    %c0_i32_0 = arith.constant 0 : i32
    %c0_i32_1 = arith.constant 0 : i32
    return %c0_i32, %c0_i32_0 : i32, i32
  }
  func.func @transform_2(%arg0: i32) -> (i32, i32) {
    %c0_i32 = arith.constant 0 : i32
    %c0_i32_0 = arith.constant 0 : i32
    %c0_i32_1 = arith.constant 0 : i32
    return %c0_i32, %c0_i32_0 : i32, i32
  }
  func.func @transform_3(%arg0: i32) -> (i32, i32) {
    %c0_i32 = arith.constant 0 : i32
    %c0_i32_0 = arith.constant 0 : i32
    %c0_i32_1 = arith.constant 0 : i32
    return %c0_i32, %c0_i32_0 : i32, i32
  }
  func.func @transform_4(%arg0: i32) -> (i32, i32) {
    %c0_i32 = arith.constant 0 : i32
    %c0_i32_0 = arith.constant 0 : i32
    %c0_i32_1 = arith.constant 0 : i32
    return %c0_i32, %c0_i32_0 : i32, i32
  }
  func.func @transform_5(%arg0: i32) -> (i32, i32) {
    %c0_i32 = arith.constant 0 : i32
    %c0_i32_0 = arith.constant 0 : i32
    %c0_i32_1 = arith.constant 0 : i32
    return %c0_i32, %c0_i32_0 : i32, i32
  }
  func.func @transform_6(%arg0: i32) -> (i32, i32, i32) {
    %c0_i32 = arith.constant 0 : i32
    %c0_i32_0 = arith.constant 0 : i32
    %c0_i32_1 = arith.constant 0 : i32
    %c0_i32_2 = arith.constant 0 : i32
    return %c0_i32, %c0_i32_0, %c0_i32_1 : i32, i32, i32
  }
  func.func @transform_7(%arg0: i32) -> (i32, i32, i32) {
    %c0_i32 = arith.constant 0 : i32
    %c0_i32_0 = arith.constant 0 : i32
    %c0_i32_1 = arith.constant 0 : i32
    %c0_i32_2 = arith.constant 0 : i32
    return %c0_i32, %c0_i32_0, %c0_i32_1 : i32, i32, i32
  }
  func.func @transform_8(%arg0: i32) -> (i32, i32, i32) {
    %c0_i32 = arith.constant 0 : i32
    %c0_i32_0 = arith.constant 0 : i32
    %c0_i32_1 = arith.constant 0 : i32
    %c0_i32_2 = arith.constant 0 : i32
    return %c0_i32, %c0_i32_0, %c0_i32_1 : i32, i32, i32
  }
  func.func @transform_9(%arg0: i32) -> (i32, i32, i32) {
    %c0_i32 = arith.constant 0 : i32
    %c0_i32_0 = arith.constant 0 : i32
    %c0_i32_1 = arith.constant 0 : i32
    %c0_i32_2 = arith.constant 0 : i32
    return %c0_i32, %c0_i32_0, %c0_i32_1 : i32, i32, i32
  }
  func.func @transform_10(%arg0: i32) -> (i32, i32, i32) {
    %c0_i32 = arith.constant 0 : i32
    %c0_i32_0 = arith.constant 0 : i32
    %c0_i32_1 = arith.constant 0 : i32
    %c0_i32_2 = arith.constant 0 : i32
    return %c0_i32, %c0_i32_0, %c0_i32_1 : i32, i32, i32
  }
  func.func @transform_11(%arg0: i32) -> (i32, i32, i32) {
    %c0_i32 = arith.constant 0 : i32
    %c0_i32_0 = arith.constant 0 : i32
    %c0_i32_1 = arith.constant 0 : i32
    %c0_i32_2 = arith.constant 0 : i32
    return %c0_i32, %c0_i32_0, %c0_i32_1 : i32, i32, i32
  }
  func.func @transform_12(%arg0: i32) -> (i32, i32, i32) {
    %c0_i32 = arith.constant 0 : i32
    %c0_i32_0 = arith.constant 0 : i32
    %c0_i32_1 = arith.constant 0 : i32
    %c0_i32_2 = arith.constant 0 : i32
    return %c0_i32, %c0_i32_0, %c0_i32_1 : i32, i32, i32
  }
  func.func @transform_13(%arg0: i32) -> (i32, i32, i32) {
    %c0_i32 = arith.constant 0 : i32
    %c0_i32_0 = arith.constant 0 : i32
    %c0_i32_1 = arith.constant 0 : i32
    %c0_i32_2 = arith.constant 0 : i32
    return %c0_i32, %c0_i32_0, %c0_i32_1 : i32, i32, i32
  }
  func.func @transform_14(%arg0: i32) -> (i32, i32, i32) {
    %c0_i32 = arith.constant 0 : i32
    %c0_i32_0 = arith.constant 0 : i32
    %c0_i32_1 = arith.constant 0 : i32
    %c0_i32_2 = arith.constant 0 : i32
    return %c0_i32, %c0_i32_0, %c0_i32_1 : i32, i32, i32
  }
  func.func @transform_15(%arg0: i32) -> (i32, i32, i32) {
    %c0_i32 = arith.constant 0 : i32
    %c0_i32_0 = arith.constant 0 : i32
    %c0_i32_1 = arith.constant 0 : i32
    %c0_i32_2 = arith.constant 0 : i32
    return %c0_i32, %c0_i32_0, %c0_i32_1 : i32, i32, i32
  }
  func.func @transform_16(%arg0: i32) -> (i32, i32, i32) {
    %c0_i32 = arith.constant 0 : i32
    %c0_i32_0 = arith.constant 0 : i32
    %c0_i32_1 = arith.constant 0 : i32
    %c0_i32_2 = arith.constant 0 : i32
    return %c0_i32, %c0_i32_0, %c0_i32_1 : i32, i32, i32
  }
  func.func @transform_17(%arg0: i32) -> (i32, i32, i32) {
    %c0_i32 = arith.constant 0 : i32
    %c0_i32_0 = arith.constant 0 : i32
    %c0_i32_1 = arith.constant 0 : i32
    %c0_i32_2 = arith.constant 0 : i32
    return %c0_i32, %c0_i32_0, %c0_i32_1 : i32, i32, i32
  }
  func.func @transform_18(%arg0: i32) -> (i32, i32) {
    %c0_i32 = arith.constant 0 : i32
    %c0_i32_0 = arith.constant 0 : i32
    %c0_i32_1 = arith.constant 0 : i32
    return %c0_i32, %c0_i32_0 : i32, i32
  }
  func.func @transform_19(%arg0: i32) -> (i32, i32) {
    %c0_i32 = arith.constant 0 : i32
    %c0_i32_0 = arith.constant 0 : i32
    %c0_i32_1 = arith.constant 0 : i32
    return %c0_i32, %c0_i32_0 : i32, i32
  }
  func.func @transform_20(%arg0: i32) -> (i32, i32, i32) {
    %c0_i32 = arith.constant 0 : i32
    %c0_i32_0 = arith.constant 0 : i32
    %c0_i32_1 = arith.constant 0 : i32
    return %arg0, %c0_i32, %c0_i32_0 : i32, i32, i32
  }
}

</mosaic_0001>

<bundles_post_ra>
// kernel: tpu_custom_call.1
= control target key start
LH: loop header
LB: loop body
LE: loop exit
PB: predicated region body
PF: predicated region fallthrough
CT: control target
= control target key end

     0   :  { %s6413_s0 = inlined_call_operand.vmem [shape: f32[2,32,384], index: 0, kind: input, shape index: {}]   ;;  %s6414_s1 = inlined_call_operand.vmem [shape: f32[384,32], index: 1, kind: input, shape index: {}]   ;;  %s6415_s2 = inlined_call_operand.vmem [shape: f32[1,32], index: 2, kind: input, shape index: {}]   ;;  %s6416_s3 = inlined_call_operand.vmem [shape: f32[32,32], index: 3, kind: input, shape index: {}]   ;;  %s6417_s4 = inlined_call_operand.vmem [shape: f32[1,32], index: 4, kind: input, shape index: {}]   ;;  %s6418_s5 = inlined_call_operand.vmem [shape: f32[1,32], index: 5, kind: input, shape index: {}]   ;;  %s6419_s6 = inlined_call_operand.vmem [shape: f32[2,1,32], index: 6, kind: input, shape index: {}]   ;;  %s6420_s7 = inlined_call_operand.vmem [shape: f32[2,1,32], index: 7, kind: input, shape index: {}]   ;;  %s6421_s8 = inlined_call_operand.vmem [shape: f32[2,32,96], index: 8, kind: input, shape index: {}]   ;;  %s6422_s9 = inlined_call_operand.vmem [shape: f32[2,1,96], index: 9, kind: input, shape index: {}]   ;;  %s6423_s10 = inlined_call_operand.vmem [shape: f32[2,32,32], index: 10, kind: input, shape index: {}]   ;;  %s6424_s11 = inlined_call_operand.vmem [shape: f32[2,1,32], index: 11, kind: input, shape index: {}]   ;;  %s6425_s12 = inlined_call_operand.vmem [shape: f32[2,1,32], index: 12, kind: input, shape index: {}]   ;;  %s6426_s13 = inlined_call_operand.vmem [shape: f32[2,1,32], index: 13, kind: input, shape index: {}]   ;;  %s6427_s14 = inlined_call_operand.vmem [shape: f32[2,32,128], index: 14, kind: input, shape index: {}]   ;;  %s6428_s15 = inlined_call_operand.vmem [shape: f32[2,1,128], index: 15, kind: input, shape index: {}]   ;;  %s6429_s16 = inlined_call_operand.vmem [shape: f32[2,128,32], index: 16, kind: input, shape index: {}]   ;;  %s6430_s17 = inlined_call_operand.vmem [shape: f32[2,1,32], index: 17, kind: input, shape index: {}]   ;;  %s6431_s18 = inlined_call_operand.vmem [shape: f32[32,256], index: 18, kind: input, shape index: {}]   ;;  %s6432_s19 = inlined_call_operand.vmem [shape: f32[1,256], index: 19, kind: input, shape index: {}]   ;;  %s6433_s20 = inlined_call_operand.hbm [shape: f32[2,32,256], index: 20, kind: output, shape index: {}]  }
   0x1   :  { %6469 = sst [smem:[#allocation11_spill]] %s6413_s0 }
   0x2   :  { %6470 = sst [smem:[#allocation12_spill]] %s6414_s1 }
   0x3   :  { %6471 = sst [smem:[#allocation13_spill]] %s6415_s2 }
   0x4   :  { %6472 = sst [smem:[#allocation14_spill]] %s6416_s3 }
   0x5   :  { %6473 = sst [smem:[#allocation15_spill]] %s6417_s4 }
   0x6   :  { %6474 = sst [smem:[#allocation16_spill]] %s6418_s5 }
   0x7   :  { %6475 = sst [smem:[#allocation17_spill]] %s6433_s20 }
   0x8   :  { %25 = vsyncpa [#allocation3], 0 }
   0x9   :  { %27 = vsyncpa [#allocation3 + $0x1], 0  ;;  %s5117_s1 = smov 0   ;;  %s5119_s22 = smov 0  }
   0xa   :  { %s5121_s23 = smov 0   ;;  %s5123_s24 = smov 0  }
   0xb LB: > { %6476 = sst [smem:[#allocation5_spill]] %s4979_s1  ;;  %s5138_s2 = sadd.s32 4294967295, %s4991_s24   ;;  %s4991_s24 = sphi %s5123_s24, %s6507_s24   ;;  %s4987_s23 = sphi %s5121_s23, %s6509_s23   ;;  %s4983_s22 = sphi %s5119_s22, %s6511_s22   ;;  %s4979_s1 = sphi %s5117_s1, %s6510_s1  }
   0xc   : > { %6477 = sst [smem:[#allocation6_spill]] %s4987_s23  ;;  %s4084_s25 = sadd.s32 4294967294, %s4991_s24  }
   0xd   : > { %6478 = sst [smem:[#allocation7_spill]] %s4991_s24  ;;  %s5142_s3 = sadd.s32 1, %s4991_s24  }
   0xe   : > { %6479 = sst [smem:[#allocation8_spill]] %s5142_s3  ;;  %s465_s26 = sadd.s32 1, %s4987_s23 }
   0xf   : > { %s462_s27 = ssub.s32 %s4991_s24, %s5142_s3  ;;  %p475_p0 = scmp.ne.s32.totalorder %s4987_s23, %s4983_s22 }
  0x10   : > { %p463_p1 = scmp.eq.s32.totalorder %s462_s27, 0  ;;  %p476_p2 = scmp.eq.s32.totalorder %s5138_s2, 1 }
  0x11   : > { %p481_p3 = scmp.ne.s32.totalorder %s4983_s22, %s4979_s1  ;;  %p482_p4 = scmp.eq.s32.totalorder %s4084_s25, 1 }
  0x12   : > { %s5153_s28 = scalar_select %p463_p1, %s4987_s23, %s465_s26  }
  0x13   : > { %p5155_p5 = por %p476_p2, %p475_p0  ;;  %p5159_p6 = por %p482_p4, %p481_p3 }
  0x14   : > { %6480 = sst [smem:[#allocation9_spill]] %s5153_s28  ;;  %p4087_p7 = scmp.ge.s32.totalorder %s4991_s24, 1 }
  0x15   : > { %s6482_s29 = scalar_select %p5159_p6, 1, 0 }
  0x16   : > { %p565_p8 = scmp.lt.s32.totalorder %s4991_s24, 3 }
  0x17   : > { %6483 = sst [smem:[#allocation10_spill]] %s6482_s29 }
  0x18   : > { %p566_p9 = pnand %p4087_p7, %p565_p8 }
  0x19   : > { %s6484_s21 = sld [smem:[#allocation12_spill]] (!%p566_p9)  ;;  %p623_p10 = scmp.lt.s32.totalorder (!%p566_p9), %s5138_s2, 1  ;;  %vm834_vm0 = vcmask (!%p566_p9), 261120   ;;  %vm4994_vm1 = vmmov (!%p566_p9), 0   ;;  %vm1061_vm2 = vcmask (!%p566_p9), 64512   ;;  %vm1109_vm3 = vcmask (!%p566_p9), 130048  }
  0x1a   : > { %569 = sbr.rel (%p566_p9) target bundleno = 6615 (0x19d7), region = 100  ;;  %s6485_s23 = sld [smem:[#allocation11_spill]] (!%p566_p9)  ;;  %vm1572_vm4 = vcmask (!%p566_p9), 195584  }
  0x1b   : > { %s6486_s20 = sld [smem:[#allocation13_spill]] (!%p566_p9)  ;;  %s6487_s29 = sld [smem:[#allocation14_spill]] (!%p566_p9) }
  0x1c   : > { %s6489_s5 = sld [smem:[#allocation16_spill]] (!%p566_p9)  ;;  %s6461_s28 = smov (!%p566_p9), 88  }
  0x1d   : > { %s6463_s25 = smov (!%p566_p9), 96   ;;  %s6459_s24 = smov (!%p566_p9), 120  }
  0x1e   : > { %s6451_s27 = smov (!%p566_p9), 104   ;;  %s6447_s30 = smov (!%p566_p9), 56  }
  0x1f   : > { %v657_v0 = vld [vmem:[%s6484_s21 + $0x80] sm:$0xff] (!%p566_p9)  ;;  %v658_v1 = vld [vmem:[%s6484_s21 + $0x88] sm:$0xff] (!%p566_p9)  ;;  %v659_v5 = vld [vmem:[%s6484_s21 + $0x90] sm:$0xff] (!%p566_p9)  ;;  %s6445_s0 = smov (!%p566_p9), 48  }
  0x20   : > { %v641_v2 = vld [vmem:[%s6484_s21] sm:$0xff] (!%p566_p9)  ;;  %v703_v3 = vpack.c.bf16 (!%p566_p9), %v658_v1, %v657_v0  ;;  %v642_v4 = vld [vmem:[%s6484_s21 + $0x8] sm:$0xff] (!%p566_p9)  ;;  %v660_v6 = vld [vmem:[%s6484_s21 + $0x98] sm:$0xff] (!%p566_p9) }
  0x21   : > { %v695_v7 = vpack.c.bf16 %v642_v4, %v641_v2  ;;  %v704_v8 = vpack.c.bf16 %v660_v6, %v659_v5  ;;  %v673_v9 = vld [vmem:[%s6484_s21 + $0x100] sm:$0xff]  ;;  %v674_v10 = vld [vmem:[%s6484_s21 + $0x108] sm:$0xff]  ;;  %v643_v11 = vld [vmem:[%s6484_s21 + $0x10] sm:$0xff]  ;;  %s5211_s1 = scalar_select %p623_p10, %s5138_s2, 1 }
  0x22   : > { %4197 = vmatprep.subr.bf16.mxu0 %v703_v3  ;;  %v711_v12 = vpack.c.bf16 %v674_v10, %v673_v9  ;;  %v644_v13 = vld [vmem:[%s6484_s21 + $0x18] sm:$0xff]  ;;  %v661_v14 = vld [vmem:[%s6484_s21 + $0xa0] sm:$0xff]  ;;  %v662_v15 = vld [vmem:[%s6484_s21 + $0xa8] sm:$0xff] }
  0x23   : > { %4198 = vmatpush3.bf16.msra.mxu0 %v695_v7  ;;  %v696_v16 = vpack.c.bf16 %v644_v13, %v643_v11  ;;  %v675_v17 = vld [vmem:[%s6484_s21 + $0x110] sm:$0xff]  ;;  %v676_v18 = vld [vmem:[%s6484_s21 + $0x118] sm:$0xff]  ;;  %v705_v19 = vpack.c.bf16 %v662_v15, %v661_v14  ;;  %v645_v21 = vld [vmem:[%s6484_s21 + $0x20] sm:$0xff]  ;;  %s4643_s26 = smul.u32 96, %s5211_s1  ;;  %s6443_s1 = smov 40  }
  0x24   : > { %4199 = vmatprep.subr.bf16.mxu0 %v704_v8  ;;  %4343 = vmatprep.subr.bf16.mxu1 %v711_v12  ;;  %v712_v20 = vpack.c.bf16 %v676_v18, %v675_v17  ;;  %v646_v22 = vld [vmem:[%s6484_s21 + $0x28] sm:$0xff]  ;;  %v663_v23 = vld [vmem:[%s6484_s21 + $0xb0] sm:$0xff]  ;;  %v664_v24 = vld [vmem:[%s6484_s21 + $0xb8] sm:$0xff] }
  0x25   : > { %4344 = vmatpush3.bf16.msra.mxu1 %v711_v12  ;;  %v677_v25 = vld [vmem:[%s6484_s21 + $0x120] sm:$0xff]  ;;  %v678_v26 = vld [vmem:[%s6484_s21 + $0x128] sm:$0xff]  ;;  %v697_v28 = vpack.c.bf16 %v646_v22, %v645_v21  ;;  %v679_v29 = vld [vmem:[%s6484_s21 + $0x130] sm:$0xff]  ;;  %v706_v31 = vpack.c.bf16 %v664_v24, %v663_v23  ;;  %s5259_s3 = scalar_lea.vmem %s6485_s23, %s4643_s26  ;;  %s6453_s26 = smov 112  }
  0x26   : > { %4345 = vmatprep.subr.bf16.mxu1 %v712_v20  ;;  %v713_v27 = vpack.c.bf16 %v678_v26, %v677_v25  ;;  %v680_v30 = vld [vmem:[%s6484_s21 + $0x138] sm:$0xff]  ;;  %v647_v32 = vld [vmem:[%s6484_s21 + $0x30] sm:$0xff]  ;;  %v665_v34 = vld [vmem:[%s6484_s21 + $0xc0] sm:$0xff]  ;;  %s6455_s23 = smov 72  }
  0x27   : > { %4200 = vmatpush3.bf16.msra.mxu0 %v696_v16  ;;  %v648_v33 = vld [vmem:[%s6484_s21 + $0x38] sm:$0xff]  ;;  %v666_v35 = vld [vmem:[%s6484_s21 + $0xc8] sm:$0xff]  ;;  %v714_v36 = vpack.c.bf16 %v680_v30, %v679_v29  ;;  %v681_v38 = vld [vmem:[%s6484_s21 + $0x140] sm:$0xff] }
  0x28   : > { %4201 = vmatprep.subr.bf16.mxu0 %v705_v19  ;;  %v698_v37 = vpack.c.bf16 %v648_v33, %v647_v32  ;;  %v682_v39 = vld [vmem:[%s6484_s21 + $0x148] sm:$0xff]  ;;  %v707_v40 = vpack.c.bf16 %v666_v35, %v665_v34  ;;  %v649_v41 = vld [vmem:[%s6484_s21 + $0x40] sm:$0xff]  ;;  %v667_v43 = vld [vmem:[%s6484_s21 + $0xd0] sm:$0xff] }
  0x29   : > { %4346 = vmatpush3.bf16.msra.mxu1 %v712_v20  ;;  %v650_v42 = vld [vmem:[%s6484_s21 + $0x48] sm:$0xff]  ;;  %v668_v44 = vld [vmem:[%s6484_s21 + $0xd8] sm:$0xff]  ;;  %v715_v45 = vpack.c.bf16 %v682_v39, %v681_v38  ;;  %v633_v47 = vld [vmem:[%s5259_s3 + $0x20] sm:$0xff] }
  0x2a   : > { %4347 = vmatprep.subr.bf16.mxu1 %v713_v27  ;;  %v630_v46 = vld [vmem:[%s5259_s3 + $0x8] sm:$0xff]  ;;  %v699_v48 = vpack.c.bf16 %v650_v42, %v649_v41  ;;  %v651_v49 = vld [vmem:[%s6484_s21 + $0x50] sm:$0xff]  ;;  %v684_v51 = vld [vmem:[%s6484_s21 + $0x158] sm:$0xff]  ;;  %v708_v53 = vpack.c.bf16 %v668_v44, %v667_v43 }
  0x2b   : > { %4202 = vmatpush3.bf16.msra.mxu0 %v697_v28  ;;  %v683_v50 = vld [vmem:[%s6484_s21 + $0x150] sm:$0xff]  ;;  %v690_v52 = vpack.c.bf16 %v633_v47, %v630_v46  ;;  %v652_v54 = vld [vmem:[%s6484_s21 + $0x58] sm:$0xff]  ;;  %v634_v56 = vld [vmem:[%s5259_s3 + $0x28] sm:$0xff] }
  0x2c   : > { %4203 = vmatprep.subr.bf16.mxu0 %v706_v31  ;;  %v631_v55 = vld [vmem:[%s5259_s3 + $0x10] sm:$0xff]  ;;  %v669_v57 = vld [vmem:[%s6484_s21 + $0xe0] sm:$0xff]  ;;  %v670_v58 = vld [vmem:[%s6484_s21 + $0xe8] sm:$0xff]  ;;  %v716_v60 = vpack.c.bf16 %v684_v51, %v683_v50  ;;  %v700_v61 = vpack.c.bf16 %v652_v54, %v651_v49 }
  0x2d   : > { %4348 = vmatpush3.bf16.msra.mxu1 %v713_v27  ;;  %758 = vmatprep.mubr.bf16.mxu0 %v690_v52  ;;  %v691_v59 = vpack.c.bf16 %v634_v56, %v631_v55  ;;  %v685_v62 = vld [vmem:[%s6484_s21 + $0x160] sm:$0xff]  ;;  %v686_v63 = vld [vmem:[%s6484_s21 + $0x168] sm:$0xff]  ;;  %v709_v0 = vpack.c.bf16 %v670_v58, %v669_v57  ;;  %v671_v3 = vld [vmem:[%s6484_s21 + $0xf0] sm:$0xff] }
  0x2e   : > { %4349 = vmatprep.subr.bf16.mxu1 %v714_v36  ;;  %v653_v1 = vld [vmem:[%s6484_s21 + $0x60] sm:$0xff]  ;;  %v654_v2 = vld [vmem:[%s6484_s21 + $0x68] sm:$0xff]  ;;  %v672_v4 = vld [vmem:[%s6484_s21 + $0xf8] sm:$0xff]  ;;  %v717_v5 = vpack.c.bf16 %v686_v63, %v685_v62 }
  0x2f   : > { %4204 = vmatpush3.bf16.msra.mxu0 %v698_v37  ;;  %4359 = vmatprep.mubr.bf16.mxu1 %v691_v59  ;;  %v701_v6 = vpack.c.bf16 %v654_v2, %v653_v1  ;;  %v687_v7 = vld [vmem:[%s6484_s21 + $0x170] sm:$0xff]  ;;  %v688_v8 = vld [vmem:[%s6484_s21 + $0x178] sm:$0xff]  ;;  %v710_v9 = vpack.c.bf16 %v672_v4, %v671_v3  ;;  %v629_v14 = vld [vmem:[%s5259_s3] sm:$0xff] }
  0x30   : > { %4205 = vmatprep.subr.bf16.mxu0 %v707_v40  ;;  %v655_v10 = vld [vmem:[%s6484_s21 + $0x70] sm:$0xff]  ;;  %v656_v11 = vld [vmem:[%s6484_s21 + $0x78] sm:$0xff]  ;;  %v718_v12 = vpack.c.bf16 %v688_v8, %v687_v7  ;;  %v637_v18 = vld [vmem:[%s5259_s3 + $0x40] sm:$0xff] }
  0x31   : > { %4350 = vmatpush3.bf16.msra.mxu1 %v714_v36  ;;  %v702_v13 = vpack.c.bf16 %v656_v11, %v655_v10  ;;  %v632_v15 = vld [vmem:[%s5259_s3 + $0x18] sm:$0xff]  ;;  %v639_v17 = vld [vmem:[%s5259_s3 + $0x50] sm:$0xff]  ;;  %v638_v24 = vld [vmem:[%s5259_s3 + $0x48] sm:$0xff] }
  0x32   : > { %4351 = vmatprep.subr.bf16.mxu1 %v715_v45  ;;  %v636_v16 = vld [vmem:[%s5259_s3 + $0x38] sm:$0xff]  ;;  %v689_v20 = vpack.c.bf16 %v632_v15, %v629_v14  ;;  %v635_v23 = vld [vmem:[%s5259_s3 + $0x30] sm:$0xff]  ;;  %v4090_v28 = vld [vmem:[%s6486_s20] ss:$0 sm:$0xff]  ;;  %s6488_s20 = sld [smem:[#allocation15_spill]] }
  0x33   : > { %4206 = vmatpush3.bf16.msra.mxu0 %v699_v48  ;;  %v640_v19 = vld [vmem:[%s5259_s3 + $0x58] sm:$0xff]  ;;  %v693_v21 = vpack.c.bf16 %v639_v17, %v636_v16  ;;  %v692_v25 = vpack.c.bf16 %v638_v24, %v635_v23  ;;  %v824_v38 = vld [vmem:[%s6487_s29] sm:$0xff]  ;;  %v825_v41 = vld [vmem:[%s6487_s29 + $0x8] sm:$0xff]  ;;  %s6449_s3 = smov 64  }
  0x34   : > { %4207 = vmatprep.subr.bf16.mxu0 %v708_v53  ;;  %v694_v22 = vpack.c.bf16 %v640_v19, %v637_v18  ;;  %v826_v53 = vld [vmem:[%s6487_s29 + $0x10] sm:$0xff]  ;;  %v827_v57 = vld [vmem:[%s6487_s29 + $0x18] sm:$0xff] }
  0x35   : > { %4352 = vmatpush3.bf16.msra.mxu1 %v715_v45 }
  0x36   : > { %4353 = vmatprep.subr.bf16.mxu1 %v716_v60 }
  0x37   : > { %4208 = vmatpush3.bf16.msra.mxu0 %v700_v61 }
  0x38   : > { %4209 = vmatprep.subr.bf16.mxu0 %v709_v0 }
  0x39   : > { %4354 = vmatpush3.bf16.msra.mxu1 %v716_v60 }
  0x3a   : > { %4355 = vmatprep.subr.bf16.mxu1 %v717_v5 }
  0x3b   : > { %4210 = vmatpush3.bf16.msra.mxu0 %v701_v6 }
  0x3c   : > { %4211 = vmatprep.subr.bf16.mxu0 %v710_v9 }
  0x3d   : > { %4356 = vmatpush3.bf16.msra.mxu1 %v717_v5 }
  0x3e   : > { %4357 = vmatprep.subr.bf16.mxu1 %v718_v12 }
  0x3f   : > { %4212 = vmatpush3.bf16.msra.mxu0 %v702_v13 }
  0x41   : > { %4358 = vmatpush3.bf16.msra.mxu1 %v718_v12 }
  0x42   : > { %759 = vmatmul.mubr.bf16.vlgmr.msra.gmra.mrb[0].mxu0 %v689_v20 }
  0x43   : > { %766 = vmatprep.mubr.bf16.mxu0 %v693_v21 }
  0x44   : > { %4360 = vmatmul.mubr.bf16.vlgmr.msra.gmra.mrb[0].mxu1 %v694_v22 }
  0x4a   : > { %767 = vmatmul.mubr.bf16.gmra.mrb[4].mxu0 %v692_v25 }
 0x115   : > { %v4213_v26 = vpop.f32.mrb[0].mxu0 }
 0x116   : > { %v4214_v27 = vpop.f32.mrb[1].mxu0 }
 0x117   : > { %v4215_v29 = vadd.f32 %v4214_v27, %v4213_v26  ;;  %v4216_v30 = vpop.f32.mrb[2].mxu0  ;;  %v4361_v31 = vpop.f32.mrb[0].mxu1 }
 0x118   : > { %v4217_v32 = vpop.f32.mrb[3].mxu0  ;;  %v809_v33 = vpop.f32.mrb[1].mxu1 }
 0x119   : > { %v4218_v34 = vadd.f32 %v4217_v32, %v4216_v30  ;;  %v761_v35 = vadd.f32 %v4215_v29, %v4090_v28  ;;  %v4362_v36 = vpop.f32.mrb[2].mxu1  ;;  %v4091_v32 = vld [vmem:[%s6488_s20] ss:$0 sm:$0xff]  ;;  %s6457_s20 = smov 80  }
 0x11a   : > { %v812_v37 = vpop.f32.mrb[3].mxu1 }
 0x11b   : > { %v810_v39 = vadd.f32 %v809_v33, %v761_v35  ;;  %v764_v40 = vadd.f32 %v4218_v34, %v4090_v28  ;;  %v4092_v34 = vld [vmem:[%s6489_s5] ss:$0 sm:$0xff] }
 0x11d   : > { %v813_v42 = vadd.f32 %v812_v37, %v764_v40  ;;  %v4219_v43 = vpop.f32.mrb[4].mxu0  ;;  %v828_v44 = vadd.f32 %v824_v38, %v810_v39 }
 0x11e   : > { %v4220_v45 = vpop.f32.mrb[5].mxu0 }
 0x11f   : > { %v4221_v46 = vadd.f32 %v4220_v45, %v4219_v43  ;;  %v4222_v47 = vpop.f32.mrb[6].mxu0  ;;  %v835_v48 = vsel %vm834_vm0, %v828_v44, 0.0  ;;  %v829_v49 = vadd.f32 %v825_v41, %v813_v42 }
 0x120   : > { %v4223_v50 = vpop.f32.mrb[7].mxu0  ;;  %836 = vadd.xlane.f32.xlu0 %v835_v48 }
 0x121   : > { %v769_v51 = vadd.f32 %v4221_v46, %v4090_v28  ;;  %v4224_v52 = vadd.f32 %v4223_v50, %v4222_v47  ;;  %v838_v55 = vsel %vm834_vm0, %v829_v49, 0.0 }
 0x123   : > { %v772_v54 = vadd.f32 %v4224_v52, %v4090_v28  ;;  %v818_v56 = vadd.f32 %v4361_v31, %v769_v51 }
 0x124   : > { %839 = vadd.xlane.f32.xlu0 %v838_v55 }
 0x125   : > { %v830_v58 = vadd.f32 %v826_v53, %v818_v56  ;;  %v821_v59 = vadd.f32 %v4362_v36, %v772_v54 }
 0x127   : > { %v841_v60 = vsel %vm834_vm0, %v830_v58, 0.0  ;;  %v831_v61 = vadd.f32 %v827_v57, %v821_v59 }
 0x128   : > { %842 = vadd.xlane.f32.xlu1 %v841_v60 }
 0x129   : > { %v844_v62 = vsel %vm834_vm0, %v831_v61, 0.0 }
 0x12c   : > { %845 = vadd.xlane.f32.xlu1 %v844_v62 }
 0x1ad   : > { %v837_v63 = vpop.xlane.xlu0 %836 }
 0x1ae   : > { %v848_v0 = vmul.f32 0.03125, %v837_v63 }
 0x1b0   : > { %v852_v1 = vsub.f32 %v828_v44, %v848_v0 }
 0x1b1   : > { %v840_v2 = vpop.xlane.xlu0 %839 }
 0x1b2   : > { %v849_v3 = vmul.f32 0.03125, %v840_v2  ;;  %v856_v4 = vmul.f32 %v852_v1, %v852_v1 }
 0x1b4   : > { %v853_v5 = vsub.f32 %v829_v49, %v849_v3  ;;  %v860_v6 = vsel %vm834_vm0, %v856_v4, 0.0 }
 0x1b5   : > { %v843_v7 = vpop.xlane.xlu1 %842  ;;  %861 = vadd.xlane.f32.xlu0 %v860_v6 }
 0x1b6   : > { %v850_v8 = vmul.f32 0.03125, %v843_v7  ;;  %v857_v9 = vmul.f32 %v853_v5, %v853_v5 }
 0x1b8   : > { %v854_v10 = vsub.f32 %v830_v58, %v850_v8  ;;  %v863_v11 = vsel %vm834_vm0, %v857_v9, 0.0  ;;  %v982_v9 = vld [vmem:[%s6421_s8] sm:$0xff] }
 0x1b9   : > { %v846_v12 = vpop.xlane.xlu1 %845  ;;  %864 = vadd.xlane.f32.xlu1 %v863_v11 }
 0x1ba   : > { %v851_v13 = vmul.f32 0.03125, %v846_v12  ;;  %v858_v14 = vmul.f32 %v854_v10, %v854_v10  ;;  %v984_v12 = vld [vmem:[%s6421_s8 + $0x10] sm:$0xff] }
 0x1bc   : > { %v855_v15 = vsub.f32 %v831_v61, %v851_v13  ;;  %v866_v16 = vsel %vm834_vm0, %v858_v14, 0.0  ;;  %v985_v13 = vld [vmem:[%s6421_s8 + $0x18] sm:$0xff] }
 0x1bd   : > { %867 = vadd.xlane.f32.xlu0 %v866_v16  ;;  %v989_v14 = vpack.c.bf16 %v985_v13, %v984_v12 }
 0x1be   : > { %v859_v17 = vmul.f32 %v855_v15, %v855_v15 }
 0x1c0   : > { %v869_v18 = vsel %vm834_vm0, %v859_v17, 0.0 }
 0x1c1   : > { %870 = vadd.xlane.f32.xlu1 %v869_v18 }
 0x242   : > { %v862_v19 = vpop.xlane.xlu0 %861 }
 0x243   : > { %v872_v20 = vmul.f32 0.03125, %v862_v19 }
 0x245   : > { %v876_v21 = vadd.f32 1e-05, %v872_v20 }
 0x246   : > { %v865_v22 = vpop.xlane.xlu1 %864 }
 0x247   : > { %4761 = vrsqrt.f32 %v876_v21  ;;  %v873_v23 = vmul.f32 0.03125, %v865_v22 }
 0x249   : > { %v877_v24 = vadd.f32 1e-05, %v873_v23 }
 0x24a   : > { %v868_v25 = vpop.xlane.xlu0 %867 }
 0x24b   : > { %4763 = vrsqrt.f32 %v877_v24  ;;  %v874_v26 = vmul.f32 0.03125, %v868_v25 }
 0x24d   : > { %v878_v27 = vadd.f32 1e-05, %v874_v26 }
 0x24e   : > { %v871_v28 = vpop.xlane.xlu1 %870 }
 0x24f   : > { %4765 = vrsqrt.f32 %v878_v27  ;;  %v875_v29 = vmul.f32 0.03125, %v871_v28 }
 0x251   : > { %v4762_v30 = vpop.eup %4761  ;;  %v879_v31 = vadd.f32 1e-05, %v875_v29  ;;  %v4093_v29 = vld [vmem:[%s6419_s6] ss:$0 sm:$0xff] }
 0x252   : > { %v884_v33 = vmul.f32 %v4762_v30, %v852_v1 }
 0x253   : > { %4767 = vrsqrt.f32 %v879_v31 }
 0x254   : > { %v894_v35 = vmul.f32 %v4091_v32, %v884_v33  ;;  %v4094_v33 = vld [vmem:[%s6420_s7] ss:$0 sm:$0xff] }
 0x255   : > { %v4764_v36 = vpop.eup %4763 }
 0x256   : > { %v5362_v37 = vadd.f32 %v4092_v34, %v894_v35  ;;  %v885_v38 = vmul.f32 %v4764_v36, %v853_v5 }
 0x258   : > { %v910_v39 = vsel %vm834_vm0, %v5362_v37, 0.0  ;;  %v895_v40 = vmul.f32 %v4091_v32, %v885_v38 }
 0x259   : > { %v4766_v41 = vpop.eup %4765  ;;  %911 = vadd.xlane.f32.xlu0 %v910_v39 }
 0x25a   : > { %v5366_v42 = vadd.f32 %v4092_v34, %v895_v40  ;;  %v886_v43 = vmul.f32 %v4766_v41, %v854_v10  ;;  %v983_v10 = vld [vmem:[%s6421_s8 + $0x8] sm:$0xff] }
 0x25b   : > { %v988_v11 = vpack.c.bf16 %v983_v10, %v982_v9 }
 0x25c   : > { %v913_v44 = vsel %vm834_vm0, %v5366_v42, 0.0  ;;  %v896_v45 = vmul.f32 %v4091_v32, %v886_v43 }
 0x25d   : > { %v4768_v46 = vpop.eup %4767  ;;  %914 = vadd.xlane.f32.xlu1 %v913_v44  ;;  %4363 = vmatprep.subr.bf16.mxu1 %v988_v11 }
 0x25e   : > { %v5370_v47 = vadd.f32 %v4092_v34, %v896_v45  ;;  %v887_v48 = vmul.f32 %v4768_v46, %v855_v15  ;;  %4364 = vmatpush3.bf16.msra.mxu1 %v988_v11 }
 0x25f   : > { %4365 = vmatprep.subr.bf16.mxu1 %v989_v14 }
 0x260   : > { %v916_v49 = vsel %vm834_vm0, %v5370_v47, 0.0  ;;  %v897_v50 = vmul.f32 %v4091_v32, %v887_v48 }
 0x261   : > { %917 = vadd.xlane.f32.xlu0 %v916_v49 }
 0x262   : > { %v5374_v51 = vadd.f32 %v4092_v34, %v897_v50  ;;  %4366 = vmatpush3.bf16.msra.mxu1 %v989_v14  ;;  %v4993_v50 = vmov 0.0  }
 0x263   : > { %4371 = vmatprep.subr.bf16.mxu0 %v4993_v50  ;;  %4377 = vmatprep.subr.bf16.mxu1 %v4993_v50 }
 0x264   : > { %v919_v52 = vsel %vm834_vm0, %v5374_v51, 0.0  ;;  %4373 = vmatprep.mubr.msk.bf16.mxu0 %vm4994_vm1, %v4993_v50 }
 0x265   : > { %920 = vadd.xlane.f32.xlu1 %v919_v52  ;;  %v4095_v52 = vld [vmem:[%s6422_s9] ss:$0 sm:$0xff] }
 0x2e6   : > { %v912_v53 = vpop.xlane.xlu0 %911 }
 0x2e7   : > { %v922_v54 = vmul.f32 0.03125, %v912_v53 }
 0x2e9   : > { %v926_v55 = vsub.f32 %v5362_v37, %v922_v54 }
 0x2ea   : > { %v915_v56 = vpop.xlane.xlu1 %914 }
 0x2eb   : > { %v923_v57 = vmul.f32 0.03125, %v915_v56  ;;  %v930_v58 = vmul.f32 %v926_v55, %v926_v55 }
 0x2ed   : > { %v927_v59 = vsub.f32 %v5366_v42, %v923_v57  ;;  %v934_v60 = vsel %vm834_vm0, %v930_v58, 0.0 }
 0x2ee   : > { %935 = vadd.xlane.f32.xlu0 %v934_v60  ;;  %v918_v61 = vpop.xlane.xlu0 %917 }
 0x2ef   : > { %v924_v62 = vmul.f32 0.03125, %v918_v61  ;;  %v931_v63 = vmul.f32 %v927_v59, %v927_v59 }
 0x2f1   : > { %v928_v0 = vsub.f32 %v5370_v47, %v924_v62  ;;  %v937_v1 = vsel %vm834_vm0, %v931_v63, 0.0 }
 0x2f2   : > { %938 = vadd.xlane.f32.xlu1 %v937_v1  ;;  %v921_v2 = vpop.xlane.xlu1 %920 }
 0x2f3   : > { %v925_v3 = vmul.f32 0.03125, %v921_v2  ;;  %v932_v4 = vmul.f32 %v928_v0, %v928_v0 }
 0x2f5   : > { %v929_v5 = vsub.f32 %v5374_v51, %v925_v3  ;;  %v940_v6 = vsel %vm834_vm0, %v932_v4, 0.0 }
 0x2f6   : > { %941 = vadd.xlane.f32.xlu0 %v940_v6 }
 0x2f7   : > { %v933_v7 = vmul.f32 %v929_v5, %v929_v5 }
 0x2f9   : > { %v943_v8 = vsel %vm834_vm0, %v933_v7, 0.0 }
 0x2fa   : > { %944 = vadd.xlane.f32.xlu1 %v943_v8 }
 0x37b   : > { %v936_v15 = vpop.xlane.xlu0 %935 }
 0x37c   : > { %v946_v16 = vmul.f32 0.03125, %v936_v15 }
 0x37e   : > { %v950_v17 = vadd.f32 1e-05, %v946_v16 }
 0x37f   : > { %v939_v18 = vpop.xlane.xlu1 %938 }
 0x380   : > { %4769 = vrsqrt.f32 %v950_v17  ;;  %v947_v19 = vmul.f32 0.03125, %v939_v18 }
 0x382   : > { %v951_v20 = vadd.f32 1e-05, %v947_v19 }
 0x383   : > { %v942_v21 = vpop.xlane.xlu0 %941 }
 0x384   : > { %4771 = vrsqrt.f32 %v951_v20  ;;  %v948_v22 = vmul.f32 0.03125, %v942_v21 }
 0x386   : > { %v952_v23 = vadd.f32 1e-05, %v948_v22 }
 0x387   : > { %v945_v24 = vpop.xlane.xlu1 %944 }
 0x388   : > { %4773 = vrsqrt.f32 %v952_v23  ;;  %v949_v25 = vmul.f32 0.03125, %v945_v24 }
 0x38a   : > { %v4770_v26 = vpop.eup %4769  ;;  %v953_v27 = vadd.f32 1e-05, %v949_v25 }
 0x38b   : > { %v958_v28 = vmul.f32 %v4770_v26, %v926_v55 }
 0x38c   : > { %4775 = vrsqrt.f32 %v953_v27 }
 0x38d   : > { %v968_v32 = vmul.f32 %v4093_v29, %v958_v28 }
 0x38e   : > { %v4772_v30 = vpop.eup %4771 }
 0x38f   : > { %v959_v31 = vmul.f32 %v4772_v30, %v927_v59  ;;  %v978_v38 = vadd.f32 %v4094_v33, %v968_v32 }
 0x391   : > { %v969_v34 = vmul.f32 %v4093_v29, %v959_v31 }
 0x392   : > { %v4774_v35 = vpop.eup %4773 }
 0x393   : > { %v960_v36 = vmul.f32 %v4774_v35, %v928_v0  ;;  %v979_v39 = vadd.f32 %v4094_v33, %v969_v34 }
 0x395   : > { %v986_v40 = vpack.c.bf16 %v979_v39, %v978_v38  ;;  %v970_v44 = vmul.f32 %v4093_v29, %v960_v36 }
 0x396   : > { %v4776_v41 = vpop.eup %4775 }
 0x397   : > { %v961_v43 = vmul.f32 %v4776_v41, %v929_v5  ;;  %4367 = vmatprep.mubr.msk.bf16.mxu1 %vm834_vm0, %v986_v40  ;;  %v980_v46 = vadd.f32 %v4094_v33, %v970_v44 }
 0x399   : > { %v971_v45 = vmul.f32 %v4093_v29, %v961_v43 }
 0x39b   : > { %v981_v48 = vadd.f32 %v4094_v33, %v971_v45 }
 0x39d   : > { %v987_v49 = vpack.c.bf16 %v981_v48, %v980_v46 }
 0x39f   : > { %4368 = vmatmul.mubr.msk.bf16.vlgmr.msra.gmra.mrb[4].mxu1 %vm834_vm0, %v987_v49 }
 0x3a0   : > { %4379 = vmatprep.mubr.msk.bf16.mxu1 %vm4994_vm1, %v4993_v50 }
 0x472   : > { %v4369_v53 = vpop.f32.mrb[4].mxu1 }
 0x473   : > { %v1046_v54 = vadd.f32 %v4369_v53, %v4095_v52  ;;  %v1037_v55 = vpop.f32.mrb[5].mxu1 }
 0x474   : > { %v1038_v56 = vadd.f32 %v4095_v52, %v1037_v55  ;;  %v4370_v57 = vpop.f32.mrb[6].mxu1 }
 0x475   : > { %v1049_v58 = vadd.f32 %v4370_v57, %v4095_v52  ;;  %v1040_v59 = vpop.f32.mrb[7].mxu1  ;;  %v1054_v61 = vmul.f32 0.35355338, %v1046_v54 }
 0x476   : > { %v1041_v60 = vadd.f32 %v4095_v52, %v1040_v59  ;;  %v1052_v0 = vmul.f32 0.35355338, %v1038_v56 }
 0x477   : > { %v1055_v62 = vmul.f32 0.35355338, %v1049_v58  ;;  %v5415_v63 = vpack.c.bf16 %v1049_v58, %v1046_v54 }
 0x478   : > { %v1053_v1 = vmul.f32 0.35355338, %v1041_v60  ;;  %v5417_v2 = vpack.c.bf16 %v1041_v60, %v1038_v56 }
 0x479   : > { %v5419_v3 = vpack.c.bf16 %v1055_v62, %v1054_v61 }
 0x47a   : > { %v1056_v4 = vpack.c.bf16 %v1053_v1, %v1052_v0  ;;  %1183 = vrot.lane.b32.xlu1 %v5417_v2, %s6461_s28  ;;  %1059 = vrot.lane.b32.xlu0 %v5417_v2, %s6463_s25 }
 0x47e   : > { %1302 = vrot.lane.b32.xlu0 %v1056_v4, %s6453_s26  ;;  %1181 = vrot.lane.b32.xlu1 %v1056_v4, %s6459_s24 }
 0x482   : > { %1423 = vrot.lane.b32.xlu0 %v1056_v4, %s6451_s27  ;;  %1304 = vrot.lane.b32.xlu1 %v5417_v2, %s6457_s20 }
 0x486   : > { %1700 = vrot.lane.b32.xlu0 %v5415_v63, %s6461_s28  ;;  %1425 = vrot.lane.b32.xlu1 %v5417_v2, %s6455_s23  ;;  %s6494_s28 = smov 72  }
 0x48a   : > { %1821 = vrot.lane.b32.xlu0 %v5415_v63, %s6457_s20  ;;  %1578 = vrot.lane.b32.xlu1 %v5415_v63, %s6463_s25  ;;  %s6491_s20 = smov 88   ;;  %s6495_s25 = smov 112  }
 0x48e   : > { %1942 = vrot.lane.b32.xlu0 %v5415_v63, %s6455_s23  ;;  %1698 = vrot.lane.b32.xlu1 %v5419_v3, %s6459_s24  ;;  %s6492_s23 = smov 120   ;;  %s6497_s24 = smov 64  }
 0x492   : > { %1133 = vrot.lane.b32.xlu0 %v5417_v2, %s6449_s3  ;;  %1819 = vrot.lane.b32.xlu1 %v5419_v3, %s6453_s26  ;;  %s6496_s26 = smov 104  }
 0x496   : > { %1940 = vrot.lane.b32.xlu1 %v5419_v3, %s6451_s27  ;;  %s6490_s27 = smov 96  }
 0x4ec   : > { %v1060_v5 = vpop.permute.xlu0 %1059  ;;  %v1184_v7 = vpop.permute.xlu1 %1183 }
 0x4ed   : > { %v1066_v6 = vsel %vm1061_vm2, %v1060_v5, 0  ;;  %v1189_v11 = vsel %vm1061_vm2, %v1184_v7, 0 }
 0x4ee   : > { %4372 = vmatpush3.bf16.xpose.msra.mxu0 %v1066_v6 }
 0x4ef   : > { %4383 = vmatprep.subr.bf16.mxu0 %v4993_v50 }
 0x4f0   : > { %v1303_v8 = vpop.permute.xlu0 %1302  ;;  %v1182_v9 = vpop.permute.xlu1 %1181 }
 0x4f4   : > { %v1424_v10 = vpop.permute.xlu0 %1423  ;;  %v1305_v13 = vpop.permute.xlu1 %1304 }
 0x4f5   : > { %4374 = vmatmul.mubr.msk.bf16.vlgmr.msra.gmra.mrb[8].mxu0 %vm1061_vm2, %v1056_v4  ;;  %v1310_v15 = vsel %vm1061_vm2, %v1305_v13, 0 }
 0x4f6   : > { %4384 = vmatpush3.bf16.xpose.msra.mxu0 %v1189_v11  ;;  %4385 = vmatprep.mubr.msk.bf16.mxu0 %vm4994_vm1, %v4993_v50 }
 0x4f7   : > { %4395 = vmatprep.subr.bf16.mxu0 %v4993_v50 }
 0x4f8   : > { %v1701_v12 = vpop.permute.xlu0 %1700  ;;  %v1426_v17 = vpop.permute.xlu1 %1425 }
 0x4f9   : > { %v1431_v19 = vsel %vm1061_vm2, %v1426_v17, 0  ;;  %v1706_v22 = vsel %vm1061_vm2, %v1701_v12, 0 }
 0x4fc   : > { %v1822_v14 = vpop.permute.xlu0 %1821  ;;  %v1579_v20 = vpop.permute.xlu1 %1578 }
 0x4fd   : > { %4386 = vmatmul.mubr.msk.bf16.vlgmr.msra.gmra.mrb[12].mxu0 %vm1061_vm2, %v1182_v9  ;;  %v1584_v21 = vsel %vm1061_vm2, %v1579_v20, 0  ;;  %v1827_v24 = vsel %vm1061_vm2, %v1822_v14, 0 }
 0x4fe   : > { %4396 = vmatpush3.bf16.xpose.msra.mxu0 %v1310_v15  ;;  %4397 = vmatprep.mubr.msk.bf16.mxu0 %vm4994_vm1, %v4993_v50 }
 0x4ff   : > { %4407 = vmatprep.subr.bf16.mxu0 %v4993_v50 }
 0x500   : > { %v1943_v16 = vpop.permute.xlu0 %1942  ;;  %v1699_v23 = vpop.permute.xlu1 %1698 }
 0x501   : > { %v1948_v26 = vsel %vm1061_vm2, %v1943_v16, 0 }
 0x504   : > { %v1134_v18 = vpop.permute.xlu0 %1133  ;;  %v1820_v25 = vpop.permute.xlu1 %1819 }
 0x505   : > { %4378 = vmatpush3.bf16.msra.mxu1 %v1134_v18  ;;  %4398 = vmatmul.mubr.msk.bf16.vlgmr.msra.gmra.mrb[16].mxu0 %vm1061_vm2, %v1303_v8 }
 0x506   : > { %4408 = vmatpush3.bf16.xpose.msra.mxu0 %v1431_v19  ;;  %4409 = vmatprep.mubr.msk.bf16.mxu0 %vm4994_vm1, %v4993_v50 }
 0x507   : > { %4419 = vmatprep.subr.bf16.mxu0 %v4993_v50  ;;  %4389 = vmatprep.subr.bf16.mxu1 %v4993_v50 }
 0x508   : > { %v1941_v27 = vpop.permute.xlu1 %1940 }
 0x50d   : > { %4410 = vmatmul.mubr.msk.bf16.vlgmr.msra.gmra.mrb[20].mxu0 %vm1061_vm2, %v1424_v10 }
 0x50e   : > { %4420 = vmatpush3.bf16.xpose.msra.mxu0 %v1584_v21  ;;  %4421 = vmatprep.mubr.msk.bf16.mxu0 %vm4994_vm1, %v4993_v50 }
 0x50f   : > { %4431 = vmatprep.subr.bf16.mxu0 %v4993_v50 }
 0x515   : > { %4422 = vmatmul.mubr.msk.bf16.vlgmr.msra.gmra.mrb[24].mxu0 %vm1061_vm2, %v5419_v3 }
 0x516   : > { %4432 = vmatpush3.bf16.xpose.msra.mxu0 %v1706_v22  ;;  %4433 = vmatprep.mubr.msk.bf16.mxu0 %vm4994_vm1, %v4993_v50 }
 0x517   : > { %4443 = vmatprep.subr.bf16.mxu0 %v4993_v50 }
 0x51d   : > { %4434 = vmatmul.mubr.msk.bf16.vlgmr.msra.gmra.mrb[28].mxu0 %vm1061_vm2, %v1699_v23 }
 0x51e   : > { %4444 = vmatpush3.bf16.xpose.msra.mxu0 %v1827_v24  ;;  %4445 = vmatprep.mubr.msk.bf16.mxu0 %vm4994_vm1, %v4993_v50 }
 0x51f   : > { %4455 = vmatprep.subr.bf16.mxu0 %v4993_v50 }
 0x525   : > { %4446 = vmatmul.mubr.msk.bf16.vlgmr.msra.gmra.mrb[32].mxu0 %vm1061_vm2, %v1820_v25 }
 0x526   : > { %4456 = vmatpush3.bf16.xpose.msra.mxu0 %v1948_v26  ;;  %4457 = vmatprep.mubr.msk.bf16.mxu0 %vm4994_vm1, %v4993_v50 }
 0x52d   : > { %4458 = vmatmul.mubr.msk.bf16.vlgmr.msra.gmra.mrb[36].mxu0 %vm1061_vm2, %v1941_v27 }
 0x5c8   : > { %v5487_v28 = vpop.f32.mrb[8].mxu0 }
 0x5c9   : > { %v4375_v29 = vpop.f32.mrb[9].mxu0  ;;  %v1110_v30 = vsel %vm1109_vm3, %v5487_v28, -inf }
 0x5ca   : > { %1111 = vmax.xlane.f32.xlu0 %v1110_v30  ;;  %v5491_v31 = vpop.f32.mrb[10].mxu0 }
 0x5cb   : > { %v4376_v32 = vpop.f32.mrb[11].mxu0  ;;  %v1113_v33 = vsel %vm1109_vm3, %v5491_v31, -inf }
 0x5cc   : > { %1114 = vmax.xlane.f32.xlu1 %v1113_v33 }
 0x5d0   : > { %v5495_v34 = vpop.f32.mrb[12].mxu0 }
 0x5d1   : > { %v4387_v35 = vpop.f32.mrb[13].mxu0  ;;  %v1232_v36 = vsel %vm1109_vm3, %v5495_v34, -inf }
 0x5d2   : > { %1233 = vmax.xlane.f32.xlu0 %v1232_v36  ;;  %v5499_v38 = vpop.f32.mrb[14].mxu0 }
 0x5d3   : > { %v4388_v39 = vpop.f32.mrb[15].mxu0  ;;  %v1235_v40 = vsel %vm1109_vm3, %v5499_v38, -inf }
 0x5d6   : > { %1236 = vmax.xlane.f32.xlu0 %v1235_v40 }
 0x5d8   : > { %v5503_v41 = vpop.f32.mrb[16].mxu0 }
 0x5d9   : > { %v4399_v43 = vpop.f32.mrb[17].mxu0  ;;  %v1353_v44 = vsel %vm1109_vm3, %v5503_v41, -inf }
 0x5da   : > { %1354 = vmax.xlane.f32.xlu0 %v1353_v44  ;;  %v5507_v45 = vpop.f32.mrb[18].mxu0 }
 0x5db   : > { %v4400_v46 = vpop.f32.mrb[19].mxu0  ;;  %v1356_v9 = vsel %vm1109_vm3, %v5507_v45, -inf }
 0x5dd   : > { %1255 = vrot.lane.b32.xlu1 %v5417_v2, %s6447_s30 }
 0x5e0   : > { %v5511_v48 = vpop.f32.mrb[20].mxu0 }
 0x5e1   : > { %v4411_v49 = vpop.f32.mrb[21].mxu0  ;;  %v1474_v52 = vsel %vm1109_vm3, %v5511_v48, -inf }
 0x5e2   : > { %1475 = vmax.xlane.f32.xlu0 %v1474_v52  ;;  %v5515_v53 = vpop.f32.mrb[22].mxu0 }
 0x5e3   : > { %v4412_v54 = vpop.f32.mrb[23].mxu0  ;;  %v1477_v14 = vsel %vm1109_vm3, %v5515_v53, -inf }
 0x5e8   : > { %v5517_v55 = vpop.f32.mrb[24].mxu0 }
 0x5e9   : > { %v4423_v56 = vpop.f32.mrb[25].mxu0  ;;  %v1627_v57 = vsel %vm1109_vm3, %v5517_v55, -inf }
 0x5ea   : > { %1628 = vmax.xlane.f32.xlu0 %v1627_v57  ;;  %v5521_v58 = vpop.f32.mrb[26].mxu0 }
 0x5eb   : > { %v4424_v59 = vpop.f32.mrb[27].mxu0  ;;  %v1630_v15 = vsel %vm1109_vm3, %v5521_v58, -inf }
 0x5f0   : > { %v5523_v60 = vpop.f32.mrb[28].mxu0 }
 0x5f1   : > { %v4435_v61 = vpop.f32.mrb[29].mxu0  ;;  %v1749_v62 = vsel %vm1109_vm3, %v5523_v60, -inf }
 0x5f2   : > { %1750 = vmax.xlane.f32.xlu0 %v1749_v62  ;;  %v5527_v0 = vpop.f32.mrb[30].mxu0 }
 0x5f3   : > { %v4436_v1 = vpop.f32.mrb[31].mxu0  ;;  %v1752_v16 = vsel %vm1109_vm3, %v5527_v0, -inf }
 0x5f8   : > { %v5529_v3 = vpop.f32.mrb[32].mxu0 }
 0x5f9   : > { %v4447_v4 = vpop.f32.mrb[33].mxu0  ;;  %v1870_v5 = vsel %vm1109_vm3, %v5529_v3, -inf }
 0x5fa   : > { %1871 = vmax.xlane.f32.xlu0 %v1870_v5  ;;  %v5533_v6 = vpop.f32.mrb[34].mxu0 }
 0x5fb   : > { %v4448_v7 = vpop.f32.mrb[35].mxu0  ;;  %v1873_v17 = vsel %vm1109_vm3, %v5533_v6, -inf }
 0x600   : > { %v5535_v8 = vpop.f32.mrb[36].mxu0 }
 0x601   : > { %1357 = vmax.xlane.f32.xlu1 %v1356_v9  ;;  %v4459_v10 = vpop.f32.mrb[37].mxu0  ;;  %v1991_v11 = vsel %vm1109_vm3, %v5535_v8, -inf }
 0x602   : > { %1992 = vmax.xlane.f32.xlu0 %v1991_v11  ;;  %v5541_v12 = vpop.f32.mrb[38].mxu0 }
 0x603   : > { %v4460_v13 = vpop.f32.mrb[39].mxu0  ;;  %v1994_v18 = vsel %vm1109_vm3, %v5541_v12, -inf }
 0x605   : > { %1478 = vmax.xlane.f32.xlu1 %v1477_v14 }
 0x609   : > { %1631 = vmax.xlane.f32.xlu1 %v1630_v15 }
 0x60d   : > { %1753 = vmax.xlane.f32.xlu1 %v1752_v16 }
 0x611   : > { %1874 = vmax.xlane.f32.xlu1 %v1873_v17 }
 0x615   : > { %1995 = vmax.xlane.f32.xlu1 %v1994_v18 }
 0x618   : > { %1376 = vrot.lane.b32.xlu0 %v5417_v2, %s6445_s0 }
 0x626   : > { %1497 = vrot.lane.b32.xlu1 %v5417_v2, %s6443_s1 }
 0x657   : > { %v1112_v19 = vpop.xlane.xlu0 %1111 }
 0x658   : > { %v1116_v20 = vsub.f32 %v5487_v28, %v1112_v19 }
 0x659   : > { %v1115_v21 = vpop.xlane.xlu1 %1114 }
 0x65a   : > { %v1118_v22 = vmul.f32 1.442695, %v1116_v20  ;;  %v1117_v23 = vsub.f32 %v5491_v31, %v1115_v21 }
 0x65c   : > { %4777 = vpow2.f32 %v1118_v22  ;;  %v1120_v24 = vmul.f32 1.442695, %v1117_v23 }
 0x65d   : > { %v5587_v56 = vpop.permute.xlu1 %1255 }
 0x65e   : > { %4779 = vpow2.f32 %v1120_v24 }
 0x65f   : > { %v1234_v25 = vpop.xlane.xlu0 %1233 }
 0x660   : > { %v1238_v26 = vsub.f32 %v5495_v34, %v1234_v25 }
 0x662   : > { %v1240_v27 = vmul.f32 1.442695, %v1238_v26 }
 0x663   : > { %v1237_v29 = vpop.xlane.xlu0 %1236 }
 0x664   : > { %4781 = vpow2.f32 %v1240_v27  ;;  %v1239_v30 = vsub.f32 %v5499_v38, %v1237_v29 }
 0x666   : > { %v5561_v32 = vpop.eup %4777  ;;  %v1242_v2 = vmul.f32 1.442695, %v1239_v30 }
 0x667   : > { %v1355_v33 = vpop.xlane.xlu0 %1354  ;;  %v1122_v28 = vsel %vm1109_vm3, %v5561_v32, 0.0 }
 0x668   : > { %v5565_v35 = vpop.eup %4779  ;;  %4783 = vpow2.f32 %v1242_v2  ;;  %v1359_v31 = vsub.f32 %v5503_v41, %v1355_v33  ;;  %1123 = vadd.xlane.f32.xlu0 %v1122_v28 }
 0x669   : > { %v1125_v34 = vsel %vm1109_vm3, %v5565_v35, 0.0 }
 0x66a   : > { %v1361_v36 = vmul.f32 1.442695, %v1359_v31  ;;  %1126 = vadd.xlane.f32.xlu1 %v1125_v34 }
 0x66c   : > { %4785 = vpow2.f32 %v1361_v36 }
 0x66e   : > { %v5570_v38 = vpop.eup %4781 }
 0x66f   : > { %v1476_v39 = vpop.xlane.xlu0 %1475  ;;  %v1244_v40 = vsel %vm1109_vm3, %v5570_v38, 0.0 }
 0x670   : > { %v1480_v43 = vsub.f32 %v5511_v48, %v1476_v39  ;;  %1245 = vadd.xlane.f32.xlu0 %v1244_v40 }
 0x672   : > { %v5575_v44 = vpop.eup %4783  ;;  %v1482_v46 = vmul.f32 1.442695, %v1480_v43 }
 0x673   : > { %v1247_v41 = vsel %vm1109_vm3, %v5575_v44, 0.0 }
 0x674   : > { %4787 = vpow2.f32 %v1482_v46  ;;  %1248 = vadd.xlane.f32.xlu1 %v1247_v41 }
 0x676   : > { %v5579_v49 = vpop.eup %4785 }
 0x677   : > { %v1365_v52 = vsel %vm1109_vm3, %v5579_v49, 0.0  ;;  %v1629_v57 = vpop.xlane.xlu0 %1628 }
 0x678   : > { %1366 = vadd.xlane.f32.xlu0 %v1365_v52  ;;  %v1633_v62 = vsub.f32 %v5517_v55, %v1629_v57 }
 0x67a   : > { %v1635_v7 = vmul.f32 1.442695, %v1633_v62 }
 0x67e   : > { %v5583_v54 = vpop.eup %4787 }
 0x67f   : > { %v1486_v48 = vsel %vm1109_vm3, %v5583_v54, 0.0  ;;  %v1751_v10 = vpop.xlane.xlu0 %1750 }
 0x680   : > { %1487 = vadd.xlane.f32.xlu0 %v1486_v48  ;;  %v1755_v20 = vsub.f32 %v5523_v60, %v1751_v10 }
 0x682   : > { %v1757_v25 = vmul.f32 1.442695, %v1755_v20 }
 0x68e   : > { %v1358_v59 = vpop.xlane.xlu1 %1357 }
 0x68f   : > { %v1360_v61 = vsub.f32 %v5507_v45, %v1358_v59  ;;  %v1872_v45 = vpop.xlane.xlu0 %1871 }
 0x691   : > { %v1363_v1 = vmul.f32 1.442695, %v1360_v61 }
 0x692   : > { %v1479_v4 = vpop.xlane.xlu1 %1478 }
 0x693   : > { %4789 = vpow2.f32 %v1363_v1  ;;  %v1481_v5 = vsub.f32 %v5515_v53, %v1479_v4  ;;  %v1876_v53 = vsub.f32 %v5529_v3, %v1872_v45 }
 0x695   : > { %v1484_v9 = vmul.f32 1.442695, %v1481_v5  ;;  %v1878_v22 = vmul.f32 1.442695, %v1876_v53 }
 0x696   : > { %v1632_v11 = vpop.xlane.xlu1 %1631  ;;  %1650 = vrot.lane.b32.xlu0 %v5415_v63, %s6449_s3  ;;  %s6493_s3 = smov 80  }
 0x697   : > { %4791 = vpow2.f32 %v1484_v9  ;;  %v1634_v13 = vsub.f32 %v5521_v58, %v1632_v11  ;;  %v1993_v58 = vpop.xlane.xlu0 %1992 }
 0x698   : > { %4793 = vpow2.f32 %v1635_v7  ;;  %v1997_v26 = vsub.f32 %v5535_v8, %v1993_v58 }
 0x699   : > { %v1637_v14 = vmul.f32 1.442695, %v1634_v13 }
 0x69a   : > { %v1754_v15 = vpop.xlane.xlu1 %1753 }
 0x69b   : > { %v1756_v55 = vsub.f32 %v5527_v0, %v1754_v15  ;;  %4795 = vpow2.f32 %v1637_v14  ;;  %v1377_v48 = vpop.permute.xlu0 %1376 }
 0x69d   : > { %v5596_v16 = vpop.eup %4789  ;;  %v1759_v17 = vmul.f32 1.442695, %v1756_v55 }
 0x69e   : > { %v1875_v18 = vpop.xlane.xlu1 %1874  ;;  %v1368_v19 = vsel %vm1109_vm3, %v5596_v16, 0.0 }
 0x69f   : > { %1369 = vadd.xlane.f32.xlu1 %v1368_v19  ;;  %4797 = vpow2.f32 %v1759_v17  ;;  %v1877_v0 = vsub.f32 %v5533_v6, %v1875_v18  ;;  %v1999_v6 = vmul.f32 1.442695, %v1997_v26 }
 0x6a0   : > { %4799 = vpow2.f32 %v1878_v22 }
 0x6a1   : > { %v5602_v21 = vpop.eup %4791  ;;  %v1880_v60 = vmul.f32 1.442695, %v1877_v0  ;;  %4801 = vpow2.f32 %v1757_v25 }
 0x6a2   : > { %v1996_v23 = vpop.xlane.xlu1 %1995  ;;  %v1489_v3 = vsel %vm1109_vm3, %v5602_v21, 0.0  ;;  %v5607_v24 = vpop.eup %4793 }
 0x6a3   : > { %1490 = vadd.xlane.f32.xlu1 %v1489_v3  ;;  %v1998_v27 = vsub.f32 %v5541_v12, %v1996_v23  ;;  %v1639_v29 = vsel %vm1109_vm3, %v5607_v24, 0.0  ;;  %4803 = vpow2.f32 %v1880_v60 }
 0x6a4   : > { %4805 = vpow2.f32 %v1999_v6 }
 0x6a5   : > { %v5613_v30 = vpop.eup %4795  ;;  %v2001_v2 = vmul.f32 1.442695, %v1998_v27 }
 0x6a6   : > { %v1642_v33 = vsel %vm1109_vm3, %v5613_v30, 0.0  ;;  %v1498_v57 = vpop.permute.xlu1 %1497 }
 0x6a7   : > { %1640 = vadd.xlane.f32.xlu1 %v1639_v29  ;;  %4807 = vpow2.f32 %v2001_v2 }
 0x6a9   : > { %v5617_v28 = vpop.eup %4797 }
 0x6aa   : > { %v1764_v8 = vsel %vm1109_vm3, %v5617_v28, 0.0  ;;  %v5621_v12 = vpop.eup %4799 }
 0x6ab   : > { %1643 = vadd.xlane.f32.xlu1 %v1642_v33  ;;  %v5623_v31 = vpop.eup %4801  ;;  %v1882_v34 = vsel %vm1109_vm3, %v5621_v12, 0.0 }
 0x6ac   : > { %v1761_v39 = vsel %vm1109_vm3, %v5623_v31, 0.0 }
 0x6ad   : > { %v5627_v36 = vpop.eup %4803 }
 0x6ae   : > { %v5631_v40 = vpop.eup %4805  ;;  %v1885_v43 = vsel %vm1109_vm3, %v5627_v36, 0.0 }
 0x6af   : > { %1765 = vadd.xlane.f32.xlu1 %v1764_v8  ;;  %v2003_v41 = vsel %vm1109_vm3, %v5631_v40, 0.0 }
 0x6b1   : > { %v5635_v46 = vpop.eup %4807 }
 0x6b2   : > { %v2006_v52 = vsel %vm1109_vm3, %v5635_v46, 0.0 }
 0x6b3   : > { %1883 = vadd.xlane.f32.xlu1 %v1882_v34 }
 0x6b5   : > { %1762 = vadd.xlane.f32.xlu0 %v1761_v39 }
 0x6b7   : > { %1886 = vadd.xlane.f32.xlu1 %v1885_v43 }
 0x6b9   : > { %2004 = vadd.xlane.f32.xlu0 %v2003_v41 }
 0x6bb   : > { %2007 = vadd.xlane.f32.xlu1 %v2006_v52 }
 0x6cc   : > { %1772 = vrot.lane.b32.xlu1 %v5415_v63, %s6447_s30  ;;  %s6465_s30 = smov 24  }
 0x6cf   : > { %1893 = vrot.lane.b32.xlu0 %v5415_v63, %s6445_s0  ;;  %s6467_s0 = smov 16  }
 0x6d3   : > { %2014 = vrot.lane.b32.xlu0 %v5415_v63, %s6443_s1  ;;  %s5006_s1 = smov 8  }
 0x6f5   : > { %v1124_v59 = vpop.xlane.xlu0 %1123 }
 0x6f6   : > { %4809 = vrcp.f32 %v1124_v59 }
 0x6f7   : > { %v1127_v61 = vpop.xlane.xlu1 %1126 }
 0x6f8   : > { %4811 = vrcp.f32 %v1127_v61 }
 0x6fd   : > { %v1246_v62 = vpop.xlane.xlu0 %1245 }
 0x6fe   : > { %4813 = vrcp.f32 %v1246_v62 }
 0x700   : > { %v4810_v1 = vpop.eup %4809 }
 0x701   : > { %v1249_v4 = vpop.xlane.xlu1 %1248  ;;  %v1130_v7 = vmul.f32 %v4810_v1, %v5561_v32 }
 0x702   : > { %v4812_v5 = vpop.eup %4811  ;;  %4815 = vrcp.f32 %v1249_v4 }
 0x703   : > { %v1131_v9 = vmul.f32 %v4812_v5, %v5565_v35 }
 0x705   : > { %v1132_v10 = vpack.c.bf16 %v1131_v9, %v1130_v7  ;;  %v1367_v32 = vpop.xlane.xlu0 %1366 }
 0x706   : > { %4817 = vrcp.f32 %v1367_v32 }
 0x707   : > { %4380 = vmatmul.mubr.msk.bf16.vlgmr.msra.gmra.mrb[8].mxu1 %vm1109_vm3, %v1132_v10 }
 0x708   : > { %4390 = vmatpush3.bf16.msra.mxu1 %v5587_v56  ;;  %4391 = vmatprep.mubr.msk.bf16.mxu1 %vm4994_vm1, %v4993_v50  ;;  %v4814_v63 = vpop.eup %4813 }
 0x709   : > { %4401 = vmatprep.subr.bf16.mxu1 %v4993_v50  ;;  %v1252_v13 = vmul.f32 %v4814_v63, %v5570_v38 }
 0x70c   : > { %v4816_v11 = vpop.eup %4815 }
 0x70d   : > { %v1253_v14 = vmul.f32 %v4816_v11, %v5575_v44  ;;  %v1488_v56 = vpop.xlane.xlu0 %1487 }
 0x70f   : > { %v1254_v45 = vpack.c.bf16 %v1253_v14, %v1252_v13 }
 0x710   : > { %v4818_v55 = vpop.eup %4817 }
 0x711   : > { %4392 = vmatmul.mubr.msk.bf16.vlgmr.msra.gmra.mrb[12].mxu1 %vm1109_vm3, %v1254_v45  ;;  %v1373_v53 = vmul.f32 %v4818_v55, %v5579_v49  ;;  %v1651_v0 = vpop.permute.xlu0 %1650 }
 0x712   : > { %4402 = vmatpush3.bf16.msra.mxu1 %v1377_v48  ;;  %4403 = vmatprep.mubr.msk.bf16.mxu1 %vm4994_vm1, %v4993_v50 }
 0x713   : > { %4413 = vmatprep.subr.bf16.mxu1 %v4993_v50 }
 0x72c   : > { %v1370_v35 = vpop.xlane.xlu1 %1369 }
 0x72d   : > { %4819 = vrcp.f32 %v1370_v35 }
 0x730   : > { %v1491_v15 = vpop.xlane.xlu1 %1490 }
 0x731   : > { %4821 = vrcp.f32 %v1491_v15 }
 0x732   : > { %4823 = vrcp.f32 %v1488_v56 }
 0x734   : > { %v1641_v38 = vpop.xlane.xlu1 %1640 }
 0x737   : > { %v4820_v44 = vpop.eup %4819 }
 0x738   : > { %v1374_v17 = vmul.f32 %v4820_v44, %v5596_v16  ;;  %v1644_v18 = vpop.xlane.xlu1 %1643 }
 0x739   : > { %4825 = vrcp.f32 %v1644_v18 }
 0x73a   : > { %v1375_v19 = vpack.c.bf16 %v1374_v17, %v1373_v53  ;;  %4827 = vrcp.f32 %v1641_v38 }
 0x73b   : > { %v4822_v20 = vpop.eup %4821 }
 0x73c   : > { %4404 = vmatmul.mubr.msk.bf16.vlgmr.msra.gmra.mrb[16].mxu1 %vm1109_vm3, %v1375_v19  ;;  %v1766_v58 = vpop.xlane.xlu1 %1765  ;;  %v4824_v22 = vpop.eup %4823  ;;  %v1495_v23 = vmul.f32 %v4822_v20, %v5602_v21 }
 0x73d   : > { %4414 = vmatpush3.bf16.msra.mxu1 %v1498_v57  ;;  %4415 = vmatprep.mubr.msk.bf16.mxu1 %vm4994_vm1, %v4993_v50  ;;  %v1494_v49 = vmul.f32 %v4824_v22, %v5583_v54  ;;  %4829 = vrcp.f32 %v1766_v58  ;;  %v2091_v22 = vld [vmem:[%s6423_s10] sm:$0xff] }
 0x73e   : > { %4425 = vmatprep.subr.bf16.mxu1 %v4993_v50 }
 0x73f   : > { %v1496_v25 = vpack.c.bf16 %v1495_v23, %v1494_v49 }
 0x740   : > { %v1884_v16 = vpop.xlane.xlu1 %1883 }
 0x742   : > { %v1763_v3 = vpop.xlane.xlu0 %1762 }
 0x743   : > { %v4826_v26 = vpop.eup %4825  ;;  %4831 = vrcp.f32 %v1763_v3  ;;  %v2093_v3 = vld [vmem:[%s6423_s10 + $0x10] sm:$0xff] }
 0x744   : > { %4416 = vmatmul.mubr.msk.bf16.vlgmr.msra.gmra.mrb[20].mxu1 %vm1109_vm3, %v1496_v25  ;;  %v1887_v60 = vpop.xlane.xlu1 %1886  ;;  %v4828_v27 = vpop.eup %4827  ;;  %v1648_v21 = vmul.f32 %v4826_v26, %v5613_v30  ;;  %v2094_v25 = vld [vmem:[%s6423_s10 + $0x18] sm:$0xff] }
 0x745   : > { %4426 = vmatpush3.bf16.msra.mxu1 %v1651_v0  ;;  %4427 = vmatprep.mubr.msk.bf16.mxu1 %vm4994_vm1, %v4993_v50  ;;  %v1647_v54 = vmul.f32 %v4828_v27, %v5607_v24  ;;  %4833 = vrcp.f32 %v1887_v60  ;;  %v2092_v0 = vld [vmem:[%s6423_s10 + $0x8] sm:$0xff]  ;;  %v2098_v60 = vpack.c.bf16 %v2094_v25, %v2093_v3 }
 0x746   : > { %4437 = vmatprep.subr.bf16.mxu1 %v4993_v50  ;;  %4835 = vrcp.f32 %v1884_v16  ;;  %v2005_v30 = vpop.xlane.xlu0 %2004  ;;  %v2097_v16 = vpack.c.bf16 %v2092_v0, %v2091_v22 }
 0x747   : > { %v1649_v6 = vpack.c.bf16 %v1648_v21, %v1647_v54  ;;  %v4830_v2 = vpop.eup %4829 }
 0x748   : > { %v2008_v29 = vpop.xlane.xlu1 %2007  ;;  %v1770_v24 = vmul.f32 %v4830_v2, %v5617_v28  ;;  %4467 = vmatprep.subr.bf16.mxu0 %v2097_v16 }
 0x749   : > { %4837 = vrcp.f32 %v2008_v29  ;;  %4468 = vmatpush3.bf16.msra.mxu0 %v2097_v16 }
 0x74a   : > { %4839 = vrcp.f32 %v2005_v30  ;;  %v1894_v41 = vpop.permute.xlu0 %1893  ;;  %4469 = vmatprep.subr.bf16.mxu0 %v2098_v60 }
 0x74c   : > { %4428 = vmatmul.mubr.msk.bf16.vlgmr.msra.gmra.mrb[24].mxu1 %vm1109_vm3, %v1649_v6  ;;  %v1773_v33 = vpop.permute.xlu1 %1772 }
 0x74d   : > { %v4832_v8 = vpop.eup %4831  ;;  %4438 = vmatpush3.bf16.msra.mxu1 %v1773_v33  ;;  %4439 = vmatprep.mubr.msk.bf16.mxu1 %vm4994_vm1, %v4993_v50 }
 0x74e   : > { %v1769_v34 = vmul.f32 %v4832_v8, %v5623_v31  ;;  %4449 = vmatprep.subr.bf16.mxu1 %v4993_v50  ;;  %v2015_v59 = vpop.permute.xlu0 %2014  ;;  %4470 = vmatpush3.bf16.msra.mxu0 %v2098_v60 }
 0x74f   : > { %v4834_v43 = vpop.eup %4833 }
 0x750   : > { %v1771_v39 = vpack.c.bf16 %v1770_v24, %v1769_v34  ;;  %v4836_v52 = vpop.eup %4835  ;;  %v1891_v48 = vmul.f32 %v4834_v43, %v5627_v36 }
 0x751   : > { %v1890_v31 = vmul.f32 %v4836_v52, %v5621_v12 }
 0x753   : > { %v1892_v57 = vpack.c.bf16 %v1891_v48, %v1890_v31  ;;  %v4838_v28 = vpop.eup %4837 }
 0x754   : > { %4440 = vmatmul.mubr.msk.bf16.vlgmr.msra.gmra.mrb[28].mxu1 %vm1109_vm3, %v1771_v39  ;;  %v4840_v61 = vpop.eup %4839  ;;  %v2012_v62 = vmul.f32 %v4838_v28, %v5635_v46 }
 0x755   : > { %4450 = vmatpush3.bf16.msra.mxu1 %v1894_v41  ;;  %4451 = vmatprep.mubr.msk.bf16.mxu1 %vm4994_vm1, %v4993_v50  ;;  %v2011_v1 = vmul.f32 %v4840_v61, %v5631_v40 }
 0x756   : > { %4461 = vmatprep.subr.bf16.mxu1 %v4993_v50 }
 0x757   : > { %v2013_v4 = vpack.c.bf16 %v2012_v62, %v2011_v1 }
 0x75c   : > { %4452 = vmatmul.mubr.msk.bf16.vlgmr.msra.gmra.mrb[32].mxu1 %vm1109_vm3, %v1892_v57 }
 0x75d   : > { %4462 = vmatpush3.bf16.msra.mxu1 %v2015_v59  ;;  %4463 = vmatprep.mubr.msk.bf16.mxu1 %vm4994_vm1, %v4993_v50 }
 0x764   : > { %4464 = vmatmul.mubr.msk.bf16.vlgmr.msra.gmra.mrb[36].mxu1 %vm1109_vm3, %v2013_v4 }
 0x7da   : > { %v5692_v36 = vpop.f32.mrb[8].mxu1 }
 0x7db   : > { %v4381_v12 = vpop.f32.mrb[9].mxu1 }
 0x7dc   : > { %v5694_v5 = vpop.f32.mrb[10].mxu1 }
 0x7dd   : > { %v4382_v7 = vpop.f32.mrb[11].mxu1 }
 0x7e4   : > { %v1295_v9 = vpop.f32.mrb[12].mxu1 }
 0x7e5   : > { %v4393_v10 = vpop.f32.mrb[13].mxu1 }
 0x7e6   : > { %v1298_v63 = vpop.f32.mrb[14].mxu1 }
 0x7e7   : > { %v4701_v11 = vpack.i.bf16 %v1298_v63, %v1295_v9  ;;  %v4394_v13 = vpop.f32.mrb[15].mxu1 }
 0x7e9   : > { %4702 = vrot.lane.b32.xlu0 %v4701_v11, %s5006_s1 }
 0x80f   : > { %v1416_v46 = vpop.f32.mrb[16].mxu1 }
 0x810   : > { %v4405_v14 = vpop.f32.mrb[17].mxu1 }
 0x811   : > { %v1419_v40 = vpop.f32.mrb[18].mxu1 }
 0x812   : > { %v4706_v45 = vpack.i.bf16 %v1419_v40, %v1416_v46  ;;  %v4406_v32 = vpop.f32.mrb[19].mxu1 }
 0x814   : > { %4707 = vrot.lane.b32.xlu1 %v4706_v45, %s6467_s0 }
 0x817   : > { %v1537_v35 = vpop.f32.mrb[20].mxu1 }
 0x818   : > { %v4417_v56 = vpop.f32.mrb[21].mxu1 }
 0x819   : > { %v1540_v15 = vpop.f32.mrb[22].mxu1 }
 0x81a   : > { %v4711_v38 = vpack.i.bf16 %v1540_v15, %v1537_v35  ;;  %v4418_v55 = vpop.f32.mrb[23].mxu1 }
 0x81b   : > { %v4116_v55 = vld [vmem:[%s6424_s11] ss:$0 sm:$0xff] }
 0x81c   : > { %4712 = vrot.lane.b32.xlu1 %v4711_v38, %s6465_s30 }
 0x81f   : > { %v1690_v44 = vpop.f32.mrb[24].mxu1 }
 0x820   : > { %v4429_v53 = vpop.f32.mrb[25].mxu1 }
 0x821   : > { %v1693_v17 = vpop.f32.mrb[26].mxu1 }
 0x822   : > { %v4430_v18 = vpop.f32.mrb[27].mxu1 }
 0x827   : > { %v1812_v19 = vpop.f32.mrb[28].mxu1 }
 0x828   : > { %v4441_v20 = vpop.f32.mrb[29].mxu1 }
 0x829   : > { %v1815_v58 = vpop.f32.mrb[30].mxu1 }
 0x82a   : > { %v4716_v23 = vpack.i.bf16 %v1815_v58, %v1812_v19  ;;  %v4442_v49 = vpop.f32.mrb[31].mxu1 }
 0x82c   : > { %4717 = vrot.lane.b32.xlu0 %v4716_v23, %s5006_s1 }
 0x82f   : > { %v1933_v26 = vpop.f32.mrb[32].mxu1 }
 0x830   : > { %v4453_v27 = vpop.f32.mrb[33].mxu1 }
 0x831   : > { %v1936_v21 = vpop.f32.mrb[34].mxu1 }
 0x832   : > { %v4721_v54 = vpack.i.bf16 %v1936_v21, %v1933_v26  ;;  %v4454_v29 = vpop.f32.mrb[35].mxu1 }
 0x834   : > { %4722 = vrot.lane.b32.xlu0 %v4721_v54, %s6467_s0  ;;  %s6499_s0 = smov 48  }
 0x837   : > { %v2054_v6 = vpop.f32.mrb[36].mxu1 }
 0x838   : > { %v4465_v2 = vpop.f32.mrb[37].mxu1 }
 0x839   : > { %v2057_v33 = vpop.f32.mrb[38].mxu1 }
 0x83a   : > { %v4726_v8 = vpack.i.bf16 %v2057_v33, %v2054_v6  ;;  %v4466_v34 = vpop.f32.mrb[39].mxu1 }
 0x83c   : > { %4727 = vrot.lane.b32.xlu1 %v4726_v8, %s6465_s30  ;;  %s6498_s30 = smov 56  }
 0x85b   : > { %v4703_v30 = vpop.permute.xlu0 %4702 }
 0x85c   : > { %v4705_v39 = vunpack.i.h.bf16 %v4703_v30  ;;  %v4704_v43 = vunpack.i.l.bf16 %v4703_v30 }
 0x85e   : > { %v1569_v31 = vsel %vm1061_vm2, %v5694_v5, %v4705_v39  ;;  %v1568_v57 = vsel %vm1061_vm2, %v5692_v36, %v4704_v43 }
 0x886   : > { %v4708_v24 = vpop.permute.xlu1 %4707 }
 0x887   : > { %v4710_v41 = vunpack.i.h.bf16 %v4708_v24  ;;  %v4709_v52 = vunpack.i.l.bf16 %v4708_v24 }
 0x889   : > { %v1571_v61 = vsel %vm1109_vm3, %v1569_v31, %v4710_v41  ;;  %v1570_v62 = vsel %vm1109_vm3, %v1568_v57, %v4709_v52  ;;  %v2244_v31 = vld [vmem:[%s6427_s14 + $0x8] sm:$0xff] }
 0x88e   : > { %v4713_v48 = vpop.permute.xlu1 %4712 }
 0x88f   : > { %v4715_v28 = vunpack.i.h.bf16 %v4713_v48  ;;  %v4714_v59 = vunpack.i.l.bf16 %v4713_v48  ;;  %v2243_v48 = vld [vmem:[%s6427_s14] sm:$0xff] }
 0x890   : > { %v2249_v57 = vpack.c.bf16 %v2244_v31, %v2243_v48  ;;  %v2332_v31 = vld [vmem:[%s6429_s16 + $0x78] sm:$0xff] }
 0x891   : > { %v1573_v1 = vsel %vm1572_vm4, %v1570_v62, %v4714_v59  ;;  %v1574_v4 = vsel %vm1572_vm4, %v1571_v61, %v4715_v28  ;;  %v2245_v28 = vld [vmem:[%s6427_s14 + $0x10] sm:$0xff]  ;;  %v2246_v59 = vld [vmem:[%s6427_s14 + $0x18] sm:$0xff]  ;;  %v2317_v62 = vld [vmem:[%s6429_s16] sm:$0xff] }
 0x892   : > { %v2095_v12 = vpack.c.bf16 %v1574_v4, %v1573_v1  ;;  %4475 = vmatprep.subr.bf16.mxu1 %v2249_v57  ;;  %v2250_v61 = vpack.c.bf16 %v2246_v59, %v2245_v28  ;;  %v2318_v1 = vld [vmem:[%s6429_s16 + $0x8] sm:$0xff]  ;;  %v2319_v4 = vld [vmem:[%s6429_s16 + $0x10] sm:$0xff]  ;;  %v4119_v28 = vld [vmem:[%s6428_s15] ss:$0 sm:$0xff] }
 0x893   : > { %4476 = vmatpush3.bf16.msra.mxu1 %v2249_v57 }
 0x894   : > { %4471 = vmatprep.mubr.msk.bf16.mxu0 %vm834_vm0, %v2095_v12  ;;  %4477 = vmatprep.subr.bf16.mxu1 %v2250_v61  ;;  %v2335_v12 = vpack.c.bf16 %v2318_v1, %v2317_v62 }
 0x896   : > { %4483 = vmatprep.subr.bf16.mxu0 %v2335_v12 }
 0x897   : > { %4478 = vmatpush3.bf16.msra.mxu1 %v2250_v61 }
 0x89e   : > { %v4718_v7 = vpop.permute.xlu0 %4717 }
 0x89f   : > { %v4720_v10 = vunpack.i.h.bf16 %v4718_v7  ;;  %v4719_v5 = vunpack.i.l.bf16 %v4718_v7  ;;  %v2320_v7 = vld [vmem:[%s6429_s16 + $0x18] sm:$0xff] }
 0x8a1   : > { %v2086_v13 = vsel %vm1061_vm2, %v1693_v17, %v4720_v10  ;;  %v2085_v46 = vsel %vm1061_vm2, %v1690_v44, %v4719_v5  ;;  %v2321_v10 = vld [vmem:[%s6429_s16 + $0x20] sm:$0xff]  ;;  %v2322_v5 = vld [vmem:[%s6429_s16 + $0x28] sm:$0xff] }
 0x8a6   : > { %v4723_v9 = vpop.permute.xlu0 %4722 }
 0x8a7   : > { %v4725_v63 = vunpack.i.h.bf16 %v4723_v9  ;;  %v4724_v11 = vunpack.i.l.bf16 %v4723_v9  ;;  %v2336_v9 = vpack.c.bf16 %v2320_v7, %v2319_v4 }
 0x8a9   : > { %v2088_v45 = vsel %vm1109_vm3, %v2086_v13, %v4725_v63  ;;  %v2087_v32 = vsel %vm1109_vm3, %v2085_v46, %v4724_v11  ;;  %v2337_v63 = vpack.c.bf16 %v2322_v5, %v2321_v10  ;;  %v2323_v11 = vld [vmem:[%s6429_s16 + $0x30] sm:$0xff]  ;;  %v2325_v46 = vld [vmem:[%s6429_s16 + $0x40] sm:$0xff] }
 0x8ae   : > { %v4728_v36 = vpop.permute.xlu1 %4727 }
 0x8af   : > { %v4730_v14 = vunpack.i.h.bf16 %v4728_v36  ;;  %v4729_v40 = vunpack.i.l.bf16 %v4728_v36  ;;  %v2324_v36 = vld [vmem:[%s6429_s16 + $0x38] sm:$0xff] }
 0x8b0   : > { %v2338_v13 = vpack.c.bf16 %v2324_v36, %v2323_v11 }
 0x8b1   : > { %v2090_v35 = vsel %vm1572_vm4, %v2088_v45, %v4730_v14  ;;  %v2089_v56 = vsel %vm1572_vm4, %v2087_v32, %v4729_v40  ;;  %v2326_v14 = vld [vmem:[%s6429_s16 + $0x48] sm:$0xff]  ;;  %v2327_v45 = vld [vmem:[%s6429_s16 + $0x50] sm:$0xff]  ;;  %v2328_v32 = vld [vmem:[%s6429_s16 + $0x58] sm:$0xff] }
 0x8b2   : > { %v2096_v15 = vpack.c.bf16 %v2090_v35, %v2089_v56  ;;  %v2339_v40 = vpack.c.bf16 %v2326_v14, %v2325_v46  ;;  %v2340_v35 = vpack.c.bf16 %v2328_v32, %v2327_v45  ;;  %v4122_v14 = vld [vmem:[%s6430_s17] ss:$0 sm:$0xff] }
 0x8b4   : > { %4472 = vmatmul.mubr.msk.bf16.vlgmr.msra.gmra.mrb[40].mxu0 %vm834_vm0, %v2096_v15 }
 0x8b5   : > { %4484 = vmatpush3.bf16.msra.mxu0 %v2335_v12 }
 0x8b6   : > { %4485 = vmatprep.subr.bf16.mxu0 %v2336_v9 }
 0x8b9   : > { %4486 = vmatpush3.bf16.msra.mxu0 %v2336_v9 }
 0x8ba   : > { %4487 = vmatprep.subr.bf16.mxu0 %v2337_v63 }
 0x8bd   : > { %4488 = vmatpush3.bf16.msra.mxu0 %v2337_v63 }
 0x8be   : > { %4489 = vmatprep.subr.bf16.mxu0 %v2338_v13 }
 0x8c1   : > { %4490 = vmatpush3.bf16.msra.mxu0 %v2338_v13 }
 0x8c2   : > { %4491 = vmatprep.subr.bf16.mxu0 %v2339_v40 }
 0x8c5   : > { %4492 = vmatpush3.bf16.msra.mxu0 %v2339_v40 }
 0x8c6   : > { %4493 = vmatprep.subr.bf16.mxu0 %v2340_v35 }
 0x8c9   : > { %4494 = vmatpush3.bf16.msra.mxu0 %v2340_v35 }
 0x987   : > { %v4473_v38 = vpop.f32.mrb[40].mxu0 }
 0x988   : > { %v2139_v53 = vpop.f32.mrb[41].mxu0  ;;  %v2156_v44 = vadd.f32 %v4473_v38, %v5370_v47 }
 0x989   : > { %v2154_v17 = vadd.f32 %v2139_v53, %v5362_v37  ;;  %v4474_v18 = vpop.f32.mrb[42].mxu0 }
 0x98a   : > { %v2142_v19 = vpop.f32.mrb[43].mxu0  ;;  %v5738_v22 = vadd.f32 %v4116_v55, %v2156_v44  ;;  %v2157_v0 = vadd.f32 %v4474_v18, %v5374_v51 }
 0x98b   : > { %v5735_v20 = vadd.f32 %v4116_v55, %v2154_v17  ;;  %v2155_v58 = vadd.f32 %v2142_v19, %v5366_v42 }
 0x98c   : > { %v5747_v37 = vadd.f32 %v4116_v55, %v2157_v0  ;;  %v2177_v16 = vsel %vm834_vm0, %v5738_v22, 0.0 }
 0x98d   : > { %v5741_v23 = vadd.f32 %v4116_v55, %v2155_v58  ;;  %v2171_v49 = vsel %vm834_vm0, %v5735_v20, 0.0 }
 0x98e   : > { %2172 = vadd.xlane.f32.xlu0 %v2171_v49  ;;  %v2180_v42 = vsel %vm834_vm0, %v5747_v37, 0.0 }
 0x98f   : > { %v2174_v47 = vsel %vm834_vm0, %v5741_v23, 0.0 }
 0x990   : > { %2175 = vadd.xlane.f32.xlu1 %v2174_v47 }
 0x992   : > { %2178 = vadd.xlane.f32.xlu0 %v2177_v16  ;;  %v4117_v16 = vld [vmem:[%s6425_s12] ss:$0 sm:$0xff] }
 0x996   : > { %2181 = vadd.xlane.f32.xlu0 %v2180_v42 }
 0xa1b   : > { %v2173_v51 = vpop.xlane.xlu0 %2172 }
 0xa1c   : > { %v2183_v3 = vmul.f32 0.03125, %v2173_v51 }
 0xa1d   : > { %v2176_v25 = vpop.xlane.xlu1 %2175 }
 0xa1e   : > { %v5754_v26 = vsub.f32 %v5735_v20, %v2183_v3  ;;  %v2184_v60 = vmul.f32 0.03125, %v2176_v25 }
 0xa1f   : > { %v2179_v27 = vpop.xlane.xlu0 %2178 }
 0xa20   : > { %v5757_v21 = vsub.f32 %v5741_v23, %v2184_v60  ;;  %v2185_v54 = vmul.f32 0.03125, %v2179_v27  ;;  %v2191_v29 = vmul.f32 %v5754_v26, %v5754_v26  ;;  %v4118_v27 = vld [vmem:[%s6426_s13] ss:$0 sm:$0xff] }
 0xa22   : > { %v5762_v6 = vsub.f32 %v5738_v22, %v2185_v54  ;;  %v2195_v2 = vsel %vm834_vm0, %v2191_v29, 0.0  ;;  %v2192_v33 = vmul.f32 %v5757_v21, %v5757_v21 }
 0xa23   : > { %2196 = vadd.xlane.f32.xlu0 %v2195_v2  ;;  %v2182_v8 = vpop.xlane.xlu0 %2181 }
 0xa24   : > { %v2186_v34 = vmul.f32 0.03125, %v2182_v8  ;;  %v2198_v30 = vsel %vm834_vm0, %v2192_v33, 0.0  ;;  %v2193_v24 = vmul.f32 %v5762_v6, %v5762_v6 }
 0xa25   : > { %2199 = vadd.xlane.f32.xlu1 %v2198_v30 }
 0xa26   : > { %v5771_v39 = vsub.f32 %v5747_v37, %v2186_v34  ;;  %v2201_v43 = vsel %vm834_vm0, %v2193_v24, 0.0 }
 0xa27   : > { %2202 = vadd.xlane.f32.xlu0 %v2201_v43 }
 0xa28   : > { %v2194_v41 = vmul.f32 %v5771_v39, %v5771_v39 }
 0xa2a   : > { %v2204_v52 = vsel %vm834_vm0, %v2194_v41, 0.0 }
 0xa2b   : > { %2205 = vadd.xlane.f32.xlu1 %v2204_v52  ;;  %v2330_v52 = vld [vmem:[%s6429_s16 + $0x68] sm:$0xff] }
 0xab0   : > { %v2197_v56 = vpop.xlane.xlu0 %2196 }
 0xab1   : > { %v2207_v15 = vmul.f32 0.03125, %v2197_v56 }
 0xab2   : > { %v2200_v38 = vpop.xlane.xlu1 %2199 }
 0xab3   : > { %v2211_v55 = vadd.f32 1e-05, %v2207_v15  ;;  %v2208_v53 = vmul.f32 0.03125, %v2200_v38 }
 0xab4   : > { %v2203_v44 = vpop.xlane.xlu0 %2202 }
 0xab5   : > { %4841 = vrsqrt.f32 %v2211_v55  ;;  %v2212_v17 = vadd.f32 1e-05, %v2208_v53  ;;  %v2209_v18 = vmul.f32 0.03125, %v2203_v44 }
 0xab7   : > { %4843 = vrsqrt.f32 %v2212_v17  ;;  %v2213_v19 = vadd.f32 1e-05, %v2209_v18 }
 0xab8   : > { %v2206_v58 = vpop.xlane.xlu1 %2205 }
 0xab9   : > { %4845 = vrsqrt.f32 %v2213_v19  ;;  %v2210_v0 = vmul.f32 0.03125, %v2206_v58 }
 0xabb   : > { %v2214_v49 = vadd.f32 1e-05, %v2210_v0 }
 0xabd   : > { %4847 = vrsqrt.f32 %v2214_v49 }
 0xabf   : > { %v4842_v47 = vpop.eup %4841 }
 0xac0   : > { %v2219_v42 = vmul.f32 %v4842_v47, %v5754_v26 }
 0xac1   : > { %v4844_v51 = vpop.eup %4843 }
 0xac2   : > { %v2220_v3 = vmul.f32 %v4844_v51, %v5757_v21  ;;  %v2229_v25 = vmul.f32 %v4117_v16, %v2219_v42 }
 0xac3   : > { %v4846_v60 = vpop.eup %4845 }
 0xac4   : > { %v2221_v54 = vmul.f32 %v4846_v60, %v5762_v6  ;;  %v2230_v29 = vmul.f32 %v4117_v16, %v2220_v3  ;;  %v2239_v2 = vadd.f32 %v4118_v27, %v2229_v25  ;;  %v2329_v6 = vld [vmem:[%s6429_s16 + $0x60] sm:$0xff] }
 0xac5   : > { %v2341_v48 = vpack.c.bf16 %v2330_v52, %v2329_v6 }
 0xac6   : > { %v2240_v33 = vadd.f32 %v4118_v27, %v2230_v29  ;;  %v2231_v34 = vmul.f32 %v4117_v16, %v2221_v54 }
 0xac7   : > { %v4848_v8 = vpop.eup %4847  ;;  %4495 = vmatprep.subr.bf16.mxu0 %v2341_v48 }
 0xac8   : > { %v2222_v30 = vmul.f32 %v4848_v8, %v5771_v39  ;;  %v2247_v24 = vpack.c.bf16 %v2240_v33, %v2239_v2  ;;  %v2241_v21 = vadd.f32 %v4118_v27, %v2231_v34  ;;  %4496 = vmatpush3.bf16.msra.mxu0 %v2341_v48  ;;  %v2331_v39 = vld [vmem:[%s6429_s16 + $0x70] sm:$0xff] }
 0xac9   : > { %v2342_v57 = vpack.c.bf16 %v2332_v31, %v2331_v39 }
 0xaca   : > { %v2232_v26 = vmul.f32 %v4117_v16, %v2222_v30  ;;  %4479 = vmatprep.mubr.msk.bf16.mxu1 %vm834_vm0, %v2247_v24  ;;  %v4127_v24 = vld [vmem:[%s6421_s8 + $0x20] sm:$0xff] }
 0xacb   : > { %4497 = vmatprep.subr.bf16.mxu0 %v2342_v57 }
 0xacc   : > { %v2242_v43 = vadd.f32 %v4118_v27, %v2232_v26  ;;  %4498 = vmatpush3.bf16.msra.mxu0 %v2342_v57  ;;  %v4128_v26 = vld [vmem:[%s6421_s8 + $0x28] sm:$0xff] }
 0xacd   : > { %4529 = vmatprep.subr.bf16.mxu0 %v4993_v50 }
 0xace   : > { %v2248_v41 = vpack.c.bf16 %v2242_v43, %v2241_v21  ;;  %v2490_v21 = vpack.c.bf16 %v4128_v26, %v4127_v24  ;;  %v4129_v43 = vld [vmem:[%s6421_s8 + $0x30] sm:$0xff] }
 0xad0   : > { %4480 = vmatmul.mubr.msk.bf16.vlgmr.msra.gmra.mrb[40].mxu1 %vm834_vm0, %v2248_v41  ;;  %4503 = vmatprep.subr.bf16.mxu1 %v2490_v21  ;;  %v4130_v41 = vld [vmem:[%s6421_s8 + $0x38] sm:$0xff] }
 0xad1   : > { %4504 = vmatpush3.bf16.msra.mxu1 %v2490_v21  ;;  %v2491_v6 = vpack.c.bf16 %v4130_v41, %v4129_v43 }
 0xad3   : > { %4505 = vmatprep.subr.bf16.mxu1 %v2491_v6 }
 0xad5   : > { %4506 = vmatpush3.bf16.msra.mxu1 %v2491_v6 }
 0xad6   : > { %4511 = vmatprep.subr.bf16.mxu1 %v4993_v50 }
 0xba3   : > { %v4481_v59 = vpop.f32.mrb[40].mxu1 }
 0xba4   : > { %v2307_v61 = vadd.f32 %v4481_v59, %v4119_v28  ;;  %v2298_v62 = vpop.f32.mrb[41].mxu1 }
 0xba5   : > { %v2299_v1 = vadd.f32 %v4119_v28, %v2298_v62  ;;  %v4482_v4 = vpop.f32.mrb[42].mxu1 }
 0xba6   : > { %v2310_v12 = vadd.f32 %v4482_v4, %v4119_v28  ;;  %v2301_v7 = vpop.f32.mrb[43].mxu1  ;;  %v2315_v10 = vmax.f32 %v2307_v61, 0.0 }
 0xba7   : > { %v2302_v9 = vadd.f32 %v4119_v28, %v2301_v7  ;;  %v2313_v63 = vmax.f32 %v2299_v1, 0.0 }
 0xba8   : > { %v2316_v5 = vmax.f32 %v2310_v12, 0.0 }
 0xba9   : > { %v2314_v11 = vmax.f32 %v2302_v9, 0.0  ;;  %v4125_v9 = vld [vmem:[%s6419_s6 + $0x1] ss:$0 sm:$0xff] }
 0xbaa   : > { %v2334_v36 = vpack.c.bf16 %v2316_v5, %v2315_v10 }
 0xbab   : > { %v2333_v13 = vpack.c.bf16 %v2314_v11, %v2313_v63 }
 0xbad   : > { %4499 = vmatprep.mubr.bf16.mxu0 %v2333_v13  ;;  %v4126_v13 = vld [vmem:[%s6420_s7 + $0x1] ss:$0 sm:$0xff] }
 0xbae   : > { %4500 = vmatmul.mubr.bf16.vlgmr.msra.gmra.mrb[44].mxu0 %v2334_v36 }
 0xbaf   : > { %4531 = vmatprep.mubr.msk.bf16.mxu0 %vm4994_vm1, %v4993_v50 }
 0xc81   : > { %v4501_v46 = vpop.f32.mrb[44].mxu0 }
 0xc82   : > { %v2377_v40 = vpop.f32.mrb[45].mxu0  ;;  %v2394_v45 = vadd.f32 %v4501_v46, %v5738_v22 }
 0xc83   : > { %v2392_v32 = vadd.f32 %v2377_v40, %v5735_v20  ;;  %v4502_v35 = vpop.f32.mrb[46].mxu0 }
 0xc84   : > { %v2380_v56 = vpop.f32.mrb[47].mxu0  ;;  %v2395_v38 = vadd.f32 %v4502_v35, %v5747_v37  ;;  %v5864_v53 = vadd.f32 %v4122_v14, %v2394_v45 }
 0xc85   : > { %v5860_v15 = vadd.f32 %v4122_v14, %v2392_v32  ;;  %v2393_v55 = vadd.f32 %v2380_v56, %v5741_v23 }
 0xc86   : > { %v5870_v18 = vadd.f32 %v4122_v14, %v2395_v38  ;;  %v2417_v22 = vsel %vm834_vm0, %v5864_v53, 0.0 }
 0xc87   : > { %v5866_v44 = vadd.f32 %v4122_v14, %v2393_v55  ;;  %v2411_v17 = vsel %vm834_vm0, %v5860_v15, 0.0 }
 0xc88   : > { %2412 = vadd.xlane.f32.xlu0 %v2411_v17  ;;  %v2420_v23 = vsel %vm834_vm0, %v5870_v18, 0.0 }
 0xc89   : > { %v2414_v20 = vsel %vm834_vm0, %v5866_v44, 0.0 }
 0xc8a   : > { %2415 = vadd.xlane.f32.xlu1 %v2414_v20 }
 0xc8c   : > { %2418 = vadd.xlane.f32.xlu0 %v2417_v22 }
 0xc8e   : > { %2421 = vadd.xlane.f32.xlu1 %v2420_v23  ;;  %v4132_v23 = vld [vmem:[%s6422_s9 + $0x1] ss:$0 sm:$0xff] }
 0xd15   : > { %v2413_v37 = vpop.xlane.xlu0 %2412 }
 0xd16   : > { %v2423_v19 = vmul.f32 0.03125, %v2413_v37 }
 0xd17   : > { %v2416_v58 = vpop.xlane.xlu1 %2415 }
 0xd18   : > { %v2427_v0 = vsub.f32 %v5860_v15, %v2423_v19  ;;  %v2424_v49 = vmul.f32 0.03125, %v2416_v58 }
 0xd19   : > { %v2419_v47 = vpop.xlane.xlu0 %2418 }
 0xd1a   : > { %v2428_v16 = vsub.f32 %v5866_v44, %v2424_v49  ;;  %v2425_v42 = vmul.f32 0.03125, %v2419_v47  ;;  %v2431_v51 = vmul.f32 %v2427_v0, %v2427_v0 }
 0xd1b   : > { %v2422_v3 = vpop.xlane.xlu1 %2421 }
 0xd1c   : > { %v2429_v25 = vsub.f32 %v5864_v53, %v2425_v42  ;;  %v2426_v60 = vmul.f32 0.03125, %v2422_v3  ;;  %v2435_v27 = vsel %vm834_vm0, %v2431_v51, 0.0  ;;  %v2432_v54 = vmul.f32 %v2428_v16, %v2428_v16 }
 0xd1d   : > { %2436 = vadd.xlane.f32.xlu0 %v2435_v27 }
 0xd1e   : > { %v2430_v29 = vsub.f32 %v5870_v18, %v2426_v60  ;;  %v2438_v2 = vsel %vm834_vm0, %v2432_v54, 0.0  ;;  %v2433_v33 = vmul.f32 %v2429_v25, %v2429_v25 }
 0xd1f   : > { %2439 = vadd.xlane.f32.xlu1 %v2438_v2 }
 0xd20   : > { %v2441_v8 = vsel %vm834_vm0, %v2433_v33, 0.0  ;;  %v2434_v34 = vmul.f32 %v2430_v29, %v2430_v29 }
 0xd21   : > { %2442 = vadd.xlane.f32.xlu0 %v2441_v8 }
 0xd22   : > { %v2444_v30 = vsel %vm834_vm0, %v2434_v34, 0.0 }
 0xd23   : > { %2445 = vadd.xlane.f32.xlu1 %v2444_v30 }
 0xdaa   : > { %v2437_v52 = vpop.xlane.xlu0 %2436 }
 0xdab   : > { %v2447_v48 = vmul.f32 0.03125, %v2437_v52 }
 0xdac   : > { %v2440_v39 = vpop.xlane.xlu1 %2439 }
 0xdad   : > { %v2451_v31 = vadd.f32 1e-05, %v2447_v48  ;;  %v2448_v57 = vmul.f32 0.03125, %v2440_v39 }
 0xdae   : > { %v2443_v28 = vpop.xlane.xlu0 %2442 }
 0xdaf   : > { %4849 = vrsqrt.f32 %v2451_v31  ;;  %v2452_v59 = vadd.f32 1e-05, %v2448_v57  ;;  %v2449_v61 = vmul.f32 0.03125, %v2443_v28 }
 0xdb0   : > { %v2446_v62 = vpop.xlane.xlu1 %2445 }
 0xdb1   : > { %4851 = vrsqrt.f32 %v2452_v59  ;;  %v2453_v1 = vadd.f32 1e-05, %v2449_v61  ;;  %v2450_v4 = vmul.f32 0.03125, %v2446_v62 }
 0xdb3   : > { %4853 = vrsqrt.f32 %v2453_v1  ;;  %v2454_v12 = vadd.f32 1e-05, %v2450_v4 }
 0xdb5   : > { %4855 = vrsqrt.f32 %v2454_v12 }
 0xdb9   : > { %v4850_v7 = vpop.eup %4849 }
 0xdba   : > { %v2459_v10 = vmul.f32 %v4850_v7, %v2427_v0 }
 0xdbb   : > { %v4852_v5 = vpop.eup %4851 }
 0xdbc   : > { %v2460_v63 = vmul.f32 %v4852_v5, %v2428_v16  ;;  %v2469_v11 = vmul.f32 %v4125_v9, %v2459_v10 }
 0xdbd   : > { %v4854_v36 = vpop.eup %4853 }
 0xdbe   : > { %v2461_v46 = vmul.f32 %v4854_v36, %v2429_v25  ;;  %v2470_v14 = vmul.f32 %v4125_v9, %v2460_v63  ;;  %v2479_v35 = vadd.f32 %v4126_v13, %v2469_v11 }
 0xdbf   : > { %v4856_v40 = vpop.eup %4855 }
 0xdc0   : > { %v2471_v45 = vmul.f32 %v4125_v9, %v2461_v46  ;;  %v2462_v32 = vmul.f32 %v4856_v40, %v2430_v29  ;;  %v2480_v56 = vadd.f32 %v4126_v13, %v2470_v14 }
 0xdc2   : > { %v2472_v38 = vmul.f32 %v4125_v9, %v2462_v32  ;;  %v2488_v55 = vpack.c.bf16 %v2480_v56, %v2479_v35  ;;  %v2481_v17 = vadd.f32 %v4126_v13, %v2471_v45 }
 0xdc4   : > { %4507 = vmatprep.mubr.msk.bf16.mxu1 %vm834_vm0, %v2488_v55  ;;  %v2482_v20 = vadd.f32 %v4126_v13, %v2472_v38 }
 0xdc6   : > { %v2489_v22 = vpack.c.bf16 %v2482_v20, %v2481_v17 }
 0xdc8   : > { %4508 = vmatmul.mubr.msk.bf16.vlgmr.msra.gmra.mrb[44].mxu1 %vm834_vm0, %v2489_v22 }
 0xdc9   : > { %4513 = vmatprep.mubr.msk.bf16.mxu1 %vm4994_vm1, %v4993_v50 }
 0xe9b   : > { %v4509_v37 = vpop.f32.mrb[44].mxu1 }
 0xe9c   : > { %v2549_v19 = vadd.f32 %v4509_v37, %v4132_v23  ;;  %v2540_v58 = vpop.f32.mrb[45].mxu1 }
 0xe9d   : > { %v2541_v0 = vadd.f32 %v4132_v23, %v2540_v58  ;;  %v4510_v49 = vpop.f32.mrb[46].mxu1 }
 0xe9e   : > { %v2552_v47 = vadd.f32 %v4510_v49, %v4132_v23  ;;  %v2543_v16 = vpop.f32.mrb[47].mxu1  ;;  %v2557_v51 = vmul.f32 0.35355338, %v2549_v19 }
 0xe9f   : > { %v2544_v42 = vadd.f32 %v4132_v23, %v2543_v16  ;;  %v2555_v60 = vmul.f32 0.35355338, %v2541_v0 }
 0xea0   : > { %v2558_v3 = vmul.f32 0.35355338, %v2552_v47  ;;  %v5912_v25 = vpack.c.bf16 %v2552_v47, %v2549_v19 }
 0xea1   : > { %v2556_v27 = vmul.f32 0.35355338, %v2544_v42  ;;  %v5914_v54 = vpack.c.bf16 %v2544_v42, %v2541_v0 }
 0xea2   : > { %v5916_v29 = vpack.c.bf16 %v2558_v3, %v2557_v51 }
 0xea3   : > { %v2559_v2 = vpack.c.bf16 %v2556_v27, %v2555_v60  ;;  %2562 = vrot.lane.b32.xlu0 %v5914_v54, %s6490_s27 }
 0xea7   : > { %2684 = vrot.lane.b32.xlu0 %v5914_v54, %s6491_s20 }
 0xeab   : > { %2682 = vrot.lane.b32.xlu0 %v2559_v2, %s6492_s23 }
 0xeaf   : > { %2805 = vrot.lane.b32.xlu0 %v5914_v54, %s6493_s3 }
 0xeb3   : > { %2926 = vrot.lane.b32.xlu0 %v5914_v54, %s6494_s28 }
 0xeb7   : > { %3078 = vrot.lane.b32.xlu0 %v5912_v25, %s6490_s27  ;;  %s6500_s27 = smov 40  }
 0xebb   : > { %3198 = vrot.lane.b32.xlu0 %v5916_v29, %s6492_s23  ;;  %s6502_s23 = smov 24  }
 0xebf   : > { %3319 = vrot.lane.b32.xlu0 %v5916_v29, %s6495_s25 }
 0xec3   : > { %3440 = vrot.lane.b32.xlu0 %v5916_v29, %s6496_s26 }
 0xf15   : > { %v2563_v33 = vpop.permute.xlu0 %2562 }
 0xf16   : > { %v2568_v8 = vsel %vm1061_vm2, %v2563_v33, 0 }
 0xf17   : > { %4512 = vmatpush3.bf16.xpose.msra.mxu1 %v2568_v8 }
 0xf18   : > { %4517 = vmatprep.subr.bf16.mxu1 %v4993_v50 }
 0xf19   : > { %v2685_v7 = vpop.permute.xlu0 %2684 }
 0xf1a   : > { %v2690_v36 = vsel %vm1061_vm2, %v2685_v7, 0 }
 0xf1d   : > { %v2683_v11 = vpop.permute.xlu0 %2682 }
 0xf1e   : > { %4514 = vmatmul.mubr.msk.bf16.vlgmr.msra.gmra.mrb[48].mxu1 %vm1061_vm2, %v2559_v2 }
 0xf1f   : > { %4519 = vmatprep.mubr.msk.bf16.mxu1 %vm4994_vm1, %v4993_v50 }
 0xf21   : > { %v2806_v13 = vpop.permute.xlu0 %2805 }
 0xf22   : > { %v2811_v46 = vsel %vm1061_vm2, %v2806_v13, 0 }
 0xf25   : > { %v2927_v14 = vpop.permute.xlu0 %2926 }
 0xf26   : > { %v2932_v45 = vsel %vm1061_vm2, %v2927_v14, 0 }
 0xf29   : > { %v3079_v32 = vpop.permute.xlu0 %3078 }
 0xf2a   : > { %v3084_v56 = vsel %vm1061_vm2, %v3079_v32, 0 }
 0xf2d   : > { %v3199_v20 = vpop.permute.xlu0 %3198 }
 0xf31   : > { %v3320_v37 = vpop.permute.xlu0 %3319 }
 0xf35   : > { %v3441_v58 = vpop.permute.xlu0 %3440 }
 0xff1   : > { %v2604_v34 = vpop.f32.mrb[48].mxu1 }
 0xff2   : > { %v4515_v30 = vpop.f32.mrb[49].mxu1  ;;  %v2611_v24 = vsel %vm1109_vm3, %v2604_v34, -inf }
 0xff3   : > { %2612 = vmax.xlane.f32.xlu1 %v2611_v24  ;;  %v2607_v26 = vpop.f32.mrb[50].mxu1 }
 0xff4   : > { %v4516_v21 = vpop.f32.mrb[51].mxu1  ;;  %v2614_v43 = vsel %vm1109_vm3, %v2607_v26, -inf }
 0xff7   : > { %2615 = vmax.xlane.f32.xlu1 %v2614_v43 }
0x1080   : > { %v2613_v41 = vpop.xlane.xlu1 %2612 }
0x1081   : > { %v2617_v6 = vsub.f32 %v2604_v34, %v2613_v41 }
0x1083   : > { %v2619_v52 = vmul.f32 1.442695, %v2617_v6 }
0x1084   : > { %v2616_v48 = vpop.xlane.xlu1 %2615 }
0x1085   : > { %4857 = vpow2.f32 %v2619_v52  ;;  %v2618_v39 = vsub.f32 %v2607_v26, %v2616_v48 }
0x1087   : > { %v2621_v31 = vmul.f32 1.442695, %v2618_v39 }
0x1089   : > { %4859 = vpow2.f32 %v2621_v31 }
0x108f   : > { %v4858_v57 = vpop.eup %4857 }
0x1090   : > { %v2623_v28 = vsel %vm1109_vm3, %v4858_v57, 0.0 }
0x1091   : > { %2624 = vadd.xlane.f32.xlu1 %v2623_v28 }
0x1093   : > { %v4860_v59 = vpop.eup %4859 }
0x1094   : > { %v2626_v61 = vsel %vm1109_vm3, %v4860_v59, 0.0 }
0x1095   : > { %2627 = vadd.xlane.f32.xlu1 %v2626_v61 }
0x10a6   : > { %2634 = vrot.lane.b32.xlu1 %v5914_v54, %s6497_s24 }
0x10aa   : > { %2803 = vrot.lane.b32.xlu1 %v2559_v2, %s6495_s25 }
0x10ae   : > { %2924 = vrot.lane.b32.xlu1 %v2559_v2, %s6496_s26  ;;  %s6503_s26 = sld [smem:[#allocation17_spill]] }
0x10b2   : > { %3200 = vrot.lane.b32.xlu1 %v5912_v25, %s6491_s20  ;;  %s6501_s20 = smov 16  }
0x10b6   : > { %3321 = vrot.lane.b32.xlu1 %v5912_v25, %s6493_s3 }
0x10ba   : > { %3442 = vrot.lane.b32.xlu1 %v5912_v25, %s6494_s28 }
0x111e   : > { %v2625_v62 = vpop.xlane.xlu1 %2624 }
0x111f   : > { %4861 = vrcp.f32 %v2625_v62 }
0x1122   : > { %v2628_v1 = vpop.xlane.xlu1 %2627 }
0x1123   : > { %4863 = vrcp.f32 %v2628_v1 }
0x1126   : > { %v2635_v4 = vpop.permute.xlu1 %2634 }
0x1127   : > { %4518 = vmatpush3.bf16.msra.mxu1 %v2635_v4 }
0x1128   : > { %4523 = vmatprep.subr.bf16.mxu1 %v4993_v50 }
0x1129   : > { %v4862_v12 = vpop.eup %4861 }
0x112a   : > { %v2631_v10 = vmul.f32 %v4862_v12, %v4858_v57  ;;  %v2804_v40 = vpop.permute.xlu1 %2803 }
0x112d   : > { %v4864_v9 = vpop.eup %4863 }
0x112e   : > { %v2632_v5 = vmul.f32 %v4864_v9, %v4860_v59  ;;  %v2925_v35 = vpop.permute.xlu1 %2924 }
0x1130   : > { %v2633_v63 = vpack.c.bf16 %v2632_v5, %v2631_v10 }
0x1132   : > { %4520 = vmatmul.mubr.msk.bf16.vlgmr.msra.gmra.mrb[52].mxu1 %vm1109_vm3, %v2633_v63  ;;  %v3201_v38 = vpop.permute.xlu1 %3200 }
0x1133   : > { %4524 = vmatpush3.bf16.xpose.msra.mxu1 %v2690_v36  ;;  %4525 = vmatprep.mubr.msk.bf16.mxu1 %vm4994_vm1, %v4993_v50  ;;  %v3206_v55 = vsel %vm1061_vm2, %v3201_v38, 0 }
0x1134   : > { %4535 = vmatprep.subr.bf16.mxu1 %v4993_v50 }
0x1136   : > { %v3322_v17 = vpop.permute.xlu1 %3321 }
0x1137   : > { %v3327_v22 = vsel %vm1061_vm2, %v3322_v17, 0 }
0x113a   : > { %4526 = vmatmul.mubr.msk.bf16.vlgmr.msra.gmra.mrb[56].mxu1 %vm1061_vm2, %v2683_v11  ;;  %v3443_v23 = vpop.permute.xlu1 %3442 }
0x113b   : > { %4536 = vmatpush3.bf16.xpose.msra.mxu1 %v2811_v46  ;;  %4537 = vmatprep.mubr.msk.bf16.mxu1 %vm4994_vm1, %v4993_v50  ;;  %v3448_v19 = vsel %vm1061_vm2, %v3443_v23, 0 }
0x113c   : > { %4547 = vmatprep.subr.bf16.mxu1 %v4993_v50 }
0x1142   : > { %4538 = vmatmul.mubr.msk.bf16.vlgmr.msra.gmra.mrb[60].mxu1 %vm1061_vm2, %v2804_v40 }
0x1143   : > { %4548 = vmatpush3.bf16.xpose.msra.mxu1 %v2932_v45  ;;  %4549 = vmatprep.mubr.msk.bf16.mxu1 %vm4994_vm1, %v4993_v50 }
0x1144   : > { %4559 = vmatprep.subr.bf16.mxu1 %v4993_v50 }
0x114a   : > { %4550 = vmatmul.mubr.msk.bf16.vlgmr.msra.gmra.mrb[64].mxu1 %vm1061_vm2, %v2925_v35 }
0x114b   : > { %4560 = vmatpush3.bf16.xpose.msra.mxu1 %v3084_v56  ;;  %4561 = vmatprep.mubr.msk.bf16.mxu1 %vm4994_vm1, %v4993_v50 }
0x114c   : > { %4571 = vmatprep.subr.bf16.mxu1 %v4993_v50 }
0x1152   : > { %4562 = vmatmul.mubr.msk.bf16.vlgmr.msra.gmra.mrb[68].mxu1 %vm1061_vm2, %v5916_v29 }
0x1153   : > { %4572 = vmatpush3.bf16.xpose.msra.mxu1 %v3206_v55  ;;  %4573 = vmatprep.mubr.msk.bf16.mxu1 %vm4994_vm1, %v4993_v50 }
0x1154   : > { %4583 = vmatprep.subr.bf16.mxu1 %v4993_v50 }
0x115a   : > { %4574 = vmatmul.mubr.msk.bf16.vlgmr.msra.gmra.mrb[72].mxu1 %vm1061_vm2, %v3199_v20 }
0x115b   : > { %4584 = vmatpush3.bf16.xpose.msra.mxu1 %v3327_v22  ;;  %4585 = vmatprep.mubr.msk.bf16.mxu1 %vm4994_vm1, %v4993_v50 }
0x115c   : > { %4595 = vmatprep.subr.bf16.mxu1 %v4993_v50 }
0x1162   : > { %4586 = vmatmul.mubr.msk.bf16.vlgmr.msra.gmra.mrb[76].mxu1 %vm1061_vm2, %v3320_v37 }
0x1163   : > { %4596 = vmatpush3.bf16.xpose.msra.mxu1 %v3448_v19  ;;  %4597 = vmatprep.mubr.msk.bf16.mxu1 %vm4994_vm1, %v4993_v50 }
0x116a   : > { %4598 = vmatmul.mubr.msk.bf16.vlgmr.msra.gmra.mrb[80].mxu1 %vm1061_vm2, %v3441_v58 }
0x1205   : > { %v5991_v0 = vpop.f32.mrb[52].mxu1 }
0x1206   : > { %v4521_v49 = vpop.f32.mrb[53].mxu1 }
0x1207   : > { %v5993_v47 = vpop.f32.mrb[54].mxu1 }
0x1208   : > { %v4522_v16 = vpop.f32.mrb[55].mxu1 }
0x120d   : > { %v2726_v42 = vpop.f32.mrb[56].mxu1 }
0x120e   : > { %v4527_v51 = vpop.f32.mrb[57].mxu1  ;;  %v2733_v3 = vsel %vm1109_vm3, %v2726_v42, -inf }
0x120f   : > { %2734 = vmax.xlane.f32.xlu1 %v2733_v3  ;;  %v2729_v60 = vpop.f32.mrb[58].mxu1 }
0x1210   : > { %v4528_v27 = vpop.f32.mrb[59].mxu1  ;;  %v2736_v29 = vsel %vm1109_vm3, %v2729_v60, -inf }
0x1211   : > { %2737 = vmax.xlane.f32.xlu0 %v2736_v29 }
0x1215   : > { %v5997_v2 = vpop.f32.mrb[60].mxu1 }
0x1216   : > { %v4539_v33 = vpop.f32.mrb[61].mxu1  ;;  %v2854_v8 = vsel %vm1109_vm3, %v5997_v2, -inf }
0x1217   : > { %2855 = vmax.xlane.f32.xlu0 %v2854_v8  ;;  %v6001_v34 = vpop.f32.mrb[62].mxu1 }
0x1218   : > { %v4540_v30 = vpop.f32.mrb[63].mxu1  ;;  %v2857_v24 = vsel %vm1109_vm3, %v6001_v34, -inf }
0x121b   : > { %2858 = vmax.xlane.f32.xlu0 %v2857_v24 }
0x121d   : > { %v6005_v26 = vpop.f32.mrb[64].mxu1 }
0x121e   : > { %v4551_v21 = vpop.f32.mrb[65].mxu1  ;;  %v2975_v46 = vsel %vm1109_vm3, %v6005_v26, -inf }
0x121f   : > { %v6007_v43 = vpop.f32.mrb[66].mxu1 }
0x1220   : > { %2756 = vrot.lane.b32.xlu1 %v5914_v54, %s6498_s30  ;;  %v4552_v41 = vpop.f32.mrb[67].mxu1  ;;  %v2978_v6 = vsel %vm1109_vm3, %v6007_v43, -inf }
0x1221   : > { %2979 = vmax.xlane.f32.xlu0 %v2978_v6 }
0x1225   : > { %v6013_v52 = vpop.f32.mrb[68].mxu1 }
0x1226   : > { %v4563_v48 = vpop.f32.mrb[69].mxu1  ;;  %v3127_v14 = vsel %vm1109_vm3, %v6013_v52, -inf }
0x1227   : > { %v6015_v39 = vpop.f32.mrb[70].mxu1 }
0x1228   : > { %v4564_v31 = vpop.f32.mrb[71].mxu1  ;;  %v3130_v57 = vsel %vm1109_vm3, %v6015_v39, -inf }
0x1229   : > { %3131 = vmax.xlane.f32.xlu0 %v3130_v57 }
0x122d   : > { %v6019_v28 = vpop.f32.mrb[72].mxu1 }
0x122e   : > { %v4575_v59 = vpop.f32.mrb[73].mxu1  ;;  %v3249_v40 = vsel %vm1109_vm3, %v6019_v28, -inf }
0x122f   : > { %v6021_v61 = vpop.f32.mrb[74].mxu1 }
0x1230   : > { %v4576_v62 = vpop.f32.mrb[75].mxu1  ;;  %v3252_v1 = vsel %vm1109_vm3, %v6021_v61, -inf }
0x1231   : > { %3253 = vmax.xlane.f32.xlu0 %v3252_v1 }
0x1235   : > { %v6025_v4 = vpop.f32.mrb[76].mxu1 }
0x1236   : > { %v4587_v12 = vpop.f32.mrb[77].mxu1  ;;  %v3370_v45 = vsel %vm1109_vm3, %v6025_v4, -inf }
0x1237   : > { %v6027_v7 = vpop.f32.mrb[78].mxu1 }
0x1238   : > { %v4588_v9 = vpop.f32.mrb[79].mxu1  ;;  %v3373_v10 = vsel %vm1109_vm3, %v6027_v7, -inf }
0x1239   : > { %3374 = vmax.xlane.f32.xlu0 %v3373_v10 }
0x123d   : > { %v6031_v5 = vpop.f32.mrb[80].mxu1 }
0x123e   : > { %v4599_v63 = vpop.f32.mrb[81].mxu1  ;;  %v3491_v32 = vsel %vm1109_vm3, %v6031_v5, -inf }
0x123f   : > { %v6033_v11 = vpop.f32.mrb[82].mxu1 }
0x1240   : > { %v4600_v36 = vpop.f32.mrb[83].mxu1  ;;  %v3494_v13 = vsel %vm1109_vm3, %v6033_v11, -inf }
0x1241   : > { %3495 = vmax.xlane.f32.xlu0 %v3494_v13 }
0x1244   : > { %2976 = vmax.xlane.f32.xlu1 %v2975_v46 }
0x1248   : > { %3128 = vmax.xlane.f32.xlu1 %v3127_v14 }
0x124c   : > { %3250 = vmax.xlane.f32.xlu1 %v3249_v40 }
0x1250   : > { %3371 = vmax.xlane.f32.xlu1 %v3370_v45 }
0x1254   : > { %3492 = vmax.xlane.f32.xlu1 %v3491_v32 }
0x1257   : > { %2877 = vrot.lane.b32.xlu0 %v5914_v54, %s6499_s0 }
0x1265   : > { %2998 = vrot.lane.b32.xlu1 %v5914_v54, %s6500_s27 }
0x129c   : > { %v2735_v35 = vpop.xlane.xlu1 %2734 }
0x129d   : > { %v2739_v56 = vsub.f32 %v2726_v42, %v2735_v35 }
0x129e   : > { %v2738_v38 = vpop.xlane.xlu0 %2737 }
0x129f   : > { %v2741_v55 = vmul.f32 1.442695, %v2739_v56  ;;  %v2740_v17 = vsub.f32 %v2729_v60, %v2738_v38 }
0x12a0   : > { %v2757_v20 = vpop.permute.xlu1 %2756 }
0x12a1   : > { %4865 = vpow2.f32 %v2741_v55  ;;  %v2743_v22 = vmul.f32 1.442695, %v2740_v17  ;;  %4530 = vmatpush3.bf16.msra.mxu0 %v2757_v20 }
0x12a2   : > { %4541 = vmatprep.subr.bf16.mxu0 %v4993_v50 }
0x12a3   : > { %4867 = vpow2.f32 %v2743_v22 }
0x12a4   : > { %v2856_v23 = vpop.xlane.xlu0 %2855 }
0x12a5   : > { %v2860_v37 = vsub.f32 %v5997_v2, %v2856_v23 }
0x12a7   : > { %v2862_v19 = vmul.f32 1.442695, %v2860_v37 }
0x12a8   : > { %v2859_v58 = vpop.xlane.xlu0 %2858 }
0x12a9   : > { %4869 = vpow2.f32 %v2862_v19  ;;  %v2861_v54 = vsub.f32 %v6001_v34, %v2859_v58 }
0x12ab   : > { %v6054_v49 = vpop.eup %4865  ;;  %v2864_v16 = vmul.f32 1.442695, %v2861_v54 }
0x12ac   : > { %v2745_v42 = vsel %vm1109_vm3, %v6054_v49, 0.0 }
0x12ad   : > { %v6058_v51 = vpop.eup %4867  ;;  %4871 = vpow2.f32 %v2864_v16  ;;  %2746 = vadd.xlane.f32.xlu1 %v2745_v42 }
0x12ae   : > { %v2980_v3 = vpop.xlane.xlu0 %2979  ;;  %v2748_v60 = vsel %vm1109_vm3, %v6058_v51, 0.0 }
0x12af   : > { %v2982_v27 = vsub.f32 %v6007_v43, %v2980_v3  ;;  %2749 = vadd.xlane.f32.xlu0 %v2748_v60 }
0x12b1   : > { %v2985_v29 = vmul.f32 1.442695, %v2982_v27 }
0x12b3   : > { %v6063_v2 = vpop.eup %4869  ;;  %4873 = vpow2.f32 %v2985_v29 }
0x12b4   : > { %v2866_v33 = vsel %vm1109_vm3, %v6063_v2, 0.0 }
0x12b5   : > { %2867 = vadd.xlane.f32.xlu1 %v2866_v33 }
0x12b6   : > { %v3132_v8 = vpop.xlane.xlu0 %3131 }
0x12b7   : > { %v6067_v34 = vpop.eup %4871  ;;  %v3134_v30 = vsub.f32 %v6015_v39, %v3132_v8 }
0x12b8   : > { %v2869_v24 = vsel %vm1109_vm3, %v6067_v34, 0.0 }
0x12b9   : > { %v3137_v21 = vmul.f32 1.442695, %v3134_v30  ;;  %2870 = vadd.xlane.f32.xlu0 %v2869_v24 }
0x12bb   : > { %4875 = vpow2.f32 %v3137_v21 }
0x12bd   : > { %v6072_v43 = vpop.eup %4873 }
0x12be   : > { %v2990_v41 = vsel %vm1109_vm3, %v6072_v43, 0.0  ;;  %v3254_v59 = vpop.xlane.xlu0 %3253 }
0x12bf   : > { %2991 = vadd.xlane.f32.xlu0 %v2990_v41  ;;  %v3256_v12 = vsub.f32 %v6021_v61, %v3254_v59 }
0x12c1   : > { %v3259_v13 = vmul.f32 1.442695, %v3256_v12 }
0x12c5   : > { %v6076_v6 = vpop.eup %4875 }
0x12c6   : > { %v3142_v48 = vsel %vm1109_vm3, %v6076_v6, 0.0  ;;  %v3375_v10 = vpop.xlane.xlu0 %3374 }
0x12c7   : > { %3143 = vadd.xlane.f32.xlu0 %v3142_v48  ;;  %v3377_v46 = vsub.f32 %v6027_v7, %v3375_v10 }
0x12c9   : > { %v3380_v45 = vmul.f32 1.442695, %v3377_v46 }
0x12ce   : > { %v3496_v32 = vpop.xlane.xlu0 %3495 }
0x12d1   : > { %v2977_v31 = vpop.xlane.xlu1 %2976 }
0x12d2   : > { %v2981_v39 = vsub.f32 %v6005_v26, %v2977_v31  ;;  %v2878_v29 = vpop.permute.xlu0 %2877 }
0x12d4   : > { %v2983_v57 = vmul.f32 1.442695, %v2981_v39 }
0x12d5   : > { %v3129_v62 = vpop.xlane.xlu1 %3128 }
0x12d6   : > { %4877 = vpow2.f32 %v2983_v57  ;;  %v3133_v1 = vsub.f32 %v6013_v52, %v3129_v62 }
0x12d8   : > { %v3135_v9 = vmul.f32 1.442695, %v3133_v1 }
0x12d9   : > { %v3251_v63 = vpop.xlane.xlu1 %3250 }
0x12da   : > { %4879 = vpow2.f32 %v3135_v9  ;;  %v3255_v36 = vsub.f32 %v6019_v28, %v3251_v63  ;;  %v3498_v28 = vsub.f32 %v6033_v11, %v3496_v32 }
0x12dc   : > { %v3257_v14 = vmul.f32 1.442695, %v3255_v36  ;;  %v3501_v17 = vmul.f32 1.442695, %v3498_v28 }
0x12dd   : > { %v3372_v40 = vpop.xlane.xlu1 %3371 }
0x12de   : > { %4881 = vpow2.f32 %v3257_v14  ;;  %v3376_v16 = vsub.f32 %v6025_v4, %v3372_v40 }
0x12df   : > { %4883 = vpow2.f32 %v3259_v13 }
0x12e0   : > { %v6085_v26 = vpop.eup %4877  ;;  %4885 = vpow2.f32 %v3380_v45  ;;  %v3378_v42 = vmul.f32 1.442695, %v3376_v16 }
0x12e1   : > { %v3493_v52 = vpop.xlane.xlu1 %3492  ;;  %v2987_v61 = vsel %vm1109_vm3, %v6085_v26, 0.0 }
0x12e2   : > { %v3497_v35 = vsub.f32 %v6031_v5, %v3493_v52  ;;  %2988 = vadd.xlane.f32.xlu1 %v2987_v61 }
0x12e4   : > { %v6090_v56 = vpop.eup %4879  ;;  %v3499_v7 = vmul.f32 1.442695, %v3497_v35 }
0x12e5   : > { %v3139_v38 = vsel %vm1109_vm3, %v6090_v56, 0.0  ;;  %v2999_v27 = vpop.permute.xlu1 %2998 }
0x12e6   : > { %3140 = vadd.xlane.f32.xlu1 %v3139_v38  ;;  %4887 = vpow2.f32 %v3499_v7 }
0x12e7   : > { %4889 = vpow2.f32 %v3501_v17 }
0x12e8   : > { %v6095_v55 = vpop.eup %4881  ;;  %4891 = vpow2.f32 %v3378_v42 }
0x12e9   : > { %v3261_v20 = vsel %vm1109_vm3, %v6095_v55, 0.0  ;;  %v6099_v22 = vpop.eup %4883 }
0x12ea   : > { %3262 = vadd.xlane.f32.xlu0 %v3261_v20  ;;  %v3264_v5 = vsel %vm1109_vm3, %v6099_v22, 0.0  ;;  %v6103_v11 = vpop.eup %4885 }
0x12eb   : > { %v3385_v23 = vsel %vm1109_vm3, %v6103_v11, 0.0 }
0x12ee   : > { %3265 = vadd.xlane.f32.xlu0 %v3264_v5 }
0x12f0   : > { %v6107_v37 = vpop.eup %4887 }
0x12f1   : > { %v3503_v19 = vsel %vm1109_vm3, %v6107_v37, 0.0  ;;  %v6111_v58 = vpop.eup %4889 }
0x12f2   : > { %3386 = vadd.xlane.f32.xlu0 %v3385_v23  ;;  %v3506_v54 = vsel %vm1109_vm3, %v6111_v58, 0.0  ;;  %v6120_v3 = vpop.eup %4891 }
0x12f3   : > { %v3382_v60 = vsel %vm1109_vm3, %v6120_v3, 0.0 }
0x12f6   : > { %3504 = vadd.xlane.f32.xlu0 %v3503_v19 }
0x12f7   : > { %3150 = vrot.lane.b32.xlu1 %v5912_v25, %s6497_s24  ;;  %s620_s24 = sand.u32 1, %s4983_s22  }
0x12fa   : > { %3507 = vadd.xlane.f32.xlu0 %v3506_v54 }
0x1310   : > { %3272 = vrot.lane.b32.xlu0 %v5912_v25, %s6498_s30 }
0x131b   : > { %3383 = vadd.xlane.f32.xlu1 %v3382_v60 }
0x132c   : > { %3393 = vrot.lane.b32.xlu1 %v5912_v25, %s6499_s0 }
0x1330   : > { %3514 = vrot.lane.b32.xlu1 %v5912_v25, %s6500_s27  ;;  %s4088_s27 = sshll.u32 %s620_s24, 6 }
0x133a   : > { %v2747_v4 = vpop.xlane.xlu1 %2746 }
0x133b   : > { %4893 = vrcp.f32 %v2747_v4 }
0x133c   : > { %v2750_v33 = vpop.xlane.xlu0 %2749 }
0x133d   : > { %4895 = vrcp.f32 %v2750_v33 }
0x1342   : > { %v2868_v8 = vpop.xlane.xlu1 %2867 }
0x1343   : > { %4897 = vrcp.f32 %v2868_v8 }
0x1345   : > { %v4894_v30 = vpop.eup %4893 }
0x1346   : > { %v2871_v24 = vpop.xlane.xlu0 %2870  ;;  %v2753_v41 = vmul.f32 %v4894_v30, %v6054_v49 }
0x1347   : > { %v4896_v21 = vpop.eup %4895  ;;  %4899 = vrcp.f32 %v2871_v24 }
0x1348   : > { %v2754_v48 = vmul.f32 %v4896_v21, %v6058_v51 }
0x134a   : > { %v2755_v31 = vpack.c.bf16 %v2754_v48, %v2753_v41 }
0x134c   : > { %4532 = vmatmul.mubr.msk.bf16.vlgmr.msra.gmra.mrb[48].mxu0 %vm1109_vm3, %v2755_v31  ;;  %v2992_v49 = vpop.xlane.xlu0 %2991 }
0x134d   : > { %4542 = vmatpush3.bf16.msra.mxu0 %v2878_v29  ;;  %4543 = vmatprep.mubr.msk.bf16.mxu0 %vm4994_vm1, %v4993_v50  ;;  %v4898_v25 = vpop.eup %4897  ;;  %4901 = vrcp.f32 %v2992_v49 }
0x134e   : > { %4553 = vmatprep.subr.bf16.mxu0 %v4993_v50  ;;  %v2874_v57 = vmul.f32 %v4898_v25, %v6063_v2 }
0x1351   : > { %v4900_v39 = vpop.eup %4899 }
0x1352   : > { %v2875_v59 = vmul.f32 %v4900_v39, %v6067_v34 }
0x1354   : > { %v2876_v62 = vpack.c.bf16 %v2875_v59, %v2874_v57  ;;  %v3144_v1 = vpop.xlane.xlu0 %3143 }
0x1356   : > { %4544 = vmatmul.mubr.msk.bf16.vlgmr.msra.gmra.mrb[52].mxu0 %vm1109_vm3, %v2876_v62 }
0x1357   : > { %4554 = vmatpush3.bf16.msra.mxu0 %v2999_v27  ;;  %4555 = vmatprep.mubr.msk.bf16.mxu0 %vm4994_vm1, %v4993_v50  ;;  %v4902_v9 = vpop.eup %4901 }
0x1358   : > { %4565 = vmatprep.subr.bf16.mxu0 %v4993_v50  ;;  %v2996_v10 = vmul.f32 %v4902_v9, %v6072_v43  ;;  %v4151_v9 = vld [vmem:[%s6423_s10 + $0x20] sm:$0xff] }
0x136f   : > { %v2989_v51 = vpop.xlane.xlu1 %2988 }
0x1370   : > { %4903 = vrcp.f32 %v2989_v51 }
0x1373   : > { %v3141_v12 = vpop.xlane.xlu1 %3140 }
0x1374   : > { %4905 = vrcp.f32 %v3141_v12 }
0x1375   : > { %4907 = vrcp.f32 %v3144_v1 }
0x1377   : > { %v3263_v2 = vpop.xlane.xlu0 %3262  ;;  %v3151_v14 = vpop.permute.xlu1 %3150 }
0x137a   : > { %v4904_v34 = vpop.eup %4903 }
0x137b   : > { %v2995_v63 = vmul.f32 %v4904_v34, %v6085_v26  ;;  %v3266_v36 = vpop.xlane.xlu0 %3265  ;;  %v4152_v34 = vld [vmem:[%s6423_s10 + $0x28] sm:$0xff] }
0x137c   : > { %4909 = vrcp.f32 %v3266_v36  ;;  %v4154_v36 = vld [vmem:[%s6423_s10 + $0x38] sm:$0xff] }
0x137d   : > { %v2997_v13 = vpack.c.bf16 %v2996_v10, %v2995_v63  ;;  %4911 = vrcp.f32 %v3263_v2  ;;  %v3598_v10 = vpack.c.bf16 %v4152_v34, %v4151_v9  ;;  %v4153_v63 = vld [vmem:[%s6423_s10 + $0x30] sm:$0xff] }
0x137e   : > { %v4906_v46 = vpop.eup %4905 }
0x137f   : > { %4556 = vmatmul.mubr.msk.bf16.vlgmr.msra.gmra.mrb[56].mxu0 %vm1109_vm3, %v2997_v13  ;;  %v3387_v40 = vpop.xlane.xlu0 %3386  ;;  %v4908_v45 = vpop.eup %4907  ;;  %v3147_v32 = vmul.f32 %v4906_v46, %v6090_v56  ;;  %4607 = vmatprep.subr.bf16.mxu1 %v3598_v10  ;;  %v3599_v46 = vpack.c.bf16 %v4154_v36, %v4153_v63 }
0x1380   : > { %4566 = vmatpush3.bf16.msra.mxu0 %v3151_v14  ;;  %4567 = vmatprep.mubr.msk.bf16.mxu0 %vm4994_vm1, %v4993_v50  ;;  %v3148_v43 = vmul.f32 %v4908_v45, %v6076_v6  ;;  %4913 = vrcp.f32 %v3387_v40 }
0x1381   : > { %4577 = vmatprep.subr.bf16.mxu0 %v4993_v50  ;;  %4608 = vmatpush3.bf16.msra.mxu1 %v3598_v10 }
0x1382   : > { %v3149_v52 = vpack.c.bf16 %v3148_v43, %v3147_v32  ;;  %4609 = vmatprep.subr.bf16.mxu1 %v3599_v46 }
0x1383   : > { %v3505_v26 = vpop.xlane.xlu0 %3504 }
0x1385   : > { %4610 = vmatpush3.bf16.msra.mxu1 %v3599_v46 }
0x1386   : > { %v4910_v61 = vpop.eup %4909 }
0x1387   : > { %4568 = vmatmul.mubr.msk.bf16.vlgmr.msra.gmra.mrb[60].mxu0 %vm1109_vm3, %v3149_v52  ;;  %v3508_v35 = vpop.xlane.xlu0 %3507  ;;  %v4912_v28 = vpop.eup %4911  ;;  %v3270_v7 = vmul.f32 %v4910_v61, %v6099_v22 }
0x1388   : > { %4579 = vmatprep.mubr.msk.bf16.mxu0 %vm4994_vm1, %v4993_v50  ;;  %v3269_v38 = vmul.f32 %v4912_v28, %v6095_v55 }
0x138a   : > { %v3271_v56 = vpack.c.bf16 %v3270_v7, %v3269_v38  ;;  %v4914_v55 = vpop.eup %4913 }
0x138b   : > { %v3273_v17 = vpop.permute.xlu0 %3272  ;;  %v3391_v5 = vmul.f32 %v4914_v55, %v6103_v11 }
0x138c   : > { %4578 = vmatpush3.bf16.msra.mxu0 %v3273_v17 }
0x138d   : > { %4589 = vmatprep.subr.bf16.mxu0 %v4993_v50 }
0x138f   : > { %4580 = vmatmul.mubr.msk.bf16.vlgmr.msra.gmra.mrb[64].mxu0 %vm1109_vm3, %v3271_v56 }
0x1390   : > { %4591 = vmatprep.mubr.msk.bf16.mxu0 %vm4994_vm1, %v4993_v50 }
0x13a8   : > { %v3384_v6 = vpop.xlane.xlu1 %3383 }
0x13a9   : > { %4915 = vrcp.f32 %v3384_v6 }
0x13aa   : > { %4917 = vrcp.f32 %v3508_v35 }
0x13ab   : > { %4919 = vrcp.f32 %v3505_v26 }
0x13ac   : > { %v3394_v20 = vpop.permute.xlu1 %3393 }
0x13ad   : > { %4590 = vmatpush3.bf16.msra.mxu0 %v3394_v20 }
0x13ae   : > { %4601 = vmatprep.subr.bf16.mxu0 %v4993_v50 }
0x13b0   : > { %v3515_v16 = vpop.permute.xlu1 %3514 }
0x13b3   : > { %v4916_v22 = vpop.eup %4915 }
0x13b4   : > { %v3390_v23 = vmul.f32 %v4916_v22, %v6120_v3  ;;  %v4918_v54 = vpop.eup %4917 }
0x13b5   : > { %v4920_v42 = vpop.eup %4919  ;;  %v3512_v60 = vmul.f32 %v4918_v54, %v6111_v58 }
0x13b6   : > { %v3392_v19 = vpack.c.bf16 %v3391_v5, %v3390_v23  ;;  %v3511_v27 = vmul.f32 %v4920_v42, %v6107_v37 }
0x13b8   : > { %4592 = vmatmul.mubr.msk.bf16.vlgmr.msra.gmra.mrb[68].mxu0 %vm1109_vm3, %v3392_v19  ;;  %v3513_v29 = vpack.c.bf16 %v3512_v60, %v3511_v27 }
0x13b9   : > { %4602 = vmatpush3.bf16.msra.mxu0 %v3515_v16  ;;  %4603 = vmatprep.mubr.msk.bf16.mxu0 %vm4994_vm1, %v4993_v50 }
0x13c0   : > { %4604 = vmatmul.mubr.msk.bf16.vlgmr.msra.gmra.mrb[72].mxu0 %vm1109_vm3, %v3513_v29 }
0x141f   : > { %v2796_v11 = vpop.f32.mrb[48].mxu0 }
0x1420   : > { %v4533_v4 = vpop.f32.mrb[49].mxu0 }
0x1421   : > { %v2799_v3 = vpop.f32.mrb[50].mxu0 }
0x1422   : > { %v4731_v33 = vpack.i.bf16 %v2799_v3, %v2796_v11  ;;  %v4534_v8 = vpop.f32.mrb[51].mxu0 }
0x1424   : > { %4732 = vrot.lane.b32.xlu1 %v4731_v33, %s5006_s1 }
0x1429   : > { %v2917_v30 = vpop.f32.mrb[52].mxu0 }
0x142a   : > { %v4545_v24 = vpop.f32.mrb[53].mxu0 }
0x142b   : > { %v2920_v21 = vpop.f32.mrb[54].mxu0 }
0x142c   : > { %v4736_v41 = vpack.i.bf16 %v2920_v21, %v2917_v30  ;;  %v4546_v48 = vpop.f32.mrb[55].mxu0 }
0x142e   : > { %4737 = vrot.lane.b32.xlu1 %v4736_v41, %s6501_s20 }
0x1452   : > { %v3038_v50 = vpop.f32.mrb[56].mxu0 }
0x1453   : > { %v4557_v58 = vpop.f32.mrb[57].mxu0 }
0x1454   : > { %v3041_v37 = vpop.f32.mrb[58].mxu0 }
0x1455   : > { %v4741_v31 = vpack.i.bf16 %v3041_v37, %v3038_v50  ;;  %v4558_v25 = vpop.f32.mrb[59].mxu0 }
0x1457   : > { %4742 = vrot.lane.b32.xlu1 %v4741_v31, %s6502_s23  ;;  %v4158_v31 = vld [vmem:[%s6424_s11 + $0x1] ss:$0 sm:$0xff] }
0x145a   : > { %v3190_v39 = vpop.f32.mrb[60].mxu0 }
0x145b   : > { %v4569_v57 = vpop.f32.mrb[61].mxu0 }
0x145c   : > { %v3193_v59 = vpop.f32.mrb[62].mxu0 }
0x145d   : > { %v4570_v62 = vpop.f32.mrb[63].mxu0 }
0x1462   : > { %v3312_v49 = vpop.f32.mrb[64].mxu0 }
0x1463   : > { %v4581_v51 = vpop.f32.mrb[65].mxu0 }
0x1464   : > { %v3315_v1 = vpop.f32.mrb[66].mxu0 }
0x1465   : > { %v4746_v12 = vpack.i.bf16 %v3315_v1, %v3312_v49  ;;  %v4582_v2 = vpop.f32.mrb[67].mxu0 }
0x1467   : > { %4747 = vrot.lane.b32.xlu1 %v4746_v12, %s5006_s1  ;;  %s622_s1 = scalar_lea.vmem [#allocation2], %s4088_s27  ;;  %s5010_s27 = smov [#allocation2]  }
0x1468   : > { %s4022_s3 = sshll.u32 %s622_s1, 4  ;;  %s6367_s3 = int_to_ptr.vmem [resolvable:$true] %s4022_s3 }
0x1469   : > { %s4929_s0 = scalar_lea.vmem %s6367_s3, 1024 }
0x146a   : > { %p4930_p11 = scmp.ne.s32.totalorder %s6367_s3, %s4929_s0 }
0x146c   : > { %p4931_p12 = pnand %p4930_p11, %p5155_p5 }
0x146e   : > { %p4932_p13 = pneg %p4931_p12 }
0x148b   : > { %v3433_v13 = vpop.f32.mrb[68].mxu0 }
0x148c   : > { %v4593_v14 = vpop.f32.mrb[69].mxu0 }
0x148d   : > { %v3436_v40 = vpop.f32.mrb[70].mxu0 }
0x148e   : > { %v4751_v45 = vpack.i.bf16 %v3436_v40, %v3433_v13  ;;  %v4594_v32 = vpop.f32.mrb[71].mxu0 }
0x1490   : > { %4752 = vrot.lane.b32.xlu0 %v4751_v45, %s6501_s20 }
0x1493   : > { %v3554_v43 = vpop.f32.mrb[72].mxu0 }
0x1494   : > { %v4605_v26 = vpop.f32.mrb[73].mxu0 }
0x1495   : > { %v3557_v52 = vpop.f32.mrb[74].mxu0 }
0x1496   : > { %v4756_v61 = vpack.i.bf16 %v3557_v52, %v3554_v43  ;;  %v4606_v35 = vpop.f32.mrb[75].mxu0  ;;  %v4733_v28 = vpop.permute.xlu1 %4732 }
0x1497   : > { %v4735_v38 = vunpack.i.h.bf16 %v4733_v28  ;;  %v4734_v17 = vunpack.i.l.bf16 %v4733_v28 }
0x1498   : > { %4757 = vrot.lane.b32.xlu1 %v4756_v61, %s6502_s23  ;;  %s4196_s23 = sshll.u32 %s5138_s2, 10  ;;  %s6371_s2 = scalar_lea.sflag [#allocation3], %s620_s24 }
0x1499   : > { %v3070_v55 = vsel %vm1061_vm2, %v5993_v47, %v4735_v38  ;;  %v3069_v22 = vsel %vm1061_vm2, %v5991_v0, %v4734_v17  ;;  %s6365_s30 = scalar_lea.hbm %s6503_s26, %s4196_s23  ;;  %s4933_s23 = sshll.u32 %s5010_s27, 4  ;;  %s4934_s23 = int_to_ptr.vmem [resolvable:$false] %s4933_s23 }
0x149a   : > { %s4935_s28 = scalar_lea.vmem %s4934_s23, 2048  ;;  %p4936_p0 = scmp.lt.s32.totalorder %s6367_s3, %s4934_s23 }
0x149b   : > { %p4937_p1 = scmp.lt.s32.totalorder %s4935_s28, %s4929_s0 }
0x149d   : > { %p4938_p2 = por %p4937_p1, %p4936_p0 }
0x149f   : > { %p4939_p3 = pnand %p4938_p2, %p4932_p13 }
0x14a0   : > { %v4738_v7 = vpop.permute.xlu1 %4737 }
0x14a1   : > { %v4740_v56 = vunpack.i.h.bf16 %v4738_v7  ;;  %v4739_v6 = vunpack.i.l.bf16 %v4738_v7 }
0x14a3   : > { %v3072_v19 = vsel %vm1109_vm3, %v3070_v55, %v4740_v56  ;;  %v3071_v54 = vsel %vm1109_vm3, %v3069_v22, %v4739_v6  ;;  %v4163_v6 = vld [vmem:[%s6427_s14 + $0x20] sm:$0xff]  ;;  %v4165_v22 = vld [vmem:[%s6427_s14 + $0x30] sm:$0xff] }
0x14c9   : > { %v4743_v20 = vpop.permute.xlu1 %4742 }
0x14ca   : > { %v4745_v5 = vunpack.i.h.bf16 %v4743_v20  ;;  %v4744_v23 = vunpack.i.l.bf16 %v4743_v20  ;;  %v4164_v20 = vld [vmem:[%s6427_s14 + $0x28] sm:$0xff] }
0x14cb   : > { %v3754_v55 = vpack.c.bf16 %v4164_v20, %v4163_v6  ;;  %v4186_v6 = vld [vmem:[%s6429_s16 + $0xf8] sm:$0xff] }
0x14cc   : > { %v3074_v16 = vsel %vm1572_vm4, %v3072_v19, %v4745_v5  ;;  %v3073_v42 = vsel %vm1572_vm4, %v3071_v54, %v4744_v23  ;;  %v4166_v5 = vld [vmem:[%s6427_s14 + $0x38] sm:$0xff]  ;;  %v4171_v19 = vld [vmem:[%s6429_s16 + $0x80] sm:$0xff]  ;;  %v4172_v54 = vld [vmem:[%s6429_s16 + $0x88] sm:$0xff] }
0x14cd   : > { %v3596_v60 = vpack.c.bf16 %v3074_v16, %v3073_v42  ;;  %4615 = vmatprep.subr.bf16.mxu0 %v3754_v55  ;;  %v3755_v23 = vpack.c.bf16 %v4166_v5, %v4165_v22  ;;  %v4173_v16 = vld [vmem:[%s6429_s16 + $0x90] sm:$0xff]  ;;  %v3842_v42 = vpack.c.bf16 %v4172_v54, %v4171_v19 }
0x14ce   : > { %4616 = vmatpush3.bf16.msra.mxu0 %v3754_v55  ;;  %v4168_v55 = vld [vmem:[%s6428_s15 + $0x1] ss:$0 sm:$0xff] }
0x14cf   : > { %4611 = vmatprep.mubr.msk.bf16.mxu1 %vm834_vm0, %v3596_v60  ;;  %4617 = vmatprep.subr.bf16.mxu0 %v3755_v23  ;;  %v4174_v60 = vld [vmem:[%s6429_s16 + $0x98] sm:$0xff] }
0x14d0   : > { %4623 = vmatprep.subr.bf16.mxu1 %v3842_v42 }
0x14d2   : > { %4618 = vmatpush3.bf16.msra.mxu0 %v3755_v23 }
0x14d9   : > { %v4748_v27 = vpop.permute.xlu1 %4747 }
0x14da   : > { %v4750_v11 = vunpack.i.h.bf16 %v4748_v27  ;;  %v4749_v47 = vunpack.i.l.bf16 %v4748_v27  ;;  %v3843_v27 = vpack.c.bf16 %v4174_v60, %v4173_v16 }
0x14dc   : > { %v3586_v33 = vsel %vm1061_vm2, %v3193_v59, %v4750_v11  ;;  %v3585_v8 = vsel %vm1061_vm2, %v3190_v39, %v4749_v47  ;;  %v4176_v11 = vld [vmem:[%s6429_s16 + $0xa8] sm:$0xff] }
0x1502   : > { %v4753_v29 = vpop.permute.xlu0 %4752 }
0x1503   : > { %v4755_v4 = vunpack.i.h.bf16 %v4753_v29  ;;  %v4754_v3 = vunpack.i.l.bf16 %v4753_v29  ;;  %v4175_v29 = vld [vmem:[%s6429_s16 + $0xa0] sm:$0xff] }
0x1504   : > { %v3844_v47 = vpack.c.bf16 %v4176_v11, %v4175_v29 }
0x1505   : > { %v3588_v21 = vsel %vm1109_vm3, %v3586_v33, %v4755_v4  ;;  %v3587_v41 = vsel %vm1109_vm3, %v3585_v8, %v4754_v3  ;;  %v4177_v4 = vld [vmem:[%s6429_s16 + $0xb0] sm:$0xff]  ;;  %v4178_v3 = vld [vmem:[%s6429_s16 + $0xb8] sm:$0xff]  ;;  %v4179_v33 = vld [vmem:[%s6429_s16 + $0xc0] sm:$0xff] }
0x1506   : > { %v4180_v8 = vld [vmem:[%s6429_s16 + $0xc8] sm:$0xff] }
0x150a   : > { %v4758_v0 = vpop.permute.xlu1 %4757 }
0x150b   : > { %v4760_v30 = vunpack.i.h.bf16 %v4758_v0  ;;  %v4759_v24 = vunpack.i.l.bf16 %v4758_v0  ;;  %v3845_v0 = vpack.c.bf16 %v4178_v3, %v4177_v4 }
0x150d   : > { %v3590_v48 = vsel %vm1572_vm4, %v3588_v21, %v4760_v30  ;;  %v3589_v50 = vsel %vm1572_vm4, %v3587_v41, %v4759_v24  ;;  %v3846_v30 = vpack.c.bf16 %v4180_v8, %v4179_v33  ;;  %v4181_v24 = vld [vmem:[%s6429_s16 + $0xd0] sm:$0xff]  ;;  %v4182_v21 = vld [vmem:[%s6429_s16 + $0xd8] sm:$0xff] }
0x150e   : > { %v3597_v58 = vpack.c.bf16 %v3590_v48, %v3589_v50  ;;  %v3847_v41 = vpack.c.bf16 %v4182_v21, %v4181_v24  ;;  %v3918_v33 = vld [vmem:[%s6431_s18 + $0x18] sm:$0xff]  ;;  %v3917_v24 = vld [vmem:[%s6431_s18 + $0x10] sm:$0xff] }
0x1510   : > { %4612 = vmatmul.mubr.msk.bf16.vlgmr.msra.gmra.mrb[84].mxu1 %vm834_vm0, %v3597_v58 }
0x1511   : > { %4624 = vmatpush3.bf16.msra.mxu1 %v3842_v42 }
0x1512   : > { %4625 = vmatprep.subr.bf16.mxu1 %v3843_v27 }
0x1515   : > { %4626 = vmatpush3.bf16.msra.mxu1 %v3843_v27 }
0x1516   : > { %4627 = vmatprep.subr.bf16.mxu1 %v3844_v47 }
0x1519   : > { %4628 = vmatpush3.bf16.msra.mxu1 %v3844_v47 }
0x151a   : > { %4629 = vmatprep.subr.bf16.mxu1 %v3845_v0 }
0x151d   : > { %4630 = vmatpush3.bf16.msra.mxu1 %v3845_v0  ;;  %v3916_v0 = vld [vmem:[%s6431_s18 + $0x8] sm:$0xff] }
0x151e   : > { %4631 = vmatprep.subr.bf16.mxu1 %v3846_v30  ;;  %v3926_v8 = vpack.c.bf16 %v3918_v33, %v3916_v0 }
0x1520   : > { %3947 = vmatprep.subr.bf16.mxu0 %v3926_v8 }
0x1521   : > { %4632 = vmatpush3.bf16.msra.mxu1 %v3846_v30  ;;  %v3915_v30 = vld [vmem:[%s6431_s18] sm:$0xff] }
0x1522   : > { %4633 = vmatprep.subr.bf16.mxu1 %v3847_v41  ;;  %v3925_v21 = vpack.c.bf16 %v3917_v24, %v3915_v30 }
0x1525   : > { %4634 = vmatpush3.bf16.msra.mxu1 %v3847_v41  ;;  %v3920_v41 = vld [vmem:[%s6431_s18 + $0x28] sm:$0xff] }
0x15e3   : > { %v4613_v37 = vpop.f32.mrb[84].mxu1 }
0x15e4   : > { %v3640_v25 = vpop.f32.mrb[85].mxu1  ;;  %v3657_v39 = vadd.f32 %v4613_v37, %v5864_v53 }
0x15e5   : > { %v3655_v57 = vadd.f32 %v3640_v25, %v5860_v15  ;;  %v4614_v59 = vpop.f32.mrb[86].mxu1 }
0x15e6   : > { %v3643_v62 = vpop.f32.mrb[87].mxu1  ;;  %v6208_v1 = vadd.f32 %v4158_v31, %v3657_v39  ;;  %v3658_v12 = vadd.f32 %v4614_v59, %v5870_v18 }
0x15e7   : > { %v6205_v49 = vadd.f32 %v4158_v31, %v3655_v57  ;;  %v3656_v51 = vadd.f32 %v3643_v62, %v5866_v44 }
0x15e8   : > { %v6217_v15 = vadd.f32 %v4158_v31, %v3658_v12  ;;  %v3681_v34 = vsel %vm834_vm0, %v6208_v1, 0.0 }
0x15e9   : > { %v6211_v2 = vadd.f32 %v4158_v31, %v3656_v51  ;;  %v3675_v9 = vsel %vm834_vm0, %v6205_v49, 0.0 }
0x15ea   : > { %3676 = vadd.xlane.f32.xlu0 %v3675_v9  ;;  %v3684_v44 = vsel %vm834_vm0, %v6217_v15, 0.0 }
0x15eb   : > { %v3678_v53 = vsel %vm834_vm0, %v6211_v2, 0.0 }
0x15ec   : > { %3679 = vadd.xlane.f32.xlu1 %v3678_v53  ;;  %v4161_v53 = vld [vmem:[%s6425_s12 + $0x1] ss:$0 sm:$0xff] }
0x15ee   : > { %3682 = vadd.xlane.f32.xlu0 %v3681_v34 }
0x15f2   : > { %3685 = vadd.xlane.f32.xlu0 %v3684_v44 }
0x1677   : > { %v3677_v18 = vpop.xlane.xlu0 %3676 }
0x1678   : > { %v3687_v10 = vmul.f32 0.03125, %v3677_v18 }
0x1679   : > { %v3680_v63 = vpop.xlane.xlu1 %3679 }
0x167a   : > { %v6224_v36 = vsub.f32 %v6205_v49, %v3687_v10  ;;  %v3688_v13 = vmul.f32 0.03125, %v3680_v63 }
0x167b   : > { %v3683_v46 = vpop.xlane.xlu0 %3682 }
0x167c   : > { %v6227_v14 = vsub.f32 %v6211_v2, %v3688_v13  ;;  %v3689_v40 = vmul.f32 0.03125, %v3683_v46  ;;  %v3695_v45 = vmul.f32 %v6224_v36, %v6224_v36  ;;  %v4162_v13 = vld [vmem:[%s6426_s13 + $0x1] ss:$0 sm:$0xff] }
0x167e   : > { %v6232_v32 = vsub.f32 %v6208_v1, %v3689_v40  ;;  %v3699_v43 = vsel %vm834_vm0, %v3695_v45, 0.0  ;;  %v3696_v26 = vmul.f32 %v6227_v14, %v6227_v14 }
0x167f   : > { %3700 = vadd.xlane.f32.xlu0 %v3699_v43  ;;  %v3686_v52 = vpop.xlane.xlu0 %3685 }
0x1680   : > { %v3690_v61 = vmul.f32 0.03125, %v3686_v52  ;;  %v3702_v35 = vsel %vm834_vm0, %v3696_v26, 0.0  ;;  %v3697_v28 = vmul.f32 %v6232_v32, %v6232_v32 }
0x1681   : > { %3703 = vadd.xlane.f32.xlu1 %v3702_v35 }
0x1682   : > { %v6241_v7 = vsub.f32 %v6217_v15, %v3690_v61  ;;  %v3705_v38 = vsel %vm834_vm0, %v3697_v28, 0.0 }
0x1683   : > { %3706 = vadd.xlane.f32.xlu0 %v3705_v38 }
0x1684   : > { %v3698_v17 = vmul.f32 %v6241_v7, %v6241_v7 }
0x1686   : > { %v3708_v56 = vsel %vm834_vm0, %v3698_v17, 0.0  ;;  %v4184_v17 = vld [vmem:[%s6429_s16 + $0xe8] sm:$0xff] }
0x1687   : > { %3709 = vadd.xlane.f32.xlu1 %v3708_v56 }
0x170c   : > { %v3701_v48 = vpop.xlane.xlu0 %3700 }
0x170d   : > { %v3711_v50 = vmul.f32 0.03125, %v3701_v48  ;;  %v3922_v48 = vld [vmem:[%s6431_s18 + $0x38] sm:$0xff] }
0x170e   : > { %v3704_v58 = vpop.xlane.xlu1 %3703 }
0x170f   : > { %v3715_v37 = vadd.f32 1e-05, %v3711_v50  ;;  %v3712_v31 = vmul.f32 0.03125, %v3704_v58  ;;  %v3928_v50 = vpack.c.bf16 %v3922_v48, %v3920_v41  ;;  %v3919_v58 = vld [vmem:[%s6431_s18 + $0x20] sm:$0xff] }
0x1710   : > { %v3707_v25 = vpop.xlane.xlu0 %3706 }
0x1711   : > { %4921 = vrsqrt.f32 %v3715_v37  ;;  %v3716_v39 = vadd.f32 1e-05, %v3712_v31  ;;  %v3713_v57 = vmul.f32 0.03125, %v3707_v25  ;;  %v3921_v37 = vld [vmem:[%s6431_s18 + $0x30] sm:$0xff]  ;;  %v5009_v25 = vmov 0  }
0x1712   : > { %v3927_v31 = vpack.c.bf16 %v3921_v37, %v3919_v58 }
0x1713   : > { %4923 = vrsqrt.f32 %v3716_v39  ;;  %v3717_v59 = vadd.f32 1e-05, %v3713_v57 }
0x1714   : > { %v3710_v62 = vpop.xlane.xlu1 %3709 }
0x1715   : > { %4925 = vrsqrt.f32 %v3717_v59  ;;  %v3714_v51 = vmul.f32 0.03125, %v3710_v62  ;;  %v4188_v62 = vld [vmem:[%s6430_s17 + $0x1] ss:$0 sm:$0xff] }
0x1717   : > { %v3718_v12 = vadd.f32 1e-05, %v3714_v51 }
0x1719   : > { %4927 = vrsqrt.f32 %v3718_v12 }
0x171b   : > { %v4922_v9 = vpop.eup %4921 }
0x171c   : > { %v3723_v34 = vmul.f32 %v4922_v9, %v6224_v36 }
0x171d   : > { %v4924_v44 = vpop.eup %4923 }
0x171e   : > { %v3724_v18 = vmul.f32 %v4924_v44, %v6227_v14  ;;  %v3733_v10 = vmul.f32 %v4161_v53, %v3723_v34 }
0x171f   : > { %v4926_v63 = vpop.eup %4925 }
0x1720   : > { %v3725_v46 = vmul.f32 %v4926_v63, %v6232_v32  ;;  %v3734_v40 = vmul.f32 %v4161_v53, %v3724_v18  ;;  %v3743_v45 = vadd.f32 %v4162_v13, %v3733_v10  ;;  %v4183_v32 = vld [vmem:[%s6429_s16 + $0xe0] sm:$0xff] }
0x1721   : > { %v3848_v56 = vpack.c.bf16 %v4184_v17, %v4183_v32 }
0x1722   : > { %v3744_v43 = vadd.f32 %v4162_v13, %v3734_v40  ;;  %v3735_v52 = vmul.f32 %v4161_v53, %v3725_v46 }
0x1723   : > { %v4928_v26 = vpop.eup %4927  ;;  %4635 = vmatprep.subr.bf16.mxu1 %v3848_v56 }
0x1724   : > { %v3726_v61 = vmul.f32 %v4928_v26, %v6241_v7  ;;  %v3752_v35 = vpack.c.bf16 %v3744_v43, %v3743_v45  ;;  %v3745_v14 = vadd.f32 %v4162_v13, %v3735_v52  ;;  %4636 = vmatpush3.bf16.msra.mxu1 %v3848_v56  ;;  %v4185_v7 = vld [vmem:[%s6429_s16 + $0xf0] sm:$0xff] }
0x1725   : > { %v3849_v20 = vpack.c.bf16 %v4186_v6, %v4185_v7 }
0x1726   : > { %v3736_v36 = vmul.f32 %v4161_v53, %v3726_v61  ;;  %4619 = vmatprep.mubr.msk.bf16.mxu0 %vm834_vm0, %v3752_v35 }
0x1727   : > { %4637 = vmatprep.subr.bf16.mxu1 %v3849_v20 }
0x1728   : > { %v3746_v28 = vadd.f32 %v4162_v13, %v3736_v36  ;;  %4638 = vmatpush3.bf16.msra.mxu1 %v3849_v20 }
0x172a   : > { %v3753_v38 = vpack.c.bf16 %v3746_v28, %v3745_v14 }
0x172c   : > { %4620 = vmatmul.mubr.msk.bf16.vlgmr.msra.gmra.mrb[76].mxu0 %vm834_vm0, %v3753_v38 }
0x172d   : > { %3948 = vmatpush1.bf16.msra.mxu0 %v3925_v21  ;;  %3979 = vmatprep.mubr.bf16.mxu0 %v5009_v25 }
0x172e   : > { %3949 = vmatprep.subr.bf16.mxu0 %v3928_v50 }
0x1731   : > { %3950 = vmatpush1.bf16.msra.mxu0 %v3927_v31 }
0x17ff   : > { %v4621_v22 = vpop.f32.mrb[76].mxu0 }
0x1800   : > { %v3813_v5 = vadd.f32 %v4621_v22, %v4168_v55  ;;  %v3804_v23 = vpop.f32.mrb[77].mxu0 }
0x1801   : > { %v3805_v19 = vadd.f32 %v4168_v55, %v3804_v23  ;;  %v4622_v54 = vpop.f32.mrb[78].mxu0 }
0x1802   : > { %v3816_v16 = vadd.f32 %v4622_v54, %v4168_v55  ;;  %v3807_v42 = vpop.f32.mrb[79].mxu0  ;;  %v3821_v27 = vmax.f32 %v3813_v5, 0.0 }
0x1803   : > { %v3808_v60 = vadd.f32 %v4168_v55, %v3807_v42  ;;  %v3819_v11 = vmax.f32 %v3805_v19, 0.0 }
0x1804   : > { %v3822_v29 = vmax.f32 %v3816_v16, 0.0 }
0x1805   : > { %v3820_v47 = vmax.f32 %v3808_v60, 0.0 }
0x1806   : > { %v3841_v4 = vpack.c.bf16 %v3822_v29, %v3821_v27 }
0x1807   : > { %v3840_v3 = vpack.c.bf16 %v3820_v47, %v3819_v11 }
0x1809   : > { %4639 = vmatprep.mubr.bf16.mxu1 %v3840_v3 }
0x180a   : > { %4640 = vmatmul.mubr.bf16.vlgmr.msra.gmra.mrb[88].mxu1 %v3841_v4 }
0x18dd   : > { %v4641_v39 = vpop.f32.mrb[88].mxu1 }
0x18de   : > { %v3901_v57 = vadd.f32 %v4641_v39, %v6208_v1  ;;  %v3884_v59 = vpop.f32.mrb[89].mxu1 }
0x18df   : > { %v3899_v51 = vadd.f32 %v3884_v59, %v6205_v49  ;;  %v4642_v12 = vpop.f32.mrb[90].mxu1  ;;  %v3931_v49 = vlaneseq }
0x18e0   : > { %v3902_v9 = vadd.f32 %v4642_v12, %v6217_v15  ;;  %v3887_v53 = vpop.f32.mrb[91].mxu1  ;;  %v3913_v44 = vadd.f32 %v4188_v62, %v3901_v57 }
0x18e1   : > { %v3900_v34 = vadd.f32 %v3887_v53, %v6211_v2  ;;  %v3911_v10 = vadd.f32 %v4188_v62, %v3899_v51  ;;  %v3932_v46 = vshrl.u32 %v3931_v49, 7  ;;  %v3929_v2 = vld [vmem:[%s6432_s19] sm:$0x3] }
0x18e2   : > { %v3914_v18 = vadd.f32 %v4188_v62, %v3902_v9 }
0x18e3   : > { %v3912_v63 = vadd.f32 %v4188_v62, %v3900_v34  ;;  %v3933_v40 = vsub.s32 0, %v3932_v46  ;;  %v3937_v15 = vsub.s32 1, %v3932_v46 }
0x18e4   : > { %v3924_v1 = vpack.c.bf16 %v3914_v18, %v3913_v44 }
0x18e5   : > { %v3923_v13 = vpack.c.bf16 %v3912_v63, %v3911_v10  ;;  %v3934_v45 = vrot.slane %v3929_v2, %v3933_v40  ;;  %v3938_v43 = vrot.slane %v3929_v2, %v3937_v15 }
0x18e7   : > { %4189 = vmatmul.mubr.msk.bf16.vlgmr.msra.gmra.mrb[80].mxu0 %vm834_vm0, %v3923_v13 }
0x18e8   : > { %3989 = vmatprep.mubr.bf16.mxu0 %v5009_v25 }
0x18ef   : > { %4190 = vmatmul.mubr.msk.bf16.gmra.mrb[84].mxu0 %vm834_vm0, %v3924_v1 }
0x19ba   : > { %v3981_v26 = vpop.f32.mrb[80].mxu0 }
0x19bb   : > { %v3982_v52 = vadd.f32 %v3981_v26, %v3934_v45  ;;  %v3983_v61 = vpop.f32.mrb[81].mxu0 }
0x19bc   : > { %v3984_v35 = vadd.f32 %v3983_v61, %v3938_v43  ;;  %v3985_v36 = vpop.f32.mrb[82].mxu0 }
0x19bd   : > { %4000 = vst [vmem:[%s622_s1] sm:$0xff] %v3982_v52  ;;  %v3986_v14 = vadd.f32 %v3985_v36, %v3934_v45  ;;  %v3987_v28 = vpop.f32.mrb[83].mxu0 }
0x19be   : > { %4001 = vst [vmem:[%s622_s1 + $0x8] sm:$0xff] %v3984_v35  ;;  %v3988_v38 = vadd.f32 %v3987_v28, %v3938_v43 }
0x19bf   : > { %4002 = vst [vmem:[%s622_s1 + $0x10] sm:$0xff] %v3986_v14 }
0x19c0   : > { %4003 = vst [vmem:[%s622_s1 + $0x18] sm:$0xff] %v3988_v38 }
0x19c2   : > { %v3991_v32 = vpop.f32.mrb[84].mxu0 }
0x19c3   : > { %v3992_v17 = vadd.f32 %v3991_v32, %v3934_v45  ;;  %v3993_v56 = vpop.f32.mrb[85].mxu0 }
0x19c4   : > { %v3994_v7 = vadd.f32 %v3993_v56, %v3938_v43  ;;  %v3995_v6 = vpop.f32.mrb[86].mxu0 }
0x19c5   : > { %4004 = vst [vmem:[%s622_s1 + $0x20] sm:$0xff] %v3992_v17  ;;  %v3996_v20 = vadd.f32 %v3995_v6, %v3934_v45  ;;  %v3997_v55 = vpop.f32.mrb[87].mxu0 }
0x19c6   : > { %4005 = vst [vmem:[%s622_s1 + $0x28] sm:$0xff] %v3994_v7  ;;  %v3998_v22 = vadd.f32 %v3997_v55, %v3938_v43 }
0x19c7   : > { %4006 = vst [vmem:[%s622_s1 + $0x30] sm:$0xff] %v3996_v20 }
0x19c8   : > { %4007 = vst [vmem:[%s622_s1 + $0x38] sm:$0xff] %v3998_v22 }
0x19c9   : > { %4942 = shalt.err (!%p4939_p3)
}
0x19ca   : > { %s4943_s24 = scalar_lea.hbm %s6365_s30, 1024  ;;  %s4947_s27 = scalar_lea.hbm %s6503_s26, 2048 }
0x19cb   : > { %p4944_p4 = scmp.ne.s32.totalorder %s6365_s30, %s4943_s24  ;;  %p4948_p9 = scmp.lt.u32.totalorder %s6365_s30, %s6503_s26 }
0x19cc   : > { %p4949_p10 = scmp.lt.u32.totalorder %s4947_s27, %s4943_s24  ;;  %p4951_p12 = scmp.lt.u32.totalorder %s4943_s24, %s6365_s30 }
0x19cd   : > { %p4945_p7 = pnand %p4944_p4, %p5155_p5 }
0x19ce   : > { %p4950_p11 = por %p4949_p10, %p4948_p9 }
0x19cf   : > { %p4946_p8 = pneg %p4945_p7 }
0x19d0   : > { %p4952_p13 = por %p4951_p12, %p4950_p11 }
0x19d2   : > { %p4953_p0 = pnand %p4952_p13, %p4946_p8 }
0x19d4   : > { %4956 = shalt.err (!%p4953_p0)
}
0x19d5   : > { %s5011_s0 = smov 256  }
0x19d6   : > { %4644 = dma.vmem_to_hbm [thread:$0]  (%p5155_p5), %s6367_s3, 1024, %s6365_s30, %s6371_s2, %s5011_s0, %s5011_s0, %s6501_s20  }
0x19d7 PF: > { %s6504_s28 = sld [smem:[#allocation7_spill]]  ;;  %s6505_s1 = sld [smem:[#allocation5_spill]] }
0x19dd   : > { %p4650_p1 = scmp.ge.s32.totalorder %s6504_s28, 2  ;;  %s4037_s5 = sand.u32 1, %s6505_s1  }
0x19de   : > { %s4038_s24 = scalar_lea.sflag [#allocation3], %s4037_s5 }
0x19df   : > { %p4647_p2 = pnand %p4650_p1, %p5159_p6 }
0x19e1   : > { %4974 = dma.done.wait (!%p4647_p2), %s4038_s24, 1024  }
0x19e2   : > { %4976 = vsyncadd (!%p4647_p2), %s4038_s24, 4294966272  ;;  %s6507_s24 = sld [smem:[#allocation8_spill]]  ;;  %s6508_s27 = sld [smem:[#allocation6_spill]] }
0x19e3   : > { %s6509_s23 = sld [smem:[#allocation9_spill]]  ;;  %s6510_s1 = smov %s4983_s22 }
0x19e8   : > { %p30_p3 = scmp.ge.s32.totalorder %s6507_s24, 4   ;;  %s6511_s22 = smov %s6508_s27 }
0x19ea   :  { %32 = sbr.rel (!%p30_p3) target bundleno = 11 (0xb), region = 147 }
0x19f1   :  { %4043 = vsyncpa [#allocation3], 1 }
0x19f2   :  { %4045 = vsyncpa [#allocation3 + $0x1], 1 }

</bundles_post_ra>
